<compile_context>
chip_gen: v7x
topology: tpu7x:2x2x1
jax: 0.10.0
libtpu: 0.0.40
codegen_flags: <defaults>
</compile_context>

<pallas_src>
import functools

import jax
import jax.numpy as jnp
from jax.experimental import pallas as pl
from jax.experimental.pallas import tpu as pltpu


# ----------------------------------------------------------------------------
# Helpers
# ----------------------------------------------------------------------------
@functools.lru_cache(maxsize=None)
def _vmem_limit_bytes():
    """Per-generation VMEM budget: <= 3/4 of physical VMEM (48 MiB on v7x,
    96 MiB on v5e/v6e); conservative 32 MiB fallback if the query fails."""
    try:
        cap = int(pltpu.get_tpu_info().vmem_capacity_bytes)
        return min(96 << 20, (cap * 3) // 4)
    except Exception:
        return 32 << 20


def _compiler_params(semantics):
    return pltpu.CompilerParams(
        dimension_semantics=semantics,
        vmem_limit_bytes=_vmem_limit_bytes(),
    )


def _largest_divisor(total, target, multiple=1):
    """Largest divisor of `total` that is <= target and a multiple of `multiple`;
    falls back to `total` (full-extent block) if none exists."""
    for d in range(min(total, target), 0, -1):
        if total % d == 0 and d % multiple == 0:
            return d
    return total


def _spatial_tile(total, target):
    """Divisor of `total` that is a multiple of 8 (sublane aligned) and <= target,
    else the full extent (full-dim blocks are always legal)."""
    if total <= target:
        return total
    for d in range(min(total, target), 7, -1):
        if total % d == 0 and d % 8 == 0:
            return d
    return total


# ----------------------------------------------------------------------------
# Fused linear (x @ w + b) with optional relu / log_softmax epilogue
# ----------------------------------------------------------------------------
def _linear_kernel(x_ref, w_ref, b_ref, o_ref, *, activation):
    acc = jnp.dot(x_ref[...], w_ref[...], preferred_element_type=jnp.float32)
    acc = acc + b_ref[...].astype(jnp.float32)
    if activation == "relu":
        acc = jnp.maximum(acc, 0.0)
    elif activation == "log_softmax":
        m = jnp.max(acc, axis=-1, keepdims=True)
        s = acc - m
        lse = jnp.log(jnp.sum(jnp.exp(s), axis=-1, keepdims=True))
        acc = s - lse
    o_ref[...] = acc.astype(o_ref.dtype)


def linear(x, w, b, activation="none", tm=256, tn=None, out_dtype=None):
    """x: (M, K) bf16, w: (K, N) bf16, b: (N,) f32 -> (M, N) out_dtype.

    Tiled over rows (M) and output columns (N); K kept whole (classifier K<=4096).
    The weight block index is independent of the row axis; both axes parallel.
    """
    M, K = x.shape
    K2, N = w.shape
    assert K == K2
    if out_dtype is None:
        out_dtype = x.dtype
    if activation == "log_softmax":
        # softmax must see the whole row in one block
        assert tn is None or tn == N
        tn = N
    if tn is None or tn > N or N % tn != 0:
        tn = N

    # Pad rows to a multiple of 8 sublanes (MXU-friendly; batch=2 -> 8).
    Mp = ((M + 7) // 8) * 8
    if Mp != M:
        x = jnp.pad(x, ((0, Mp - M), (0, 0)))
    tm_ = _largest_divisor(Mp, max(tm, 8), multiple=8)

    grid = (Mp // tm_, N // tn)
    y = pl.pallas_call(
        functools.partial(_linear_kernel, activation=activation),
        out_shape=jax.ShapeDtypeStruct((Mp, N), out_dtype),
        grid=grid,
        in_specs=[
            pl.BlockSpec((tm_, K), lambda i, j: (i, 0)),
            pl.BlockSpec((K, tn), lambda i, j: (0, j)),   # independent of row tile
            pl.BlockSpec((1, tn), lambda i, j: (0, j)),
        ],
        out_specs=pl.BlockSpec((tm_, tn), lambda i, j: (i, j)),  # lane-dense
        compiler_params=_compiler_params(("parallel", "parallel")),
    )(x, w, b.reshape(1, N))
    return y[:M]


# ----------------------------------------------------------------------------
# 3x3 conv (pad=1, stride=1) + ReLU: in-kernel 9-tap accumulation (no im2col)
# ----------------------------------------------------------------------------
def _conv3x3_kernel(x_ref, w_ref, b_ref, o_ref, *, H, W):
    # x_ref: (H+2, W+2, Cin) padded activation (single VMEM copy)
    # w_ref: (3, 3, Cin, tco), b_ref: (1, tco), o_ref: (H, W, tco)
    cin = x_ref.shape[-1]
    tco = o_ref.shape[-1]
    acc = jnp.zeros((H * W, tco), jnp.float32)
    for dh in range(3):
        for dw in range(3):
            tap = x_ref[dh:dh + H, dw:dw + W, :].reshape(H * W, cin)
            acc = acc + jnp.dot(tap, w_ref[dh, dw],
                                preferred_element_type=jnp.float32)
    acc = jnp.maximum(acc + b_ref[...].astype(jnp.float32), 0.0)
    o_ref[...] = acc.reshape(H, W, tco).astype(o_ref.dtype)


def conv3x3_relu(x, w, b):
    """x: (N, H, W, Cin) bf16, w: (3, 3, Cin, Cout) bf16, b: (Cout,) f32."""
    N, H, W, Cin = x.shape
    Cout = w.shape[-1]
    xp = jnp.pad(x, ((0, 0), (1, 1), (1, 1), (0, 0)))  # one padded copy, ~1x traffic

    # Cout tile: full if small, else a 128-aligned divisor (bounds accumulator VMEM).
    if Cout <= 256:
        tco = Cout
    elif Cout % 256 == 0:
        tco = 256
    elif Cout % 128 == 0:
        tco = 128
    else:
        tco = Cout

    grid = (N, Cout // tco)
    return pl.pallas_call(
        functools.partial(_conv3x3_kernel, H=H, W=W),
        out_shape=jax.ShapeDtypeStruct((N, H, W, Cout), x.dtype),
        grid=grid,
        in_specs=[
            pl.BlockSpec((None, H + 2, W + 2, Cin), lambda n, c: (n, 0, 0, 0)),
            pl.BlockSpec((3, 3, Cin, tco), lambda n, c: (0, 0, 0, c)),
            pl.BlockSpec((1, tco), lambda n, c: (0, c)),
        ],
        out_specs=pl.BlockSpec((None, H, W, tco), lambda n, c: (n, 0, 0, c)),
        compiler_params=_compiler_params(("parallel", "parallel")),
    )(xp, w, b.reshape(1, Cout))


# ----------------------------------------------------------------------------
# 2x2 / stride-2 max pool (no strided HBM copies; max taken in-kernel)
# ----------------------------------------------------------------------------
def _maxpool_kernel(x_ref, o_ref):
    x = x_ref[...]                    # (tr, 2, Wo, 2, C)
    m = jnp.max(x, axis=1)            # (tr, Wo, 2, C)
    o_ref[...] = jnp.max(m, axis=2)   # (tr, Wo, C)


def maxpool2x2(x):
    """x: (N, H, W, C) -> (N, H//2, W//2, C). H, W assumed even (VGG sizes)."""
    N, H, W, C = x.shape
    Ho, Wo = H // 2, W // 2
    R = N * Ho
    xr = x.reshape(R, 2, Wo, 2, C)    # contiguous reshape: free, no copies
    per_row_bytes = (2 * Wo * 2 * C + Wo * C) * x.dtype.itemsize
    tr = _largest_divisor(R, max(1, (1 << 20) // per_row_bytes))
    y = pl.pallas_call(
        _maxpool_kernel,
        out_shape=jax.ShapeDtypeStruct((R, Wo, C), x.dtype),
        grid=(R // tr,),
        in_specs=[pl.BlockSpec((tr, 2, Wo, 2, C), lambda r: (r, 0, 0, 0, 0))],
        out_specs=pl.BlockSpec((tr, Wo, C), lambda r: (r, 0, 0)),
        compiler_params=_compiler_params(("parallel",)),
    )(xr)
    return y.reshape(N, Ho, Wo, C)


# ----------------------------------------------------------------------------
# AdaptiveAvgPool2d((1,1)) + flatten: tiled spatial reduction with f32 accumulator
# ----------------------------------------------------------------------------
def _avgpool_kernel(x_ref, o_ref, acc_ref, *, inv_hw):
    s = pl.program_id(1)

    @pl.when(s == 0)
    def _():
        acc_ref[...] = jnp.zeros_like(acc_ref)

    acc_ref[...] += jnp.sum(x_ref[...].astype(jnp.float32), axis=1, keepdims=True)

    @pl.when(s == pl.num_programs(1) - 1)
    def _():
        o_ref[...] = (acc_ref[...] * inv_hw).astype(o_ref.dtype)


def global_avgpool(x):
    """x: (N, H, W, C) -> (N, C)."""
    N, H, W, C = x.shape
    HW = H * W
    xr = x.reshape(N, HW, C)
    ts = _spatial_tile(HW, max(8, (1 << 21) // (C * x.dtype.itemsize)))
    y = pl.pallas_call(
        functools.partial(_avgpool_kernel, inv_hw=1.0 / HW),
        out_shape=jax.ShapeDtypeStruct((N, 1, C), x.dtype),
        grid=(N, HW // ts),
        in_specs=[pl.BlockSpec((1, ts, C), lambda n, s: (n, s, 0))],
        out_specs=pl.BlockSpec((1, 1, C), lambda n, s: (n, 0, 0)),
        scratch_shapes=[pltpu.VMEM((1, 1, C), jnp.float32)],
        compiler_params=_compiler_params(("parallel", "arbitrary")),
    )(xr)
    return y.reshape(N, C)


# ----------------------------------------------------------------------------
# Parameter init (mirrors VGGBase._initialize_weights, deterministic)
# ----------------------------------------------------------------------------
def init_params(key, cfg, in_channels=3, K=10):
    keys = iter(jax.random.split(key, 64))
    features = []
    c_in = in_channels
    for v in cfg:
        if v == "M":
            features.append("M")
        else:
            c_out = int(v)
            # kaiming_normal_, mode='fan_out', relu: std = sqrt(2 / (c_out * 3*3))
            std = (2.0 / (c_out * 9)) ** 0.5
            w = std * jax.random.normal(next(keys), (3, 3, c_in, c_out), jnp.float32)
            features.append((w.astype(jnp.bfloat16), jnp.zeros((c_out,), jnp.float32)))
            c_in = c_out

    def lin(k, n_in, n_out):
        # nn.init.normal_(weight, 0, 0.01); bias = 0   (stored as (in, out), bf16)
        w = 0.01 * jax.random.normal(k, (n_in, n_out), jnp.float32)
        return w.astype(jnp.bfloat16), jnp.zeros((n_out,), jnp.float32)

    w1, b1 = lin(next(keys), 512, 4096)
    w2, b2 = lin(next(keys), 4096, 4096)
    w3, b3 = lin(next(keys), 4096, K)
    return {"features": features, "classifier": (w1, b1, w2, b2, w3, b3)}


# ----------------------------------------------------------------------------
# Forward pass (VGGBase.forward)
# ----------------------------------------------------------------------------
def vgg_forward(params, x_nchw):
    # NCHW (PyTorch) -> NHWC (kernel layout), bf16 activations
    x = jnp.transpose(x_nchw, (0, 2, 3, 1)).astype(jnp.bfloat16)

    # self.features(x)
    for layer in params["features"]:
        if layer == "M":
            x = maxpool2x2(x)
        else:
            w, b = layer
            x = conv3x3_relu(x, w, b)

    # self.avgpool + view(N, -1)
    x = global_avgpool(x)  # (N, 512) bf16

    # classifier: Linear->ReLU->(Dropout)->Linear->ReLU->(Dropout)->Linear
    w1, b1, w2, b2, w3, b3 = params["classifier"]
    x = linear(x, w1, b1, activation="relu", tn=1024, out_dtype=jnp.bfloat16)
    x = linear(x, w2, b2, activation="relu", tn=1024, out_dtype=jnp.bfloat16)
    # final Linear fused with F.log_softmax(logits, dim=1); epilogue in f32
    out = linear(x, w3, b3, activation="log_softmax", out_dtype=jnp.float32)
    return out


if __name__ == "__main__":
    key = jax.random.PRNGKey(0)
    kx, kp = jax.random.split(key)

    # Small, module-consistent shapes: batch=2, 3 input channels, 16x16 spatial.
    x = jax.random.normal(kx, (2, 3, 16, 16), dtype=jnp.float32)  # NCHW, like PyTorch

    params = init_params(kp, cfg=[64, "M", 512, "M"], in_channels=3, K=10)

    out = vgg_forward(params, x)
    out = jax.block_until_ready(out)

    assert out.shape == (2, 10), out.shape
    assert bool(jnp.all(jnp.isfinite(out)))
    # log_softmax rows must exponentiate-sum to 1
    row_sums = jnp.sum(jnp.exp(out), axis=1)
    assert bool(jnp.allclose(row_sums, 1.0, atol=1e-3)), row_sums

    print("KERNEL_OK")
</pallas_src>

<mosaic_0001>
module attributes {stable_mosaic.version = 11 : i64} {
  func.func @_conv3x3_kernel(%arg0: i32, %arg1: i32, %arg2: memref<1x18x18x3xbf16, #tpu.memory_space<vmem>>, %arg3: memref<3x3x3x64xbf16, #tpu.memory_space<vmem>>, %arg4: memref<1x64xf32, #tpu.memory_space<vmem>>, %arg5: memref<1x16x16x64xbf16, #tpu.memory_space<vmem>>) attributes {dimension_semantics = [#tpu.dimension_semantics<parallel>, #tpu.dimension_semantics<parallel>], iteration_bounds = array<i64: 2, 1>, scalar_prefetch = 0 : i64, scratch_operands = 0 : i64, tpu.core_type = #tpu.core_type<tc>, window_params = [{transform_indices = @transform_0, window_bounds = array<i64: 1, 18, 18, 3>}, {transform_indices = @transform_1, window_bounds = array<i64: 3, 3, 3, 64>}, {transform_indices = @transform_2, window_bounds = array<i64: 1, 64>}, {transform_indices = @transform_3, window_bounds = array<i64: 1, 16, 16, 64>}]} {
    %cst = arith.constant 0.000000e+00 : f32
    %0 = vector.broadcast %cst : f32 to vector<256x64xf32>
    %c0 = arith.constant 0 : index
    %c0_0 = arith.constant 0 : index
    %c0_1 = arith.constant 0 : index
    %c0_2 = arith.constant 0 : index
    %1 = vector.load %arg2[%c0, %c0_0, %c0_1, %c0_2] : memref<1x18x18x3xbf16, #tpu.memory_space<vmem>>, vector<1x16x16x3xbf16>
    %2 = vector.shape_cast %1 : vector<1x16x16x3xbf16> to vector<16x16x3xbf16>
    %3 = vector.shape_cast %2 : vector<16x16x3xbf16> to vector<256x3xbf16>
    %c0_3 = arith.constant 0 : index
    %c0_4 = arith.constant 0 : index
    %c0_5 = arith.constant 0 : index
    %c0_6 = arith.constant 0 : index
    %4 = vector.load %arg3[%c0_3, %c0_4, %c0_5, %c0_6] : memref<3x3x3x64xbf16, #tpu.memory_space<vmem>>, vector<1x1x3x64xbf16>
    %5 = vector.shape_cast %4 : vector<1x1x3x64xbf16> to vector<3x64xbf16>
    %cst_7 = arith.constant dense<0.000000e+00> : vector<256x64xf32>
    %6 = tpu.matmul %3, %5, %cst_7 {dimension_numbers = #tpu.dot_dimension_numbers<[1], [0], [0], [1], [0, 0, 1, 1], [], []>} : vector<256x3xbf16>, vector<3x64xbf16>, vector<256x64xf32> -> vector<256x64xf32>
    %7 = arith.addf %0, %6 : vector<256x64xf32>
    %c0_8 = arith.constant 0 : index
    %c0_9 = arith.constant 0 : index
    %c1 = arith.constant 1 : index
    %c0_10 = arith.constant 0 : index
    %8 = vector.load %arg2[%c0_8, %c0_9, %c1, %c0_10] : memref<1x18x18x3xbf16, #tpu.memory_space<vmem>>, vector<1x16x16x3xbf16>
    %9 = vector.shape_cast %8 : vector<1x16x16x3xbf16> to vector<16x16x3xbf16>
    %10 = vector.shape_cast %9 : vector<16x16x3xbf16> to vector<256x3xbf16>
    %c0_11 = arith.constant 0 : index
    %c1_12 = arith.constant 1 : index
    %c0_13 = arith.constant 0 : index
    %c0_14 = arith.constant 0 : index
    %11 = vector.load %arg3[%c0_11, %c1_12, %c0_13, %c0_14] : memref<3x3x3x64xbf16, #tpu.memory_space<vmem>>, vector<1x1x3x64xbf16>
    %12 = vector.shape_cast %11 : vector<1x1x3x64xbf16> to vector<3x64xbf16>
    %cst_15 = arith.constant dense<0.000000e+00> : vector<256x64xf32>
    %13 = tpu.matmul %10, %12, %cst_15 {dimension_numbers = #tpu.dot_dimension_numbers<[1], [0], [0], [1], [0, 0, 1, 1], [], []>} : vector<256x3xbf16>, vector<3x64xbf16>, vector<256x64xf32> -> vector<256x64xf32>
    %14 = arith.addf %7, %13 : vector<256x64xf32>
    %c0_16 = arith.constant 0 : index
    %c0_17 = arith.constant 0 : index
    %c2 = arith.constant 2 : index
    %c0_18 = arith.constant 0 : index
    %15 = vector.load %arg2[%c0_16, %c0_17, %c2, %c0_18] : memref<1x18x18x3xbf16, #tpu.memory_space<vmem>>, vector<1x16x16x3xbf16>
    %16 = vector.shape_cast %15 : vector<1x16x16x3xbf16> to vector<16x16x3xbf16>
    %17 = vector.shape_cast %16 : vector<16x16x3xbf16> to vector<256x3xbf16>
    %c0_19 = arith.constant 0 : index
    %c2_20 = arith.constant 2 : index
    %c0_21 = arith.constant 0 : index
    %c0_22 = arith.constant 0 : index
    %18 = vector.load %arg3[%c0_19, %c2_20, %c0_21, %c0_22] : memref<3x3x3x64xbf16, #tpu.memory_space<vmem>>, vector<1x1x3x64xbf16>
    %19 = vector.shape_cast %18 : vector<1x1x3x64xbf16> to vector<3x64xbf16>
    %cst_23 = arith.constant dense<0.000000e+00> : vector<256x64xf32>
    %20 = tpu.matmul %17, %19, %cst_23 {dimension_numbers = #tpu.dot_dimension_numbers<[1], [0], [0], [1], [0, 0, 1, 1], [], []>} : vector<256x3xbf16>, vector<3x64xbf16>, vector<256x64xf32> -> vector<256x64xf32>
    %21 = arith.addf %14, %20 : vector<256x64xf32>
    %c0_24 = arith.constant 0 : index
    %c1_25 = arith.constant 1 : index
    %c0_26 = arith.constant 0 : index
    %c0_27 = arith.constant 0 : index
    %22 = vector.load %arg2[%c0_24, %c1_25, %c0_26, %c0_27] : memref<1x18x18x3xbf16, #tpu.memory_space<vmem>>, vector<1x16x16x3xbf16>
    %23 = vector.shape_cast %22 : vector<1x16x16x3xbf16> to vector<16x16x3xbf16>
    %24 = vector.shape_cast %23 : vector<16x16x3xbf16> to vector<256x3xbf16>
    %c1_28 = arith.constant 1 : index
    %c0_29 = arith.constant 0 : index
    %c0_30 = arith.constant 0 : index
    %c0_31 = arith.constant 0 : index
    %25 = vector.load %arg3[%c1_28, %c0_29, %c0_30, %c0_31] : memref<3x3x3x64xbf16, #tpu.memory_space<vmem>>, vector<1x1x3x64xbf16>
    %26 = vector.shape_cast %25 : vector<1x1x3x64xbf16> to vector<3x64xbf16>
    %cst_32 = arith.constant dense<0.000000e+00> : vector<256x64xf32>
    %27 = tpu.matmul %24, %26, %cst_32 {dimension_numbers = #tpu.dot_dimension_numbers<[1], [0], [0], [1], [0, 0, 1, 1], [], []>} : vector<256x3xbf16>, vector<3x64xbf16>, vector<256x64xf32> -> vector<256x64xf32>
    %28 = arith.addf %21, %27 : vector<256x64xf32>
    %c0_33 = arith.constant 0 : index
    %c1_34 = arith.constant 1 : index
    %c1_35 = arith.constant 1 : index
    %c0_36 = arith.constant 0 : index
    %29 = vector.load %arg2[%c0_33, %c1_34, %c1_35, %c0_36] : memref<1x18x18x3xbf16, #tpu.memory_space<vmem>>, vector<1x16x16x3xbf16>
    %30 = vector.shape_cast %29 : vector<1x16x16x3xbf16> to vector<16x16x3xbf16>
    %31 = vector.shape_cast %30 : vector<16x16x3xbf16> to vector<256x3xbf16>
    %c1_37 = arith.constant 1 : index
    %c1_38 = arith.constant 1 : index
    %c0_39 = arith.constant 0 : index
    %c0_40 = arith.constant 0 : index
    %32 = vector.load %arg3[%c1_37, %c1_38, %c0_39, %c0_40] : memref<3x3x3x64xbf16, #tpu.memory_space<vmem>>, vector<1x1x3x64xbf16>
    %33 = vector.shape_cast %32 : vector<1x1x3x64xbf16> to vector<3x64xbf16>
    %cst_41 = arith.constant dense<0.000000e+00> : vector<256x64xf32>
    %34 = tpu.matmul %31, %33, %cst_41 {dimension_numbers = #tpu.dot_dimension_numbers<[1], [0], [0], [1], [0, 0, 1, 1], [], []>} : vector<256x3xbf16>, vector<3x64xbf16>, vector<256x64xf32> -> vector<256x64xf32>
    %35 = arith.addf %28, %34 : vector<256x64xf32>
    %c0_42 = arith.constant 0 : index
    %c1_43 = arith.constant 1 : index
    %c2_44 = arith.constant 2 : index
    %c0_45 = arith.constant 0 : index
    %36 = vector.load %arg2[%c0_42, %c1_43, %c2_44, %c0_45] : memref<1x18x18x3xbf16, #tpu.memory_space<vmem>>, vector<1x16x16x3xbf16>
    %37 = vector.shape_cast %36 : vector<1x16x16x3xbf16> to vector<16x16x3xbf16>
    %38 = vector.shape_cast %37 : vector<16x16x3xbf16> to vector<256x3xbf16>
    %c1_46 = arith.constant 1 : index
    %c2_47 = arith.constant 2 : index
    %c0_48 = arith.constant 0 : index
    %c0_49 = arith.constant 0 : index
    %39 = vector.load %arg3[%c1_46, %c2_47, %c0_48, %c0_49] : memref<3x3x3x64xbf16, #tpu.memory_space<vmem>>, vector<1x1x3x64xbf16>
    %40 = vector.shape_cast %39 : vector<1x1x3x64xbf16> to vector<3x64xbf16>
    %cst_50 = arith.constant dense<0.000000e+00> : vector<256x64xf32>
    %41 = tpu.matmul %38, %40, %cst_50 {dimension_numbers = #tpu.dot_dimension_numbers<[1], [0], [0], [1], [0, 0, 1, 1], [], []>} : vector<256x3xbf16>, vector<3x64xbf16>, vector<256x64xf32> -> vector<256x64xf32>
    %42 = arith.addf %35, %41 : vector<256x64xf32>
    %c0_51 = arith.constant 0 : index
    %c2_52 = arith.constant 2 : index
    %c0_53 = arith.constant 0 : index
    %c0_54 = arith.constant 0 : index
    %43 = vector.load %arg2[%c0_51, %c2_52, %c0_53, %c0_54] : memref<1x18x18x3xbf16, #tpu.memory_space<vmem>>, vector<1x16x16x3xbf16>
    %44 = vector.shape_cast %43 : vector<1x16x16x3xbf16> to vector<16x16x3xbf16>
    %45 = vector.shape_cast %44 : vector<16x16x3xbf16> to vector<256x3xbf16>
    %c2_55 = arith.constant 2 : index
    %c0_56 = arith.constant 0 : index
    %c0_57 = arith.constant 0 : index
    %c0_58 = arith.constant 0 : index
    %46 = vector.load %arg3[%c2_55, %c0_56, %c0_57, %c0_58] : memref<3x3x3x64xbf16, #tpu.memory_space<vmem>>, vector<1x1x3x64xbf16>
    %47 = vector.shape_cast %46 : vector<1x1x3x64xbf16> to vector<3x64xbf16>
    %cst_59 = arith.constant dense<0.000000e+00> : vector<256x64xf32>
    %48 = tpu.matmul %45, %47, %cst_59 {dimension_numbers = #tpu.dot_dimension_numbers<[1], [0], [0], [1], [0, 0, 1, 1], [], []>} : vector<256x3xbf16>, vector<3x64xbf16>, vector<256x64xf32> -> vector<256x64xf32>
    %49 = arith.addf %42, %48 : vector<256x64xf32>
    %c0_60 = arith.constant 0 : index
    %c2_61 = arith.constant 2 : index
    %c1_62 = arith.constant 1 : index
    %c0_63 = arith.constant 0 : index
    %50 = vector.load %arg2[%c0_60, %c2_61, %c1_62, %c0_63] : memref<1x18x18x3xbf16, #tpu.memory_space<vmem>>, vector<1x16x16x3xbf16>
    %51 = vector.shape_cast %50 : vector<1x16x16x3xbf16> to vector<16x16x3xbf16>
    %52 = vector.shape_cast %51 : vector<16x16x3xbf16> to vector<256x3xbf16>
    %c2_64 = arith.constant 2 : index
    %c1_65 = arith.constant 1 : index
    %c0_66 = arith.constant 0 : index
    %c0_67 = arith.constant 0 : index
    %53 = vector.load %arg3[%c2_64, %c1_65, %c0_66, %c0_67] : memref<3x3x3x64xbf16, #tpu.memory_space<vmem>>, vector<1x1x3x64xbf16>
    %54 = vector.shape_cast %53 : vector<1x1x3x64xbf16> to vector<3x64xbf16>
    %cst_68 = arith.constant dense<0.000000e+00> : vector<256x64xf32>
    %55 = tpu.matmul %52, %54, %cst_68 {dimension_numbers = #tpu.dot_dimension_numbers<[1], [0], [0], [1], [0, 0, 1, 1], [], []>} : vector<256x3xbf16>, vector<3x64xbf16>, vector<256x64xf32> -> vector<256x64xf32>
    %56 = arith.addf %49, %55 : vector<256x64xf32>
    %c0_69 = arith.constant 0 : index
    %c2_70 = arith.constant 2 : index
    %c2_71 = arith.constant 2 : index
    %c0_72 = arith.constant 0 : index
    %57 = vector.load %arg2[%c0_69, %c2_70, %c2_71, %c0_72] : memref<1x18x18x3xbf16, #tpu.memory_space<vmem>>, vector<1x16x16x3xbf16>
    %58 = vector.shape_cast %57 : vector<1x16x16x3xbf16> to vector<16x16x3xbf16>
    %59 = vector.shape_cast %58 : vector<16x16x3xbf16> to vector<256x3xbf16>
    %c2_73 = arith.constant 2 : index
    %c2_74 = arith.constant 2 : index
    %c0_75 = arith.constant 0 : index
    %c0_76 = arith.constant 0 : index
    %60 = vector.load %arg3[%c2_73, %c2_74, %c0_75, %c0_76] : memref<3x3x3x64xbf16, #tpu.memory_space<vmem>>, vector<1x1x3x64xbf16>
    %61 = vector.shape_cast %60 : vector<1x1x3x64xbf16> to vector<3x64xbf16>
    %cst_77 = arith.constant dense<0.000000e+00> : vector<256x64xf32>
    %62 = tpu.matmul %59, %61, %cst_77 {dimension_numbers = #tpu.dot_dimension_numbers<[1], [0], [0], [1], [0, 0, 1, 1], [], []>} : vector<256x3xbf16>, vector<3x64xbf16>, vector<256x64xf32> -> vector<256x64xf32>
    %63 = arith.addf %56, %62 : vector<256x64xf32>
    %c0_78 = arith.constant 0 : index
    %c0_79 = arith.constant 0 : index
    %64 = vector.load %arg4[%c0_78, %c0_79] : memref<1x64xf32, #tpu.memory_space<vmem>>, vector<1x64xf32>
    %65 = vector.broadcast %64 : vector<1x64xf32> to vector<256x64xf32>
    %66 = arith.addf %63, %65 : vector<256x64xf32>
    %cst_80 = arith.constant 0.000000e+00 : f32
    %67 = vector.broadcast %cst_80 : f32 to vector<256x64xf32>
    %68 = arith.maximumf %66, %67 : vector<256x64xf32>
    %69 = vector.shape_cast %68 : vector<256x64xf32> to vector<16x16x64xf32>
    %70 = arith.truncf %69 : vector<16x16x64xf32> to vector<16x16x64xbf16>
    %c0_81 = arith.constant 0 : index
    %c0_82 = arith.constant 0 : index
    %c0_83 = arith.constant 0 : index
    %c0_84 = arith.constant 0 : index
    %71 = vector.load %arg5[%c0_81, %c0_82, %c0_83, %c0_84] : memref<1x16x16x64xbf16, #tpu.memory_space<vmem>>, vector<1x16x16x64xbf16>
    %72 = vector.shape_cast %71 : vector<1x16x16x64xbf16> to vector<16x16x64xbf16>
    %73 = vector.shape_cast %70 : vector<16x16x64xbf16> to vector<1x16x16x64xbf16>
    tpu.vector_store %arg5[%c0_81, %c0_82, %c0_83, %c0_84], %73 {strides = array<i32>} : memref<1x16x16x64xbf16, #tpu.memory_space<vmem>>, vector<1x16x16x64xbf16>,
    return
  }
  func.func @transform_0(%arg0: i32, %arg1: i32) -> (i32, i32, i32, i32) {
    %c0_i32 = arith.constant 0 : i32
    %c0_i32_0 = arith.constant 0 : i32
    %c0_i32_1 = arith.constant 0 : i32
    %c0_i32_2 = arith.constant 0 : i32
    return %arg0, %c0_i32, %c0_i32_0, %c0_i32_1 : i32, i32, i32, i32
  }
  func.func @transform_1(%arg0: i32, %arg1: i32) -> (i32, i32, i32, i32) {
    %c0_i32 = arith.constant 0 : i32
    %c0_i32_0 = arith.constant 0 : i32
    %c0_i32_1 = arith.constant 0 : i32
    %c0_i32_2 = arith.constant 0 : i32
    return %c0_i32, %c0_i32_0, %c0_i32_1, %arg1 : i32, i32, i32, i32
  }
  func.func @transform_2(%arg0: i32, %arg1: i32) -> (i32, i32) {
    %c0_i32 = arith.constant 0 : i32
    %c0_i32_0 = arith.constant 0 : i32
    return %c0_i32, %arg1 : i32, i32
  }
  func.func @transform_3(%arg0: i32, %arg1: i32) -> (i32, i32, i32, i32) {
    %c0_i32 = arith.constant 0 : i32
    %c0_i32_0 = arith.constant 0 : i32
    %c0_i32_1 = arith.constant 0 : i32
    return %arg0, %c0_i32, %c0_i32_0, %arg1 : i32, i32, i32, i32
  }
}

</mosaic_0001>

<bundles_post_ra>
// kernel: tpu_custom_call.1
= control target key start
LH: loop header
LB: loop body
LE: loop exit
PB: predicated region body
PF: predicated region fallthrough
CT: control target
= control target key end

     0   :  { %8 = vsyncpa [#allocation3], 0  ;;  %s8677_s0 = inlined_call_operand.vmem [shape: bf16[2,18,18,3], index: 0, kind: input, shape index: {}]   ;;  %s8678_s1 = inlined_call_operand.vmem [shape: bf16[3,3,3,64], index: 1, kind: input, shape index: {}]   ;;  %s8679_s2 = inlined_call_operand.vmem [shape: f32[1,64], index: 2, kind: input, shape index: {}]   ;;  %s8680_s3 = inlined_call_operand.hbm [shape: bf16[2,16,16,64], index: 3, kind: output, shape index: {}]  }
   0x1   :  { %10 = vsyncpa [#allocation3 + $0x1], 0  ;;  %s6721_s12 = smov 0   ;;  %s6723_s13 = smov 0  }
   0x2   :  { %s6725_s14 = smov 0   ;;  %s6727_s15 = smov 0  }
   0x3   :  { %s6729_s16 = smov 0   ;;  %s6731_s17 = smov 0  }
   0x4 LB: > { %s5123_s18 = sadd.s32 4294967295, %s6695_s17   ;;  %s5124_s19 = sadd.s32 4294967294, %s6695_s17   ;;  %s6695_s17 = sphi %s6731_s17, %s16_s17   ;;  %s6691_s16 = sphi %s6729_s16, %s8764_s16   ;;  %s6687_s15 = sphi %s6727_s15, %s8763_s15   ;;  %s6683_s14 = sphi %s6725_s14, %s8762_s14   ;;  %s6679_s13 = sphi %s6723_s13, %s8761_s13   ;;  %s6675_s12 = sphi %s6721_s12, %s8760_s12  }
   0x5   : > { %s28_s20 = sadd.s32 1, %s6691_s16  ;;  %s115_s21 = sadd.s32 1, %s6683_s14 }
   0x6   : > { %p30_p0 = scmp.ge.s32.totalorder %s28_s20, 2  ;;  %p125_p1 = scmp.ne.s32.totalorder %s6683_s14, %s6679_s13 }
   0x7   : > { %p126_p2 = scmp.eq.s32.totalorder %s5123_s18, 1  ;;  %p131_p3 = scmp.ne.s32.totalorder %s6679_s13, %s6675_s12 }
   0x8   : > { %s8766_s20 = smov (%p30_p0, %s28_s20), 0  ;;  %p132_p5 = scmp.eq.s32.totalorder %s5124_s19, 1 }
   0x9   : > { %p6761_p4 = por %p126_p2, %p125_p1  ;;  %s110_s23 = ssub.s32 %s6691_s16, %s8766_s20 }
   0xa   : > { %p5129_p6 = scmp.ge.s32.totalorder %s6695_s17, 1  ;;  %p113_p7 = scmp.eq.s32.totalorder %s110_s23, 0 }
   0xb   : > { %p6768_p8 = por %p132_p5, %p131_p3  ;;  %p171_p9 = scmp.lt.s32.totalorder %s6695_s17, 3 }
   0xc   : > { %s6774_s25 = scalar_select %p113_p7, %s6683_s14, %s115_s21  }
   0xd   : > { %p172_p10 = pnand %p5129_p6, %p171_p9 }
   0xf   : > { %175 = sbr.rel (%p172_p10) target bundleno = 613 (0x265), region = 32 }
  0x16   : > { %v5132_v0 = vld [vmem:[%s8678_s1 + $0x2] sm:$0x3]  ;;  %vm750_vm0 = vcmask 1040384   ;;  %vm751_vm1 = vcmask 1041408   ;;  %p202_p11 = scmp.lt.s32.totalorder %s6687_s15, 1  ;;  %v6697_v1 = vmov 65535  }
  0x17   : > { %v752_v2 = vsel %vm750_vm0, 4294967295, %v6697_v1  ;;  %v5359_v3 = vld [vmem:[%s8678_s1 + $0x8] sm:$0x3]  ;;  %v247_v5 = vld [vmem:[%s8678_s1] sm:$0x3]  ;;  %vm701_vm4 = vcmask 23552  }
  0x18   : > { %v6783_v4 = vsel %vm751_vm1, %v752_v2, 0  ;;  %s203_s30 = scalar_select %p202_p11, %s6687_s15, 1  ;;  %v5424_v9 = vld [vmem:[%s8678_s1 + $0xa] sm:$0x3]  ;;  %vm264_vm2 = vsmask.f32 3328 }
  0x19   : > { %v755_v6 = vand.u32 %v5132_v0, %v6783_v4  ;;  %v6791_v7 = vand.u32 %v5359_v3, %v6783_v4  ;;  %v6794_v8 = vand.u32 %v6783_v4, %v247_v5  ;;  %v6800_v10 = vand.u32 %v5424_v9, %v6783_v4  ;;  %v5489_v26 = vld [vmem:[%s8678_s1 + $0xc] sm:$0x3]  ;;  %v5213_v31 = vld [vmem:[%s8678_s1 + $0x4] sm:$0x3]  ;;  %s199_s5 = sand.u32 1, %s6679_s13   ;;  %s5738_s10 = sshll.u32 %s6687_s15, 11 }
  0x1a   : > { %s6456_s8 = smul.u32 216, %s203_s30  ;;  %vm265_vm3 = vsmask.f32 7440  ;;  %v6839_v42 = vand.u32 %v5489_v26, %v6783_v4  ;;  %v6842_v46 = vand.u32 %v5213_v31, %v6783_v4  ;;  %vm1258_vm6 = vcmask 1042432   ;;  %s8619_s21 = scalar_lea.hbm %s8680_s3, %s5738_s10 }
  0x1b   : > { %8699 = vst [vmem:[#allocation5_spill] sm:$0xff] %v6791_v7  ;;  %5892 = vmatprep.subr.bf16.mxu1 %v755_v6  ;;  %6028 = vmatprep.subr.bf16.mxu0 %v6791_v7  ;;  %vm6833_vm5 = vmor %vm264_vm2, %vm265_vm3  ;;  %vm1259_vm7 = vcmask 1046532   ;;  %vm4976_vm9 = vcmask 519168   ;;  %s8631_s15 = scalar_lea.sflag [#allocation3], %s199_s5  ;;  %s6698_s26 = smov [#allocation2]  }
  0x1c   : > { %5893 = vmatpush3.bf16.msra.mxu1 %v755_v6  ;;  %6029 = vmatpush3.bf16.msra.mxu0 %v6791_v7  ;;  %s6807_s11 = scalar_lea.vmem %s8677_s0, %s6456_s8  ;;  %vm7054_vm8 = vmor %vm1258_vm6, %vm1259_vm7  ;;  %s5130_s8 = sshll.u32 %s199_s5, 7 }
  0x1d   : > { %v215_v11 = vld [vmem:[%s6807_s11] sm:$0xf]  ;;  %v216_v12 = vld [vmem:[%s6807_s11 + $0x4] sm:$0xf]  ;;  %v248_v13 = vld [vmem:[%s6807_s11 + $0x8] sm:$0x1]  ;;  %5926 = vmatprep.subr.bf16.mxu1 %v6794_v8  ;;  %6062 = vmatprep.subr.bf16.mxu0 %v6800_v10 }
  0x1e   : > { %v268_v14 = vshrl.u32 %v215_v11, 16  ;;  %v271_v15 = vshll.u32 %v215_v11, 16  ;;  %v277_v16 = vshll.u32 %v216_v12, 16  ;;  %v281_v17 = vshrl.u32 %v216_v12, 16  ;;  %v5311_v18 = vld [vmem:[%s6807_s11 + $0xc] sm:$0xf] }
  0x1f   : > { %v287_v19 = vshll.u32 %v248_v13, 16  ;;  %v6816_v20 = vld [vmem:[%s6807_s11 + $0x10] sm:$0xf]  ;;  %v6819_v21 = vld [vmem:[%s6807_s11 + $0x14] sm:$0x1]  ;;  %v2075_v28 = vshrl.u32 %v5311_v18, 16 }
  0x20   : > { %v270_v22 = vrot.slane %v268_v14, 4  ;;  %v273_v23 = vrot.slane %v271_v15, 5  ;;  %v279_v24 = vrot.slane %v277_v16, 5  ;;  %v283_v25 = vrot.slane %v281_v17, 4  ;;  %v217_v36 = vld [vmem:[%s6807_s11 + $0xc] sm:$0xf] }
  0x21   : > { %v289_v27 = vrot.slane %v287_v19, 5  ;;  %v2078_v29 = vshll.u32 %v5311_v18, 16  ;;  %v2084_v30 = vshll.u32 %v6816_v20, 16  ;;  %v2088_v34 = vshrl.u32 %v6816_v20, 16  ;;  %v218_v41 = vld [vmem:[%s6807_s11 + $0x10] sm:$0xf] }
  0x22   : > { %v274_v32 = vor.u32 %v273_v23, %v270_v22  ;;  %v284_v33 = vor.u32 %v283_v25, %v279_v24  ;;  %v2094_v35 = vshll.u32 %v6819_v21, 16  ;;  %v2077_v38 = vrot.slane %v2075_v28, 4  ;;  %v249_v49 = vld [vmem:[%s6807_s11 + $0x14] sm:$0x1]  ;;  %v5314_v60 = vld [vmem:[%s6807_s11 + $0x18] sm:$0xf] }
  0x23   : > { %v2080_v39 = vrot.slane %v2078_v29, 5  ;;  %v2086_v40 = vrot.slane %v2084_v30, 5  ;;  %v2090_v45 = vrot.slane %v2088_v34, 4  ;;  %v292_v50 = vshrl.u32 %v217_v36, 16  ;;  %v6851_v1 = vld [vmem:[%s6807_s11 + $0x1c] sm:$0xf] }
  0x24   : > { %v275_v43 = vrot.slane %v274_v32, 4  ;;  %v285_v44 = vrot.slane %v284_v33, 4  ;;  %v2096_v48 = vrot.slane %v2094_v35, 5  ;;  %v295_v51 = vshll.u32 %v217_v36, 16  ;;  %v6859_v9 = vld [vmem:[%s6807_s11 + $0x20] sm:$0x1] }
  0x25   : > { %v2081_v47 = vor.u32 %v2080_v39, %v2077_v38  ;;  %v2091_v54 = vor.u32 %v2090_v45, %v2086_v40  ;;  %v301_v55 = vshll.u32 %v218_v41, 16  ;;  %v294_v58 = vrot.slane %v292_v50, 4  ;;  %v219_v25 = vld [vmem:[%s6807_s11 + $0x18] sm:$0xf]  ;;  %v220_v30 = vld [vmem:[%s6807_s11 + $0x1c] sm:$0xf] }
  0x26   : > { %v280_v52 = vsel %vm6833_vm5, %v275_v43, %v279_v24  ;;  %v290_v53 = vsel %vm6833_vm5, %v285_v44, %v289_v27  ;;  %v297_v59 = vrot.slane %v295_v51, 5  ;;  %v305_v63 = vshrl.u32 %v218_v41, 16  ;;  %v250_v38 = vld [vmem:[%s6807_s11 + $0x20] sm:$0x1]  ;;  %s8520_s9 = scalar_lea.vmem [#allocation2], %s5130_s8  ;;  %s6621_s27 = sshll.u32 %s6698_s26, 4  ;;  %s6622_s27 = int_to_ptr.vmem [resolvable:$false] %s6621_s27 }
  0x27   : > { %v5133_v56 = vcombine.low %v280_v52, %v290_v53  ;;  %v2082_v57 = vrot.slane %v2081_v47, 4  ;;  %v2092_v61 = vrot.slane %v2091_v54, 4  ;;  %v303_v62 = vrot.slane %v301_v55, 5  ;;  %v5317_v47 = vld [vmem:[%s6807_s11 + $0x24] sm:$0xf]  ;;  %s6623_s28 = scalar_lea.vmem %s6622_s27, 4096 }
  0x28   : > { %v311_v0 = vshll.u32 %v249_v49, 16  ;;  %v2818_v3 = vrot.slane %v6816_v20, 5  ;;  %v2821_v5 = vrot.slane %v6819_v21, 5  ;;  %v298_v6 = vor.u32 %v297_v59, %v294_v58  ;;  %v6882_v52 = vld [vmem:[%s6807_s11 + $0x28] sm:$0xf] }
  0x29   : > { %5894 = vmatprep.mubr.msk.bf16.mxu1 %vm701_vm4, %v5133_v56  ;;  %v2087_v2 = vsel %vm6833_vm5, %v2082_v57, %v2086_v40  ;;  %v2097_v11 = vsel %vm6833_vm5, %v2092_v61, %v2096_v48  ;;  %v307_v12 = vrot.slane %v305_v63, 4  ;;  %v2099_v14 = vshrl.u32 %v5314_v60, 16  ;;  %v6888_v59 = vld [vmem:[%s6807_s11 + $0x2c] sm:$0x1]  ;;  %v7087_v21 = vld [vmem:[%s6807_s11 + $0x7c] sm:$0xf] }
  0x2a   : > { %v313_v13 = vrot.slane %v311_v0, 5  ;;  %v5360_v15 = vcombine.low %v2087_v2, %v2097_v11  ;;  %v299_v16 = vrot.slane %v298_v6, 4  ;;  %v2102_v17 = vshll.u32 %v5314_v60, 16  ;;  %v221_v6 = vld [vmem:[%s6807_s11 + $0x24] sm:$0xf] }
  0x2b   : > { %v2108_v18 = vshll.u32 %v6851_v1, 16  ;;  %v308_v19 = vor.u32 %v307_v12, %v303_v62  ;;  %v2101_v22 = vrot.slane %v2099_v14, 4  ;;  %v2112_v23 = vshrl.u32 %v6851_v1, 16 }
  0x2c   : > { %v2118_v24 = vshll.u32 %v6859_v9, 16  ;;  %6030 = vmatprep.mubr.msk.bf16.mxu0 %vm701_vm4, %v5360_v15  ;;  %v304_v26 = vsel %vm6833_vm5, %v299_v16, %v303_v62  ;;  %v2104_v27 = vrot.slane %v2102_v17, 5  ;;  %v2825_v29 = vrot.slane %v6851_v1, 5  ;;  %v222_v15 = vld [vmem:[%s6807_s11 + $0x28] sm:$0xf] }
  0x2d   : > { %v2110_v28 = vrot.slane %v2108_v18, 5  ;;  %v309_v31 = vrot.slane %v308_v19, 4  ;;  %v2114_v32 = vrot.slane %v2112_v23, 4  ;;  %v2828_v34 = vrot.slane %v6859_v9, 5  ;;  %v251_v23 = vld [vmem:[%s6807_s11 + $0x2c] sm:$0x1] }
  0x2e   : > { %v2120_v33 = vrot.slane %v2118_v24, 5  ;;  %v2105_v35 = vor.u32 %v2104_v27, %v2101_v22  ;;  %v6875_v36 = vrot.slane %v2825_v29, 4  ;;  %v316_v39 = vshrl.u32 %v219_v25, 16 }
  0x2f   : > { %v319_v40 = vshll.u32 %v219_v25, 16  ;;  %v314_v41 = vsel %vm6833_vm5, %v309_v31, %v313_v13  ;;  %v2115_v43 = vor.u32 %v2114_v32, %v2110_v28  ;;  %v325_v44 = vshll.u32 %v220_v30, 16  ;;  %v5320_v31 = vld [vmem:[%s6807_s11 + $0x30] sm:$0xf] }
  0x30   : > { %v329_v45 = vshrl.u32 %v220_v30, 16  ;;  %v5134_v48 = vcombine.low %v304_v26, %v314_v41  ;;  %v2106_v49 = vrot.slane %v2105_v35, 4  ;;  %v318_v50 = vrot.slane %v316_v39, 4  ;;  %v6908_v39 = vld [vmem:[%s6807_s11 + $0x34] sm:$0xf] }
  0x31   : > { %v321_v51 = vrot.slane %v319_v40, 5  ;;  %v2116_v53 = vrot.slane %v2115_v43, 4  ;;  %v327_v54 = vrot.slane %v325_v44, 5  ;;  %v335_v56 = vshll.u32 %v250_v38, 16 }
  0x32   : > { %v331_v55 = vrot.slane %v329_v45, 4  ;;  %5895 = vmatmul.mubr.msk.bf16.vlgmr.msra.gmra.mrb[0].mxu1 %vm701_vm4, %v5134_v48  ;;  %v2111_v57 = vsel %vm6833_vm5, %v2106_v49, %v2110_v28  ;;  %v2123_v60 = vshrl.u32 %v5317_v47, 16  ;;  %v2126_v61 = vshll.u32 %v5317_v47, 16  ;;  %v6915_v47 = vld [vmem:[%s6807_s11 + $0x38] sm:$0x1] }
  0x33   : > { %v322_v58 = vor.u32 %v321_v51, %v318_v50  ;;  %5927 = vmatpush3.bf16.msra.mxu1 %v6794_v8  ;;  %v2121_v62 = vsel %vm6833_vm5, %v2116_v53, %v2120_v33  ;;  %v337_v0 = vrot.slane %v335_v56, 5  ;;  %v2132_v2 = vshll.u32 %v6882_v52, 16 }
  0x34   : > { %v332_v63 = vor.u32 %v331_v55, %v327_v54  ;;  %v5361_v11 = vcombine.low %v2111_v57, %v2121_v62  ;;  %v2125_v13 = vrot.slane %v2123_v60, 4  ;;  %v2128_v14 = vrot.slane %v2126_v61, 5  ;;  %5960 = vmatprep.subr.bf16.mxu1 %v6842_v46  ;;  %v223_v60 = vld [vmem:[%s6807_s11 + $0x30] sm:$0xf] }
  0x35   : > { %v323_v12 = vrot.slane %v322_v58, 4  ;;  %v2134_v17 = vrot.slane %v2132_v2, 5  ;;  %v2136_v8 = vshrl.u32 %v6882_v52, 16  ;;  %v2142_v18 = vshll.u32 %v6888_v59, 16  ;;  %v224_v2 = vld [vmem:[%s6807_s11 + $0x34] sm:$0xf] }
  0x36   : > { %v333_v16 = vrot.slane %v332_v63, 4  ;;  %6031 = vmatmul.mubr.msk.bf16.vlgmr.msra.gmra.mrb[0].mxu0 %vm701_vm4, %v5361_v11  ;;  %v2129_v22 = vor.u32 %v2128_v14, %v2125_v13  ;;  %v340_v24 = vshrl.u32 %v221_v6, 16  ;;  %v343_v25 = vshll.u32 %v221_v6, 16  ;;  %v252_v14 = vld [vmem:[%s6807_s11 + $0x38] sm:$0x1] }
  0x37   : > { %v328_v19 = vsel %vm6833_vm5, %v323_v12, %v327_v54  ;;  %6063 = vmatpush3.bf16.msra.mxu0 %v6800_v10  ;;  %v2138_v27 = vrot.slane %v2136_v8, 4  ;;  %v2144_v28 = vrot.slane %v2142_v18, 5  ;;  %v349_v30 = vshll.u32 %v222_v15, 16 }
  0x38   : > { %v338_v26 = vsel %vm6833_vm5, %v333_v16, %v337_v0  ;;  %v2130_v33 = vrot.slane %v2129_v22, 4  ;;  %v342_v35 = vrot.slane %v340_v24, 4  ;;  %v345_v38 = vrot.slane %v343_v25, 5  ;;  %6096 = vmatprep.subr.bf16.mxu0 %v6839_v42  ;;  %v5323_v24 = vld [vmem:[%s6807_s11 + $0x3c] sm:$0xf] }
  0x39   : > { %v5135_v32 = vcombine.low %v328_v19, %v338_v26  ;;  %v2139_v40 = vor.u32 %v2138_v27, %v2134_v17  ;;  %v351_v41 = vrot.slane %v349_v30, 5  ;;  %v353_v43 = vshrl.u32 %v222_v15, 16  ;;  %v6932_v30 = vld [vmem:[%s6807_s11 + $0x40] sm:$0xf] }
  0x3a   : > { %v359_v10 = vshll.u32 %v251_v23, 16  ;;  %v2135_v44 = vsel %vm6833_vm5, %v2130_v33, %v2134_v17  ;;  %v346_v45 = vor.u32 %v345_v38, %v342_v35  ;;  %v2147_v48 = vshrl.u32 %v5320_v31, 16 }
  0x3b   : > { %5898 = vmatprep.mubr.msk.bf16.mxu1 %vm701_vm4, %v5135_v32  ;;  %v2150_v49 = vshll.u32 %v5320_v31, 16  ;;  %v2140_v50 = vrot.slane %v2139_v40, 4  ;;  %v355_v51 = vrot.slane %v353_v43, 4  ;;  %v2156_v54 = vshll.u32 %v6908_v39, 16  ;;  %v6937_v43 = vld [vmem:[%s6807_s11 + $0x44] sm:$0x1] }
  0x3c   : > { %v361_v53 = vrot.slane %v359_v10, 5  ;;  %v347_v55 = vrot.slane %v346_v45, 4  ;;  %v2149_v56 = vrot.slane %v2147_v48, 4  ;;  %v2160_v58 = vshrl.u32 %v6908_v39, 16 }
  0x3d   : > { %v2152_v57 = vrot.slane %v2150_v49, 5  ;;  %v2145_v61 = vsel %vm6833_vm5, %v2140_v50, %v2144_v28  ;;  %v356_v62 = vor.u32 %v355_v51, %v351_v41  ;;  %v2158_v63 = vrot.slane %v2156_v54, 5  ;;  %v225_v50 = vld [vmem:[%s6807_s11 + $0x3c] sm:$0xf] }
  0x3e   : > { %v2166_v0 = vshll.u32 %v6915_v47, 16  ;;  %v5362_v6 = vcombine.low %v2135_v44, %v2145_v61  ;;  %v352_v11 = vsel %vm6833_vm5, %v347_v55, %v351_v41  ;;  %v2162_v13 = vrot.slane %v2160_v58, 4 }
  0x3f   : > { %v2153_v12 = vor.u32 %v2152_v57, %v2149_v56  ;;  %v357_v15 = vrot.slane %v356_v62, 4  ;;  %v364_v17 = vshrl.u32 %v223_v60, 16  ;;  %v367_v8 = vshll.u32 %v223_v60, 16  ;;  %v226_v56 = vld [vmem:[%s6807_s11 + $0x40] sm:$0xf] }
  0x40   : > { %v2168_v16 = vrot.slane %v2166_v0, 5  ;;  %6034 = vmatprep.mubr.msk.bf16.mxu0 %vm701_vm4, %v5362_v6  ;;  %v2163_v19 = vor.u32 %v2162_v13, %v2158_v63  ;;  %v373_v22 = vshll.u32 %v224_v2, 16  ;;  %v377_v23 = vshrl.u32 %v224_v2, 16  ;;  %v253_v13 = vld [vmem:[%s6807_s11 + $0x44] sm:$0x1] }
  0x41   : > { %v2154_v18 = vrot.slane %v2153_v12, 4  ;;  %v362_v25 = vsel %vm6833_vm5, %v357_v15, %v361_v53  ;;  %v366_v26 = vrot.slane %v364_v17, 4  ;;  %v369_v27 = vrot.slane %v367_v8, 5  ;;  %v5326_v15 = vld [vmem:[%s6807_s11 + $0x48] sm:$0xf] }
  0x42   : > { %v383_v28 = vshll.u32 %v252_v14, 16  ;;  %v5136_v31 = vcombine.low %v352_v11, %v362_v25  ;;  %v2164_v33 = vrot.slane %v2163_v19, 4  ;;  %v375_v35 = vrot.slane %v373_v22, 5  ;;  %v6955_v19 = vld [vmem:[%s6807_s11 + $0x4c] sm:$0xf] }
  0x43   : > { %v2159_v32 = vsel %vm6833_vm5, %v2154_v18, %v2158_v63  ;;  %v370_v38 = vor.u32 %v369_v27, %v366_v26  ;;  %v379_v40 = vrot.slane %v377_v23, 4  ;;  %v2171_v10 = vshrl.u32 %v5323_v24, 16 }
  0x44   : > { %v385_v41 = vrot.slane %v383_v28, 5  ;;  %5899 = vmatmul.mubr.msk.bf16.gmra.mrb[4].mxu1 %vm701_vm4, %v5136_v31  ;;  %v2169_v44 = vsel %vm6833_vm5, %v2164_v33, %v2168_v16  ;;  %v2174_v45 = vshll.u32 %v5323_v24, 16  ;;  %v2180_v48 = vshll.u32 %v6932_v30, 16 }
  0x45   : > { %v2184_v49 = vshrl.u32 %v6932_v30, 16  ;;  %v5363_v51 = vcombine.low %v2159_v32, %v2169_v44  ;;  %v371_v53 = vrot.slane %v370_v38, 4  ;;  %v380_v54 = vor.u32 %v379_v40, %v375_v35 }
  0x46   : > { %v2173_v55 = vrot.slane %v2171_v10, 4  ;;  %v2176_v57 = vrot.slane %v2174_v45, 5  ;;  %v2182_v58 = vrot.slane %v2180_v48, 5  ;;  %v2190_v61 = vshll.u32 %v6937_v43, 16 }
  0x47   : > { %v2186_v60 = vrot.slane %v2184_v49, 4  ;;  %6035 = vmatmul.mubr.msk.bf16.gmra.mrb[4].mxu0 %vm701_vm4, %v5363_v51  ;;  %v376_v62 = vsel %vm6833_vm5, %v371_v53, %v375_v35  ;;  %v381_v63 = vrot.slane %v380_v54, 4  ;;  %v388_v0 = vshrl.u32 %v225_v50, 16  ;;  %v6963_v35 = vld [vmem:[%s6807_s11 + $0x50] sm:$0x1] }
  0x48   : > { %v391_v2 = vshll.u32 %v225_v50, 16  ;;  %v2177_v6 = vor.u32 %v2176_v57, %v2173_v55  ;;  %v2192_v12 = vrot.slane %v2190_v61, 5  ;;  %v397_v14 = vshll.u32 %v226_v56, 16  ;;  %v6970_v49 = vld [vmem:[%s6807_s11 + $0x4c] sm:$0xf] }
  0x49   : > { %v2187_v11 = vor.u32 %v2186_v60, %v2182_v58  ;;  %v386_v16 = vsel %vm6833_vm5, %v381_v63, %v385_v41  ;;  %v390_v17 = vrot.slane %v388_v0, 4  ;;  %v401_v18 = vshrl.u32 %v226_v56, 16  ;;  %v6967_v41 = vld [vmem:[%s6807_s11 + $0x48] sm:$0xf] }
  0x4a   : > { %v393_v8 = vrot.slane %v391_v2, 5  ;;  %v5137_v22 = vcombine.low %v376_v62, %v386_v16  ;;  %v2178_v23 = vrot.slane %v2177_v6, 4  ;;  %v399_v25 = vrot.slane %v397_v14, 5  ;;  %v5329_v2 = vld [vmem:[%s6807_s11 + $0x54] sm:$0xf] }
  0x4b   : > { %v2188_v24 = vrot.slane %v2187_v11, 4  ;;  %v403_v27 = vrot.slane %v401_v18, 4  ;;  %v407_v28 = vshll.u32 %v253_v13, 16  ;;  %v2195_v31 = vshrl.u32 %v5326_v15, 16 }
  0x4c   : > { %v394_v26 = vor.u32 %v393_v8, %v390_v17  ;;  %5902 = vmatprep.mubr.msk.bf16.mxu1 %vm701_vm4, %v5137_v22  ;;  %v2183_v32 = vsel %vm6833_vm5, %v2178_v23, %v2182_v58  ;;  %v2198_v38 = vshll.u32 %v5326_v15, 16  ;;  %v2204_v40 = vshll.u32 %v6955_v19, 16  ;;  %v254_v58 = vld [vmem:[%s6807_s11 + $0x50] sm:$0x1]  ;;  %v6986_v8 = vld [vmem:[%s6807_s11 + $0x58] sm:$0xf] }
  0x4d   : > { %v2193_v33 = vsel %vm6833_vm5, %v2188_v24, %v2192_v12  ;;  %v404_v45 = vor.u32 %v403_v27, %v399_v25  ;;  %v409_v48 = vrot.slane %v407_v28, 5  ;;  %v2197_v50 = vrot.slane %v2195_v31, 4  ;;  %v6992_v28 = vld [vmem:[%s6807_s11 + $0x5c] sm:$0x1] }
  0x4e   : > { %v5364_v10 = vcombine.low %v2183_v32, %v2193_v33  ;;  %v395_v44 = vrot.slane %v394_v26, 4  ;;  %v2200_v51 = vrot.slane %v2198_v38, 5  ;;  %v2206_v53 = vrot.slane %v2204_v40, 5 }
  0x4f   : > { %v2208_v54 = vshrl.u32 %v6955_v19, 16  ;;  %v405_v56 = vrot.slane %v404_v45, 4  ;;  %v2214_v57 = vshll.u32 %v6963_v35, 16  ;;  %v412_v60 = vshrl.u32 %v6967_v41, 16 }
  0x50   : > { %6038 = vmatprep.mubr.msk.bf16.mxu0 %vm701_vm4, %v5364_v10  ;;  %v400_v55 = vsel %vm6833_vm5, %v395_v44, %v399_v25  ;;  %v2201_v61 = vor.u32 %v2200_v51, %v2197_v50  ;;  %v415_v63 = vshll.u32 %v6967_v41, 16  ;;  %v421_v0 = vshll.u32 %v6970_v49, 16  ;;  %v6996_v10 = vld [vmem:[%s6807_s11 + $0x54] sm:$0xf]  ;;  %v7002_v51 = vld [vmem:[%s6807_s11 + $0x58] sm:$0xf] }
  0x51   : > { %v2210_v62 = vrot.slane %v2208_v54, 4  ;;  %v410_v6 = vsel %vm6833_vm5, %v405_v56, %v409_v48  ;;  %v2216_v11 = vrot.slane %v2214_v57, 5  ;;  %v414_v12 = vrot.slane %v412_v60, 4 }
  0x52   : > { %v425_v13 = vshrl.u32 %v6970_v49, 16  ;;  %v5138_v14 = vcombine.low %v400_v55, %v410_v6  ;;  %v2202_v15 = vrot.slane %v2201_v61, 4  ;;  %v417_v17 = vrot.slane %v415_v63, 5  ;;  %v255_v61 = vld [vmem:[%s6807_s11 + $0x5c] sm:$0x1] }
  0x53   : > { %v2211_v16 = vor.u32 %v2210_v62, %v2206_v53  ;;  %v423_v18 = vrot.slane %v421_v0, 5  ;;  %v431_v23 = vshll.u32 %v254_v58, 16  ;;  %v2219_v24 = vshrl.u32 %v5329_v2, 16 }
  0x54   : > { %v427_v22 = vrot.slane %v425_v13, 4  ;;  %5903 = vmatmul.mubr.msk.bf16.gmra.mrb[8].mxu1 %vm701_vm4, %v5138_v14  ;;  %v2207_v25 = vsel %vm6833_vm5, %v2202_v15, %v2206_v53  ;;  %v418_v27 = vor.u32 %v417_v17, %v414_v12  ;;  %v2222_v31 = vshll.u32 %v5329_v2, 16 }
  0x55   : > { %v2212_v26 = vrot.slane %v2211_v16, 4  ;;  %v433_v33 = vrot.slane %v431_v23, 5  ;;  %v2221_v38 = vrot.slane %v2219_v24, 4  ;;  %v2228_v40 = vshll.u32 %v6986_v8, 16  ;;  %v7016_v16 = vld [vmem:[%s6807_s11 + $0x64] sm:$0xf] }
  0x56   : > { %v428_v32 = vor.u32 %v427_v22, %v423_v18  ;;  %v419_v45 = vrot.slane %v418_v27, 4  ;;  %v2224_v48 = vrot.slane %v2222_v31, 5  ;;  %v2232_v50 = vshrl.u32 %v6986_v8, 16 }
  0x57   : > { %v2217_v44 = vsel %vm6833_vm5, %v2212_v26, %v2216_v11  ;;  %v2230_v55 = vrot.slane %v2228_v40, 5  ;;  %v2238_v56 = vshll.u32 %v6992_v28, 16  ;;  %v436_v62 = vshrl.u32 %v6996_v10, 16  ;;  %v5332_v11 = vld [vmem:[%s6807_s11 + $0x60] sm:$0xf] }
  0x58   : > { %v5365_v53 = vcombine.low %v2207_v25, %v2217_v44  ;;  %v429_v54 = vrot.slane %v428_v32, 4  ;;  %v424_v57 = vsel %vm6833_vm5, %v419_v45, %v423_v18  ;;  %v2225_v58 = vor.u32 %v2224_v48, %v2221_v38  ;;  %v7023_v26 = vld [vmem:[%s6807_s11 + $0x68] sm:$0x1]  ;;  %v7027_v44 = vld [vmem:[%s6807_s11 + $0x60] sm:$0xf] }
  0x59   : > { %v2234_v60 = vrot.slane %v2232_v50, 4  ;;  %v2240_v0 = vrot.slane %v2238_v56, 5  ;;  %v439_v2 = vshll.u32 %v6996_v10, 16  ;;  %v445_v6 = vshll.u32 %v7002_v51, 16 }
  0x5a   : > { %6039 = vmatmul.mubr.msk.bf16.gmra.mrb[8].mxu0 %vm701_vm4, %v5365_v53  ;;  %v434_v63 = vsel %vm6833_vm5, %v429_v54, %v433_v33  ;;  %v2226_v13 = vrot.slane %v2225_v58, 4  ;;  %v438_v15 = vrot.slane %v436_v62, 4  ;;  %v449_v22 = vshrl.u32 %v7002_v51, 16  ;;  %v7033_v54 = vld [vmem:[%s6807_s11 + $0x64] sm:$0xf] }
  0x5b   : > { %v5139_v12 = vcombine.low %v424_v57, %v434_v63  ;;  %v2235_v14 = vor.u32 %v2234_v60, %v2230_v55  ;;  %v441_v17 = vrot.slane %v439_v2, 5  ;;  %v447_v18 = vrot.slane %v445_v6, 5  ;;  %v256_v6 = vld [vmem:[%s6807_s11 + $0x68] sm:$0x1] }
  0x5c   : > { %v455_v23 = vshll.u32 %v255_v61, 16  ;;  %v2231_v24 = vsel %vm6833_vm5, %v2226_v13, %v2230_v55  ;;  %v2243_v27 = vshrl.u32 %v5332_v11, 16  ;;  %v2246_v31 = vshll.u32 %v5332_v11, 16 }
  0x5d   : > { %5906 = vmatprep.mubr.msk.bf16.mxu1 %vm701_vm4, %v5139_v12  ;;  %v2236_v25 = vrot.slane %v2235_v14, 4  ;;  %v442_v32 = vor.u32 %v441_v17, %v438_v15  ;;  %v451_v33 = vrot.slane %v449_v22, 4  ;;  %v2252_v40 = vshll.u32 %v7016_v16, 16  ;;  %v5392_v22 = vld [vmem:[%s6807_s11 + $0xc] sm:$0xe] }
  0x5e   : > { %v457_v38 = vrot.slane %v455_v23, 5  ;;  %v2245_v48 = vrot.slane %v2243_v27, 4  ;;  %v2248_v50 = vrot.slane %v2246_v31, 5  ;;  %v2256_v53 = vshrl.u32 %v7016_v16, 16 }
  0x5f   : > { %v2241_v45 = vsel %vm6833_vm5, %v2236_v25, %v2240_v0  ;;  %v443_v56 = vrot.slane %v442_v32, 4  ;;  %v452_v57 = vor.u32 %v451_v33, %v447_v18  ;;  %v2254_v58 = vrot.slane %v2252_v40, 5 }
  0x60   : > { %v5366_v55 = vcombine.low %v2231_v24, %v2241_v45  ;;  %v2249_v60 = vor.u32 %v2248_v50, %v2245_v48  ;;  %v2258_v61 = vrot.slane %v2256_v53, 4  ;;  %v2262_v62 = vshll.u32 %v7023_v26, 16 }
  0x61   : > { %v460_v63 = vshrl.u32 %v7027_v44, 16  ;;  %v448_v0 = vsel %vm6833_vm5, %v443_v56, %v447_v18  ;;  %v453_v2 = vrot.slane %v452_v57, 4  ;;  %v463_v11 = vshll.u32 %v7027_v44, 16  ;;  %v7048_v18 = vld [vmem:[%s6807_s11 + $0x6c] sm:$0xf] }
  0x62   : > { %6042 = vmatprep.mubr.msk.bf16.mxu0 %vm701_vm4, %v5366_v55  ;;  %v469_v12 = vshll.u32 %v7033_v54, 16  ;;  %v2250_v13 = vrot.slane %v2249_v60, 4  ;;  %v2259_v14 = vor.u32 %v2258_v61, %v2254_v58  ;;  %v2264_v15 = vrot.slane %v2262_v62, 5  ;;  %v7061_v55 = vld [vmem:[%s6807_s11 + $0x70] sm:$0xf] }
  0x63   : > { %v462_v17 = vrot.slane %v460_v63, 4  ;;  %v458_v23 = vsel %vm6833_vm5, %v453_v2, %v457_v38  ;;  %v465_v24 = vrot.slane %v463_v11, 5  ;;  %v473_v27 = vshrl.u32 %v7033_v54, 16  ;;  %v257_v2 = vld [vmem:[%s6807_s11 + $0x74] sm:$0x1] }
  0x64   : > { %v471_v25 = vrot.slane %v469_v12, 5  ;;  %v5140_v31 = vcombine.low %v448_v0, %v458_v23  ;;  %v2255_v32 = vsel %vm6833_vm5, %v2250_v13, %v2254_v58  ;;  %v2260_v33 = vrot.slane %v2259_v14, 4  ;;  %v258_v23 = vld [vmem:[%s6807_s11 + $0x80] sm:$0x1] }
  0x65   : > { %v479_v40 = vshll.u32 %v256_v6, 16  ;;  %v466_v38 = vor.u32 %v465_v24, %v462_v17  ;;  %v475_v48 = vrot.slane %v473_v27, 4  ;;  %v5408_v50 = vrot.slane %v5392_v22, 9  ;;  %v5393_v6 = vld [vmem:[%s6807_s11 + $0x18] sm:$0xe] }
  0x66   : > { %v2820_v53 = vrot.slane %v2818_v3, 4  ;;  %5907 = vmatmul.mubr.msk.bf16.gmra.mrb[12].mxu1 %vm701_vm4, %v5140_v31  ;;  %v2265_v56 = vsel %vm6833_vm5, %v2260_v33, %v2264_v15  ;;  %v484_v58 = vshrl.u32 %v7048_v18, 16  ;;  %v487_v60 = vshll.u32 %v7048_v18, 16  ;;  %v7080_v15 = vld [vmem:[%s6807_s11 + $0x78] sm:$0xf] }
  0x67   : > { %v481_v57 = vrot.slane %v479_v40, 5  ;;  %v5367_v61 = vcombine.low %v2255_v32, %v2265_v56  ;;  %v467_v62 = vrot.slane %v466_v38, 4  ;;  %v476_v63 = vor.u32 %v475_v48, %v471_v25  ;;  %v5394_v38 = vld [vmem:[%s6807_s11 + $0x24] sm:$0xe] }
  0x68   : > { %v2819_v0 = vsel %vm7054_vm8, %v5408_v50, %v2818_v3  ;;  %v2822_v11 = vsel %vm7054_vm8, %v2820_v53, %v2821_v5  ;;  %v486_v12 = vrot.slane %v484_v58, 4  ;;  %v489_v13 = vrot.slane %v487_v60, 5 }
  0x69   : > { %v493_v14 = vshll.u32 %v7061_v55, 16  ;;  %6043 = vmatmul.mubr.msk.bf16.gmra.mrb[12].mxu0 %vm701_vm4, %v5367_v61  ;;  %v472_v20 = vsel %vm6833_vm5, %v467_v62, %v471_v25  ;;  %v477_v3 = vrot.slane %v476_v63, 4  ;;  %v5425_v17 = vcombine.low %v2819_v0, %v2822_v11  ;;  %v7106_v61 = vld [vmem:[%s6807_s11 + $0x84] sm:$0xf] }
  0x6a   : > { %v497_v22 = vshrl.u32 %v7061_v55, 16  ;;  %v490_v5 = vor.u32 %v489_v13, %v486_v12  ;;  %v503_v27 = vshll.u32 %v257_v2, 16  ;;  %v5409_v31 = vrot.slane %v5393_v6, 9 }
  0x6b   : > { %v495_v24 = vrot.slane %v493_v14, 5  ;;  %v482_v32 = vsel %vm6833_vm5, %v477_v3, %v481_v57  ;;  %6064 = vmatprep.mubr.msk.bf16.mxu0 %vm701_vm4, %v5425_v17  ;;  %v2829_v25 = vsel %vm7054_vm8, %v6875_v36, %v2828_v34  ;;  %v508_v40 = vshrl.u32 %v7080_v15, 16 }
  0x6c   : > { %v499_v33 = vrot.slane %v497_v22, 4  ;;  %v5141_v48 = vcombine.low %v472_v20, %v482_v32  ;;  %v491_v50 = vrot.slane %v490_v5, 4  ;;  %v505_v53 = vrot.slane %v503_v27, 5  ;;  %v259_v20 = vld [vmem:[%s6807_s11 + $0x8c] sm:$0x1] }
  0x6d   : > { %v2826_v56 = vsel %vm7054_vm8, %v5409_v31, %v2825_v29  ;;  %v510_v60 = vrot.slane %v508_v40, 4  ;;  %v511_v9 = vshll.u32 %v7080_v15, 16  ;;  %v517_v36 = vshll.u32 %v7087_v21, 16  ;;  %v7114_v29 = vld [vmem:[%s6807_s11 + $0x88] sm:$0xf] }
  0x6e   : > { %v500_v57 = vor.u32 %v499_v33, %v495_v24  ;;  %v5426_v58 = vcombine.low %v2826_v56, %v2829_v25  ;;  %5910 = vmatprep.mubr.msk.bf16.mxu1 %vm701_vm4, %v5141_v48  ;;  %v496_v34 = vsel %vm6833_vm5, %v491_v50, %v495_v24  ;;  %v521_v1 = vshrl.u32 %v7087_v21, 16  ;;  %v5395_v5 = vld [vmem:[%s6807_s11 + $0x30] sm:$0xe] }
  0x6f   : > { %v527_v62 = vshll.u32 %v258_v23, 16  ;;  %v513_v0 = vrot.slane %v511_v9, 5  ;;  %v5410_v2 = vrot.slane %v5394_v38, 9  ;;  %v2832_v6 = vrot.slane %v6882_v52, 5  ;;  %v7133_v40 = vld [vmem:[%s6807_s11 + $0x90] sm:$0xf] }
  0x70   : > { %v501_v63 = vrot.slane %v500_v57, 4  ;;  %v519_v11 = vrot.slane %v517_v36, 5  ;;  %v523_v12 = vrot.slane %v521_v1, 4  ;;  %v2835_v14 = vrot.slane %v6888_v59, 5  ;;  %v7143_v1 = vld [vmem:[%s6807_s11 + $0x94] sm:$0xf] }
  0x71   : > { %v529_v13 = vrot.slane %v527_v62, 5  ;;  %6065 = vmatmul.mubr.msk.bf16.vlgmr.msra.gmra.mrb[0].mxu0 %vm701_vm4, %v5426_v58  ;;  %v514_v17 = vor.u32 %v513_v0, %v510_v60  ;;  %v2833_v22 = vsel %vm7054_vm8, %v5410_v2, %v2832_v6  ;;  %v2834_v23 = vrot.slane %v2832_v6, 4  ;;  %v260_v62 = vld [vmem:[%s6807_s11 + $0x98] sm:$0x1] }
  0x72   : > { %v506_v3 = vsel %vm6833_vm5, %v501_v63, %v505_v53  ;;  %6097 = vmatpush3.bf16.msra.mxu0 %v6839_v42  ;;  %v524_v52 = vor.u32 %v523_v12, %v519_v11  ;;  %v532_v27 = vshrl.u32 %v7106_v61, 16  ;;  %v535_v59 = vshll.u32 %v7106_v61, 16 }
  0x73   : > { %v5142_v24 = vcombine.low %v496_v34, %v506_v3  ;;  %v515_v31 = vrot.slane %v514_v17, 4  ;;  %v2836_v32 = vsel %vm7054_vm8, %v2834_v23, %v2835_v14  ;;  %v541_v33 = vshll.u32 %v7114_v29, 16  ;;  %v7152_v3 = vld [vmem:[%s6807_s11 + $0x9c] sm:$0xf] }
  0x74   : > { %v545_v25 = vshrl.u32 %v7114_v29, 16  ;;  %v525_v42 = vrot.slane %v524_v52, 4  ;;  %v5427_v38 = vcombine.low %v2833_v22, %v2836_v32  ;;  %v534_v48 = vrot.slane %v532_v27, 4  ;;  %v7163_v27 = vld [vmem:[%s6807_s11 + $0xa0] sm:$0xf] }
  0x75   : > { %5911 = vmatmul.mubr.msk.bf16.gmra.mrb[16].mxu1 %vm701_vm4, %v5142_v24  ;;  %v537_v50 = vrot.slane %v535_v59, 5  ;;  %v520_v53 = vsel %vm6833_vm5, %v515_v31, %v519_v11  ;;  %v543_v56 = vrot.slane %v541_v33, 5  ;;  %v551_v58 = vshll.u32 %v259_v20, 16  ;;  %v5396_v11 = vld [vmem:[%s6807_s11 + $0x3c] sm:$0xe] }
  0x76   : > { %v547_v57 = vrot.slane %v545_v25, 4  ;;  %v530_v60 = vsel %vm6833_vm5, %v525_v42, %v529_v13  ;;  %6068 = vmatprep.mubr.msk.bf16.mxu0 %vm701_vm4, %v5427_v38  ;;  %v5411_v34 = vrot.slane %v5395_v5, 9  ;;  %v2839_v36 = vrot.slane %v6908_v39, 5 }
  0x77   : > { %v538_v9 = vor.u32 %v537_v50, %v534_v48  ;;  %v5143_v63 = vcombine.low %v520_v53, %v530_v60  ;;  %v553_v2 = vrot.slane %v551_v58, 5  ;;  %v2842_v6 = vrot.slane %v6915_v47, 5  ;;  %v261_v50 = vld [vmem:[%s6807_s11 + $0xa4] sm:$0x1]  ;;  %v5397_v53 = vld [vmem:[%s6807_s11 + $0x48] sm:$0xe] }
  0x78   : > { %v548_v0 = vor.u32 %v547_v57, %v543_v56  ;;  %v2840_v13 = vsel %vm7054_vm8, %v5411_v34, %v2839_v36  ;;  %v2841_v14 = vrot.slane %v2839_v36, 4  ;;  %v556_v20 = vshrl.u32 %v7133_v40, 16 }
  0x79   : > { %v539_v12 = vrot.slane %v538_v9, 4  ;;  %5914 = vmatprep.mubr.msk.bf16.mxu1 %vm701_vm4, %v5143_v63  ;;  %v559_v17 = vshll.u32 %v7133_v40, 16  ;;  %v565_v22 = vshll.u32 %v7143_v1, 16  ;;  %v569_v47 = vshrl.u32 %v7143_v1, 16 }
  0x7a   : > { %v549_v39 = vrot.slane %v548_v0, 4  ;;  %v2843_v5 = vsel %vm7054_vm8, %v2841_v14, %v2842_v6  ;;  %v558_v24 = vrot.slane %v556_v20, 4  ;;  %v575_v52 = vshll.u32 %v260_v62, 16 }
  0x7b   : > { %v544_v23 = vsel %vm6833_vm5, %v539_v12, %v543_v56  ;;  %v5428_v31 = vcombine.low %v2840_v13, %v2843_v5  ;;  %v561_v32 = vrot.slane %v559_v17, 5  ;;  %v567_v33 = vrot.slane %v565_v22, 5  ;;  %v7184_v17 = vld [vmem:[%s6807_s11 + $0xa8] sm:$0xf] }
  0x7c   : > { %v554_v59 = vsel %vm6833_vm5, %v549_v39, %v553_v2  ;;  %v571_v42 = vrot.slane %v569_v47, 4  ;;  %v577_v38 = vrot.slane %v575_v52, 5  ;;  %v5412_v48 = vrot.slane %v5396_v11, 9 }
  0x7d   : > { %v5144_v25 = vcombine.low %v544_v23, %v554_v59  ;;  %6069 = vmatmul.mubr.msk.bf16.gmra.mrb[4].mxu0 %vm701_vm4, %v5428_v31  ;;  %v562_v56 = vor.u32 %v561_v32, %v558_v24  ;;  %v2846_v57 = vrot.slane %v6932_v30, 5  ;;  %v2849_v58 = vrot.slane %v6937_v43, 5  ;;  %v7189_v24 = vld [vmem:[%s6807_s11 + $0xac] sm:$0xf] }
  0x7e   : > { %v580_v60 = vshrl.u32 %v7152_v3, 16  ;;  %v572_v9 = vor.u32 %v571_v42, %v567_v33  ;;  %v583_v34 = vshll.u32 %v7152_v3, 16  ;;  %v589_v36 = vshll.u32 %v7163_v27, 16 }
  0x7f   : > { %5915 = vmatmul.mubr.msk.bf16.gmra.mrb[20].mxu1 %vm701_vm4, %v5144_v25  ;;  %v593_v62 = vshrl.u32 %v7163_v27, 16  ;;  %v563_v63 = vrot.slane %v562_v56, 4  ;;  %v2847_v0 = vsel %vm7054_vm8, %v5412_v48, %v2846_v57  ;;  %v2848_v30 = vrot.slane %v2846_v57, 4  ;;  %v5398_v25 = vld [vmem:[%s6807_s11 + $0x54] sm:$0xe] }
  0x80   : > { %v582_v2 = vrot.slane %v580_v60, 4  ;;  %v573_v43 = vrot.slane %v572_v9, 4  ;;  %v585_v6 = vrot.slane %v583_v34, 5  ;;  %v591_v11 = vrot.slane %v589_v36, 5  ;;  %v7204_v57 = vld [vmem:[%s6807_s11 + $0xb4] sm:$0xf] }
  0x81   : > { %v595_v12 = vrot.slane %v593_v62, 4  ;;  %v568_v13 = vsel %vm6833_vm5, %v563_v63, %v567_v33  ;;  %v2850_v14 = vsel %vm7054_vm8, %v2848_v30, %v2849_v58  ;;  %v599_v20 = vshll.u32 %v261_v50, 16  ;;  %v262_v33 = vld [vmem:[%s6807_s11 + $0xb0] sm:$0x1]  ;;  %v7213_v30 = vld [vmem:[%s6807_s11 + $0xb8] sm:$0xf] }
  0x82   : > { %v5413_v39 = vrot.slane %v5397_v53, 9  ;;  %v578_v22 = vsel %vm6833_vm5, %v573_v43, %v577_v38  ;;  %v5429_v47 = vcombine.low %v2847_v0, %v2850_v14  ;;  %v586_v23 = vor.u32 %v585_v6, %v582_v2 }
  0x83   : > { %v596_v5 = vor.u32 %v595_v12, %v591_v11  ;;  %v5145_v52 = vcombine.low %v568_v13, %v578_v22  ;;  %v601_v59 = vrot.slane %v599_v20, 5  ;;  %v2853_v31 = vrot.slane %v6955_v19, 5  ;;  %v7219_v20 = vld [vmem:[%s6807_s11 + $0xbc] sm:$0x1] }
  0x84   : > { %v2856_v32 = vrot.slane %v6963_v35, 5  ;;  %6072 = vmatprep.mubr.msk.bf16.mxu0 %vm701_vm4, %v5429_v47  ;;  %v587_v42 = vrot.slane %v586_v23, 4  ;;  %v604_v38 = vshrl.u32 %v7184_v17, 16  ;;  %v607_v50 = vshll.u32 %v7184_v17, 16 }
  0x85   : > { %v597_v48 = vrot.slane %v596_v5, 4  ;;  %5918 = vmatprep.mubr.msk.bf16.mxu1 %vm701_vm4, %v5145_v52  ;;  %v2854_v53 = vsel %vm7054_vm8, %v5413_v39, %v2853_v31  ;;  %v2855_v56 = vrot.slane %v2853_v31, 4  ;;  %v613_v19 = vshll.u32 %v7189_v24, 16  ;;  %v5399_v52 = vld [vmem:[%s6807_s11 + $0x60] sm:$0xe] }
  0x86   : > { %v617_v35 = vshrl.u32 %v7189_v24, 16  ;;  %v592_v58 = vsel %vm6833_vm5, %v587_v42, %v591_v11  ;;  %v606_v9 = vrot.slane %v604_v38, 4  ;;  %v609_v34 = vrot.slane %v607_v50, 5 }
  0x87   : > { %v602_v60 = vsel %vm6833_vm5, %v597_v48, %v601_v59  ;;  %v2857_v62 = vsel %vm7054_vm8, %v2855_v56, %v2856_v32  ;;  %v615_v63 = vrot.slane %v613_v19, 5  ;;  %v623_v6 = vshll.u32 %v262_v33, 16  ;;  %v5400_v48 = vld [vmem:[%s6807_s11 + $0x6c] sm:$0xe]  ;;  %v5336_v19 = vld [vmem:[%s6807_s11 + $0x70] sm:$0xf] }
  0x88   : > { %v5146_v36 = vcombine.low %v592_v58, %v602_v60  ;;  %v619_v0 = vrot.slane %v617_v35, 4  ;;  %v5430_v2 = vcombine.low %v2854_v53, %v2857_v62  ;;  %v610_v43 = vor.u32 %v609_v34, %v606_v9  ;;  %v5337_v35 = vld [vmem:[%s6807_s11 + $0x74] sm:$0x1] }
  0x89   : > { %v5414_v12 = vrot.slane %v5398_v25, 9  ;;  %v2860_v13 = vrot.slane %v6986_v8, 5  ;;  %v2863_v14 = vrot.slane %v6992_v28, 5  ;;  %v628_v39 = vshrl.u32 %v7204_v57, 16 }
  0x8a   : > { %5919 = vmatmul.mubr.msk.bf16.gmra.mrb[24].mxu1 %vm701_vm4, %v5146_v36  ;;  %v620_v11 = vor.u32 %v619_v0, %v615_v63  ;;  %6073 = vmatmul.mubr.msk.bf16.gmra.mrb[8].mxu0 %vm701_vm4, %v5430_v2  ;;  %v611_v22 = vrot.slane %v610_v43, 4  ;;  %v625_v47 = vrot.slane %v623_v6, 5  ;;  %v631_v23 = vshll.u32 %v7204_v57, 16 }
  0x8b   : > { %v637_v5 = vshll.u32 %v7213_v30, 16  ;;  %v2861_v8 = vsel %vm7054_vm8, %v5414_v12, %v2860_v13  ;;  %v2862_v28 = vrot.slane %v2860_v13, 4  ;;  %v630_v31 = vrot.slane %v628_v39, 4  ;;  %v5401_v13 = vld [vmem:[%s6807_s11 + $0x78] sm:$0xe] }
  0x8c   : > { %v621_v59 = vrot.slane %v620_v11, 4  ;;  %v616_v32 = vsel %vm6833_vm5, %v611_v22, %v615_v63  ;;  %v633_v33 = vrot.slane %v631_v23, 5  ;;  %v641_v42 = vshrl.u32 %v7213_v30, 16  ;;  %v6563_v23 = vld [vmem:[%s6807_s11] sm:$0xf] }
  0x8d   : > { %v639_v25 = vrot.slane %v637_v5, 5  ;;  %v2864_v50 = vsel %vm7054_vm8, %v2862_v28, %v2863_v14  ;;  %v647_v53 = vshll.u32 %v7219_v20, 16  ;;  %v5415_v56 = vrot.slane %v5399_v52, 9  ;;  %v7254_v5 = vld [vmem:[%s6807_s11 + $0x4] sm:$0xf] }
  0x8e   : > { %v626_v38 = vsel %vm6833_vm5, %v621_v59, %v625_v47  ;;  %v5431_v60 = vcombine.low %v2861_v8, %v2864_v50  ;;  %v634_v9 = vor.u32 %v633_v33, %v630_v31  ;;  %v643_v34 = vrot.slane %v641_v42, 4  ;;  %v7258_v59 = vld [vmem:[%s6807_s11 + $0x7c] sm:$0xf]  ;;  %v7261_v8 = vld [vmem:[%s6807_s11 + $0x80] sm:$0x1] }
  0x8f   : > { %v5147_v58 = vcombine.low %v616_v32, %v626_v38  ;;  %v649_v36 = vrot.slane %v647_v53, 5  ;;  %v2867_v62 = vrot.slane %v7016_v16, 5  ;;  %v2870_v63 = vrot.slane %v7023_v26, 5  ;;  %v5402_v28 = vld [vmem:[%s6807_s11 + $0x84] sm:$0xe] }
  0x90   : > { %v5416_v0 = vrot.slane %v5400_v48, 9  ;;  %6076 = vmatprep.mubr.msk.bf16.mxu0 %vm701_vm4, %v5431_v60  ;;  %v635_v2 = vrot.slane %v634_v9, 4  ;;  %v644_v43 = vor.u32 %v643_v34, %v639_v25  ;;  %v2874_v6 = vrot.slane %v5336_v19, 5  ;;  %v5342_v42 = vld [vmem:[%s6807_s11 + $0x88] sm:$0xf] }
  0x91   : > { %5922 = vmatprep.mubr.msk.bf16.mxu1 %vm701_vm4, %v5147_v58  ;;  %v2877_v12 = vrot.slane %v5337_v35, 5  ;;  %v2868_v11 = vsel %vm7054_vm8, %v5415_v56, %v2867_v62  ;;  %v2869_v16 = vrot.slane %v2867_v62, 4  ;;  %v5165_v52 = vcombine.low %v6563_v23, %v7254_v5  ;;  %v5343_v48 = vld [vmem:[%s6807_s11 + $0x8c] sm:$0x1]  ;;  %v5345_v53 = vld [vmem:[%s6807_s11 + $0x94] sm:$0xf] }
  0x92   : > { %v640_v26 = vsel %vm6833_vm5, %v635_v2, %v639_v25  ;;  %v645_v14 = vrot.slane %v644_v43, 4  ;;  %v2875_v39 = vsel %vm7054_vm8, %v5416_v0, %v2874_v6  ;;  %v2876_v22 = vrot.slane %v2874_v6, 4  ;;  %v5346_v9 = vld [vmem:[%s6807_s11 + $0x98] sm:$0x1]  ;;  %v5403_v34 = vld [vmem:[%s6807_s11 + $0x90] sm:$0xe] }
  0x93   : > { %v2871_v47 = vsel %vm7054_vm8, %v2869_v16, %v2870_v63  ;;  %v5417_v25 = vrot.slane %v5401_v13, 9  ;;  %v2881_v56 = vrot.slane %v7258_v59, 5  ;;  %v2884_v19 = vrot.slane %v7261_v8, 5  ;;  %v5348_v0 = vld [vmem:[%s6807_s11 + $0xa0] sm:$0xf] }
  0x94   : > { %v650_v31 = vsel %vm6833_vm5, %v645_v14, %v649_v36  ;;  %v5432_v32 = vcombine.low %v2868_v11, %v2871_v47  ;;  %v2878_v33 = vsel %vm7054_vm8, %v2876_v22, %v2877_v12  ;;  %v5418_v35 = vrot.slane %v5402_v28, 9  ;;  %v5349_v6 = vld [vmem:[%s6807_s11 + $0xa4] sm:$0x1]  ;;  %v5404_v12 = vld [vmem:[%s6807_s11 + $0x9c] sm:$0xe] }
  0x95   : > { %v5148_v38 = vcombine.low %v640_v26, %v650_v31  ;;  %v5433_v50 = vcombine.low %v2875_v39, %v2878_v33  ;;  %v2888_v58 = vrot.slane %v5342_v42, 5  ;;  %v2891_v60 = vrot.slane %v5343_v48, 5  ;;  %v6565_v11 = vld [vmem:[%s6807_s11 + $0xc] sm:$0xf]  ;;  %v7288_v16 = vld [vmem:[%s6807_s11 + $0x10] sm:$0xf] }
  0x96   : > { %6077 = vmatmul.mubr.msk.bf16.gmra.mrb[12].mxu0 %vm701_vm4, %v5432_v32  ;;  %v2882_v36 = vsel %vm7054_vm8, %v5417_v25, %v2881_v56  ;;  %v2883_v62 = vrot.slane %v2881_v56, 4  ;;  %v2895_v63 = vrot.slane %v5345_v53, 5  ;;  %v5166_v13 = vcombine.low %v6565_v11, %v7288_v16  ;;  %v6567_v28 = vld [vmem:[%s6807_s11 + $0x18] sm:$0xf]  ;;  %v7297_v31 = vld [vmem:[%s6807_s11 + $0x1c] sm:$0xf] }
  0x97   : > { %5923 = vmatmul.mubr.msk.bf16.gmra.mrb[28].mxu1 %vm701_vm4, %v5148_v38  ;;  %6080 = vmatprep.mubr.msk.bf16.mxu0 %vm701_vm4, %v5433_v50  ;;  %v2889_v2 = vsel %vm7054_vm8, %v5418_v35, %v2888_v58  ;;  %v2890_v43 = vrot.slane %v2888_v58, 4  ;;  %v5419_v14 = vrot.slane %v5403_v34, 9  ;;  %v2898_v39 = vrot.slane %v5346_v9, 5  ;;  %v5351_v48 = vld [vmem:[%s6807_s11 + $0xac] sm:$0xf] }
  0x98   : > { %5928 = vmatprep.mubr.msk.bf16.mxu1 %vm701_vm4, %v5165_v52  ;;  %v2885_v26 = vsel %vm7054_vm8, %v2883_v62, %v2884_v19  ;;  %v2897_v23 = vrot.slane %v2895_v63, 4  ;;  %v2902_v52 = vrot.slane %v5348_v0, 5  ;;  %v5167_v32 = vcombine.low %v6567_v28, %v7297_v31  ;;  %v5354_v50 = vld [vmem:[%s6807_s11 + $0xb8] sm:$0xf]  ;;  %v5352_v53 = vld [vmem:[%s6807_s11 + $0xb0] sm:$0x1] }
  0x99   : > { %v5434_v22 = vcombine.low %v2882_v36, %v2885_v26  ;;  %v2892_v47 = vsel %vm7054_vm8, %v2890_v43, %v2891_v60  ;;  %v5420_v25 = vrot.slane %v5404_v12, 9  ;;  %v2905_v42 = vrot.slane %v5349_v6, 5  ;;  %v5405_v56 = vld [vmem:[%s6807_s11 + $0xa8] sm:$0xe]  ;;  %v5570_v60 = vld [vmem:[%s8678_s1 + $0xe] sm:$0x3] }
  0x9a   : > { %v5435_v33 = vcombine.low %v2889_v2, %v2892_v47  ;;  %v2904_v38 = vrot.slane %v2902_v52, 4  ;;  %v2896_v19 = vsel %vm7054_vm8, %v5419_v14, %v2895_v63  ;;  %v2899_v35 = vsel %vm7054_vm8, %v2897_v23, %v2898_v39  ;;  %v5406_v36 = vld [vmem:[%s6807_s11 + $0xb4] sm:$0xe]  ;;  %v5355_v63 = vld [vmem:[%s6807_s11 + $0xbc] sm:$0x1] }
  0x9b   : > { %v2909_v58 = vrot.slane %v5351_v48, 5  ;;  %v2903_v9 = vsel %vm7054_vm8, %v5420_v25, %v2902_v52  ;;  %v2916_v62 = vrot.slane %v5354_v50, 5  ;;  %v6569_v0 = vld [vmem:[%s6807_s11 + $0x24] sm:$0xf]  ;;  %v7324_v2 = vld [vmem:[%s6807_s11 + $0x28] sm:$0xf]  ;;  %v5436_v6 = vcombine.low %v2896_v19, %v2899_v35 }
  0x9c   : > { %v2906_v34 = vsel %vm7054_vm8, %v2904_v38, %v2905_v42  ;;  %v5168_v43 = vcombine.low %v6569_v0, %v7324_v2  ;;  %v5357_v12 = vld [vmem:[%s6807_s11 + $0xc4] sm:$0xf]  ;;  %v7329_v11 = vand.u32 %v5570_v60, %v6783_v4  ;;  %v2912_v14 = vrot.slane %v5352_v53, 5  ;;  %v6571_v47 = vld [vmem:[%s6807_s11 + $0x30] sm:$0xf] }
  0x9d   : > { %v2911_v26 = vrot.slane %v2909_v58, 4  ;;  %v5422_v39 = vrot.slane %v5406_v36, 9  ;;  %v7336_v23 = vld [vmem:[%s6807_s11 + $0x34] sm:$0xf]  ;;  %v2918_v28 = vrot.slane %v2916_v62, 4  ;;  %v2923_v48 = vrot.slane %v5357_v12, 5 }
  0x9e   : > { %6081 = vmatmul.mubr.msk.bf16.gmra.mrb[16].mxu0 %vm701_vm4, %v5434_v22  ;;  %v5278_v22 = vld [vmem:[%s8678_s1 + $0x6] sm:$0x3]  ;;  %v5169_v52 = vcombine.low %v6571_v47, %v7336_v23  ;;  %6130 = vmatprep.subr.bf16.mxu0 %v7329_v11  ;;  %v5358_v53 = vld [vmem:[%s6807_s11 + $0xc8] sm:$0x1]  ;;  %v6573_v19 = vld [vmem:[%s6807_s11 + $0x3c] sm:$0xf] }
  0x9f   : > { %5929 = vmatmul.mubr.msk.bf16.vlgmr.msra.gmra.mrb[0].mxu1 %vm701_vm4, %v5166_v13  ;;  %6084 = vmatprep.mubr.msk.bf16.mxu0 %vm701_vm4, %v5435_v33  ;;  %v5437_v13 = vcombine.low %v2903_v9, %v2906_v34  ;;  %v7342_v33 = vand.u32 %v5278_v22, %v6783_v4  ;;  %v2913_v42 = vsel %vm7054_vm8, %v2911_v26, %v2912_v14  ;;  %v7360_v35 = vld [vmem:[%s6807_s11 + $0x40] sm:$0xf]  ;;  %v2925_v36 = vrot.slane %v2923_v48, 4  ;;  %v6524_v12 = vld [vmem:[%s6807_s11 + $0x18] sm:$0xff]   ;;  %v6575_v47 = vld [vmem:[%s6807_s11 + $0x8] sm:$0x1] }
  0xa0   : > { %5961 = vmatpush3.bf16.msra.mxu1 %v6842_v46  ;;  %5932 = vmatprep.mubr.msk.bf16.mxu1 %vm701_vm4, %v5167_v32  ;;  %v5421_v46 = vrot.slane %v5405_v56, 9  ;;  %v2919_v32 = vrot.slane %v5355_v63, 5  ;;  %v2917_v38 = vsel %vm7054_vm8, %v5422_v39, %v2916_v62  ;;  %v5407_v56 = vld [vmem:[%s6807_s11 + $0xc0] sm:$0xe]  ;;  %v2926_v63 = vrot.slane %v5358_v53, 5 }
  0xa1   : > { %5994 = vmatprep.subr.bf16.mxu1 %v7342_v33  ;;  %v5423_v34 = vrot.slane %v5407_v56, 9  ;;  %v5171_v62 = vcombine.low %v6967_v41, %v6970_v49  ;;  %v2304_v41 = vshrl.u32 %v7258_v59, 16  ;;  %v5173_v26 = vcombine.low %v7027_v44, %v7033_v54  ;;  %v1210_v22 = vld [vmem:[%s6807_s11] sm:$0xe]  ;;  %v6576_v44 = vld [vmem:[%s6807_s11 + $0x14] sm:$0x1] }
  0xa2   : > { %v2910_v25 = vsel %vm7054_vm8, %v5421_v46, %v2909_v58  ;;  %v2920_v50 = vsel %vm7054_vm8, %v2918_v28, %v2919_v32  ;;  %v5170_v58 = vcombine.low %v6573_v19, %v7360_v35  ;;  %v5172_v46 = vcombine.low %v6996_v10, %v7002_v51  ;;  %v1212_v51 = vld [vmem:[%s6807_s11 + $0x18] sm:$0xe]  ;;  %v1214_v53 = vld [vmem:[%s6807_s11 + $0x30] sm:$0xe] }
  0xa3   : > { %v5438_v60 = vcombine.low %v2910_v25, %v2913_v42  ;;  %v5439_v9 = vcombine.low %v2917_v38, %v2920_v50  ;;  %v2924_v0 = vsel %vm7054_vm8, %v5423_v34, %v2923_v48  ;;  %v2306_v39 = vrot.slane %v2304_v41, 4  ;;  %v1213_v25 = vld [vmem:[%s6807_s11 + $0x24] sm:$0xe]  ;;  %v6528_v56 = vld [vmem:[%s6807_s11 + $0x30] sm:$0xff]  }
  0xa4   : > { %v1263_v10 = vrot.slane %v7254_v5, 5  ;;  %v1273_v54 = vrot.slane %v6576_v44, 5  ;;  %v5197_v28 = vrot.slane %v1210_v22, 9  ;;  %v1277_v32 = vrot.slane %v7297_v31, 5  ;;  %v6526_v38 = vld [vmem:[%s6807_s11 + $0x24] sm:$0xff]  }
  0xa5   : > { %v5174_v48 = vcombine.low %v7048_v18, %v7061_v55  ;;  %v1284_v50 = vrot.slane %v7324_v2, 5  ;;  %v5176_v31 = vcombine.low %v7106_v61, %v7114_v29  ;;  %v5635_v18 = vld [vmem:[%s8678_s1 + $0x10] sm:$0x3]  ;;  %v5199_v2 = vrot.slane %v1212_v51, 9  ;;  %v6580_v22 = vld [vmem:[%s6807_s11 + $0x4c] sm:$0xf] }
  0xa6   : > { %6085 = vmatmul.mubr.msk.bf16.gmra.mrb[20].mxu0 %vm701_vm4, %v5436_v6  ;;  %v2300_v6 = vshll.u32 %v7258_v59, 16  ;;  %v1211_v59 = vld [vmem:[%s6807_s11 + $0xc] sm:$0xe]  ;;  %v1265_v55 = vrot.slane %v1263_v10, 4  ;;  %v5200_v34 = vrot.slane %v1213_v25, 9  ;;  %v6530_v25 = vld [vmem:[%s6807_s11 + $0x3c] sm:$0xff]  }
  0xa7   : > { %5933 = vmatmul.mubr.msk.bf16.gmra.mrb[4].mxu1 %vm701_vm4, %v5168_v43  ;;  %6088 = vmatprep.mubr.msk.bf16.mxu0 %vm701_vm4, %v5437_v13  ;;  %v2927_v43 = vsel %vm7054_vm8, %v2925_v36, %v2926_v63  ;;  %v1270_v13 = vrot.slane %v7288_v16, 5  ;;  %v2310_v16 = vshll.u32 %v7261_v8, 16  ;;  %v5198_v5 = vrot.slane %v1211_v59, 9  ;;  %v1215_v63 = vld [vmem:[%s6807_s11 + $0x3c] sm:$0xe] }
  0xa8   : > { %5936 = vmatprep.mubr.msk.bf16.mxu1 %vm701_vm4, %v5169_v52  ;;  %v5440_v49 = vcombine.low %v2924_v0, %v2927_v43  ;;  %v7381_v14 = vrot.slane %v2300_v6, 5  ;;  %v1266_v52 = vrot.slane %v6575_v47, 5  ;;  %v5175_v8 = vcombine.low %v7080_v15, %v7087_v21  ;;  %v6578_v6 = vld [vmem:[%s6807_s11 + $0x2c] sm:$0x1]  ;;  %v6586_v61 = vld [vmem:[%s6807_s11 + $0x68] sm:$0x1] }
  0xa9   : > { %v1272_v19 = vrot.slane %v1270_v13, 4  ;;  %v5177_v15 = vcombine.low %v7133_v40, %v7143_v1  ;;  %v7416_v21 = vsel %vm7054_vm8, %v5197_v28, %v1263_v10  ;;  %v1279_v36 = vrot.slane %v1277_v32, 4 }
  0xaa   : > { %8704 = vst [vmem:[#allocation6_spill] sm:$0xff] %v7381_v14  ;;  %v2307_v42 = vor.u32 %v2306_v39, %v7381_v14  ;;  %v7422_v0 = vsel %vm7054_vm8, %v5198_v5, %v1270_v13  ;;  %v1286_v43 = vrot.slane %v1284_v50, 4  ;;  %v1287_v41 = vrot.slane %v6578_v6, 5  ;;  %v6582_v5 = vld [vmem:[%s6807_s11 + $0x50] sm:$0x1] }
  0xab   : > { %v1298_v39 = vrot.slane %v7360_v35, 5  ;;  %v1305_v59 = vrot.slane %v6580_v22, 5  ;;  %v7432_v47 = vrot.slane %v2310_v16, 5  ;;  %v7442_v13 = vsel %vm7054_vm8, %v1272_v19, %v1273_v54  ;;  %v6581_v16 = vld [vmem:[%s6807_s11 + $0x44] sm:$0x1] }
  0xac   : > { %v7446_v35 = vsel %vm7054_vm8, %v5199_v2, %v1277_v32  ;;  %v7448_v10 = vrot.slane %v2307_v42, 4  ;;  %v7466_v44 = vsel %vm7054_vm8, %v1286_v43, %v1287_v41  ;;  %v5202_v54 = vrot.slane %v1215_v63, 9 }
  0xad   : > { %8705 = vst [vmem:[#allocation7_spill] sm:$0xff] %v7432_v47  ;;  %v1301_v28 = vrot.slane %v6581_v16, 5  ;;  %v1322_v29 = vrot.slane %v6586_v61, 5  ;;  %v6536_v61 = vld [vmem:[%s6807_s11 + $0x60] sm:$0xff]  }
  0xae   : > { %6089 = vmatmul.mubr.msk.bf16.gmra.mrb[24].mxu0 %vm701_vm4, %v5438_v60  ;;  %v6577_v60 = vld [vmem:[%s6807_s11 + $0x20] sm:$0x1]  ;;  %8706 = vst [vmem:[#allocation8_spill] sm:$0xff] %v7448_v10  ;;  %v7500_v6 = vsel %vm7054_vm8, %v5202_v54, %v1298_v39  ;;  %v5525_v54 = vld [vmem:[%s6807_s11 + $0x24] sm:$0xf] }
  0xaf   : > { %5937 = vmatmul.mubr.msk.bf16.gmra.mrb[8].mxu1 %vm701_vm4, %v5170_v58  ;;  %6092 = vmatprep.mubr.msk.bf16.mxu0 %vm701_vm4, %v5439_v9  ;;  %v1291_v58 = vrot.slane %v7336_v23, 5  ;;  %v1280_v9 = vrot.slane %v6577_v60, 5  ;;  %v5201_v23 = vrot.slane %v1214_v53, 9  ;;  %v6532_v53 = vld [vmem:[%s6807_s11 + $0x48] sm:$0xff]   ;;  %v3657_v40 = vshll.u32 %v5525_v54, 16 }
  0xb0   : > { %5940 = vmatprep.mubr.msk.bf16.mxu1 %vm701_vm4, %v5171_v62  ;;  %v1216_v62 = vld [vmem:[%s6807_s11 + $0x48] sm:$0xe]  ;;  %v1221_v10 = vld [vmem:[%s6807_s11 + $0x84] sm:$0xe] }
  0xb1   : > { %v7462_v51 = vsel %vm7054_vm8, %v5201_v23, %v1291_v58  ;;  %v5203_v32 = vrot.slane %v1216_v62, 9  ;;  %v6584_v23 = vld [vmem:[%s6807_s11 + $0x64] sm:$0xf]  ;;  %v6587_v62 = vld [vmem:[%s6807_s11 + $0x70] sm:$0xf] }
  0xb2   : > { %v1319_v63 = vrot.slane %v6584_v23, 5 }
  0xb3   : > { %v7504_v41 = vsel %vm7054_vm8, %v5203_v32, %v1305_v59 }
  0xb6   : > { %6093 = vmatmul.mubr.msk.bf16.gmra.mrb[28].mxu0 %vm701_vm4, %v5440_v49  ;;  %v7426_v49 = vand.u32 %v5635_v18, %v6783_v4  ;;  %v7438_v4 = vsel %vm7054_vm8, %v1265_v55, %v1266_v52  ;;  %v7458_v52 = vsel %vm7054_vm8, %v5200_v34, %v1284_v50  ;;  %v1308_v50 = vrot.slane %v6582_v5, 5  ;;  %v5522_v55 = vld [vmem:[%s6807_s11 + $0x18] sm:$0xf]  ;;  %v1217_v34 = vld [vmem:[%s6807_s11 + $0x54] sm:$0xe] }
  0xb7   : > { %5941 = vmatmul.mubr.msk.bf16.gmra.mrb[12].mxu1 %vm701_vm4, %v5172_v46  ;;  %6098 = vmatprep.mubr.msk.bf16.mxu0 %vm701_vm4, %v6524_v12  ;;  %v1293_v46 = vrot.slane %v1291_v58, 4  ;;  %v6579_v12 = vld [vmem:[%s6807_s11 + $0x38] sm:$0x1]  ;;  %v3633_v22 = vshll.u32 %v5522_v55, 16  ;;  %v5524_v5 = vld [vmem:[%s6807_s11 + $0x20] sm:$0x1] }
  0xb8   : > { %5944 = vmatprep.mubr.msk.bf16.mxu1 %vm701_vm4, %v5173_v26  ;;  %v1294_v26 = vrot.slane %v6579_v12, 5  ;;  %v6583_v58 = vld [vmem:[%s6807_s11 + $0x58] sm:$0xf] }
  0xb9   : > { %v1312_v18 = vrot.slane %v6583_v58, 5 }
  0xba   : > { %v7473_v42 = vsel %vm7054_vm8, %v1293_v46, %v1294_v26  ;;  %v5523_v46 = vld [vmem:[%s6807_s11 + $0x1c] sm:$0xf] }
  0xbb   : > { %v1314_v16 = vrot.slane %v1312_v18, 4 }
  0xbe   : > { %6099 = vmatmul.mubr.msk.bf16.vlgmr.msra.gmra.mrb[0].mxu0 %vm701_vm4, %v6526_v38  ;;  %v1307_v38 = vrot.slane %v1305_v59, 4  ;;  %v5204_v59 = vrot.slane %v1217_v34, 9  ;;  %v3654_v34 = vshrl.u32 %v5525_v54, 16  ;;  %v1219_v54 = vld [vmem:[%s6807_s11 + $0x6c] sm:$0xe] }
  0xbf   : > { %5945 = vmatmul.mubr.msk.bf16.gmra.mrb[16].mxu1 %vm701_vm4, %v5174_v48  ;;  %6131 = vmatpush3.bf16.msra.mxu0 %v7329_v11  ;;  %v7454_v11 = vsel %vm7054_vm8, %v1279_v36, %v1280_v9  ;;  %v1300_v48 = vrot.slane %v1298_v39, 4  ;;  %v1218_v36 = vld [vmem:[%s6807_s11 + $0x60] sm:$0xe]  ;;  %v3630_v39 = vshrl.u32 %v5522_v55, 16  ;;  %v5527_v9 = vld [vmem:[%s6807_s11 + $0x2c] sm:$0x1] }
  0xc0   : > { %5948 = vmatprep.mubr.msk.bf16.mxu1 %vm701_vm4, %v5175_v8  ;;  %6102 = vmatprep.mubr.msk.bf16.mxu0 %vm701_vm4, %v6528_v56  ;;  %v5178_v8 = vcombine.low %v7152_v3, %v7163_v27  ;;  %v5179_v56 = vcombine.low %v7184_v17, %v7189_v24  ;;  %v7514_v26 = vsel %vm7054_vm8, %v1307_v38, %v1308_v50  ;;  %v1321_v38 = vrot.slane %v1319_v63, 4 }
  0xc1   : > { %6164 = vmatprep.subr.bf16.mxu0 %v7426_v49  ;;  %v7510_v12 = vsel %vm7054_vm8, %v1300_v48, %v1301_v28  ;;  %v6585_v28 = vld [vmem:[%s6807_s11 + $0x5c] sm:$0x1]  ;;  %v5526_v48 = vld [vmem:[%s6807_s11 + $0x28] sm:$0xf]  ;;  %v3643_v50 = vshrl.u32 %v5523_v46, 16  ;;  %v3632_v1 = vrot.slane %v3630_v39, 4 }
  0xc2   : > { %v1315_v32 = vrot.slane %v6585_v28, 5  ;;  %v3667_v23 = vshrl.u32 %v5526_v48, 16  ;;  %v5528_v28 = vld [vmem:[%s6807_s11 + $0x30] sm:$0xf]  ;;  %v3649_v39 = vshll.u32 %v5524_v5, 16  ;;  %v3656_v60 = vrot.slane %v3654_v34, 4 }
  0xc3   : > { %v3645_v43 = vrot.slane %v3643_v50, 4  ;;  %v3681_v2 = vshll.u32 %v5528_v28, 16  ;;  %v3673_v34 = vshll.u32 %v5527_v9, 16  ;;  %v7588_v9 = vld [vmem:[%s6807_s11 + $0x38] sm:$0x1] }
  0xc4   : > { %v7543_v58 = vsel %vm7054_vm8, %v1314_v16, %v1315_v32  ;;  %v3659_v16 = vrot.slane %v3657_v40, 5  ;;  %v3678_v32 = vshrl.u32 %v5528_v28, 16  ;;  %v5531_v40 = vld [vmem:[%s6807_s11 + $0x3c] sm:$0xf]  ;;  %8707 = vst [vmem:[#allocation9_spill] sm:$0xff] %v7588_v9  ;;  %v3697_v14 = vshll.u32 %v7588_v9, 16 }
  0xc5   : > { %v6545_v9 = vld [vmem:[%s6807_s11 + $0xc0] sm:$0xff]  }
  0xc6   : > { %6103 = vmatmul.mubr.msk.bf16.gmra.mrb[4].mxu0 %vm701_vm4, %v6530_v25  ;;  %v5205_v25 = vrot.slane %v1218_v36, 9  ;;  %v3663_v36 = vshll.u32 %v5526_v48, 16  ;;  %v3680_v28 = vrot.slane %v3678_v32, 4  ;;  %v3705_v32 = vshll.u32 %v5531_v40, 16 }
  0xc7   : > { %5949 = vmatmul.mubr.msk.bf16.gmra.mrb[20].mxu1 %vm701_vm4, %v5176_v31  ;;  %6106 = vmatprep.mubr.msk.bf16.mxu0 %vm701_vm4, %v6532_v53  ;;  %v3639_v31 = vshll.u32 %v5523_v46, 16  ;;  %v6534_v53 = vld [vmem:[%s6807_s11 + $0x54] sm:$0xff]   ;;  %v7539_v46 = vsel %vm7054_vm8, %v5204_v59, %v1312_v18  ;;  %v1326_v18 = vrot.slane %v6587_v62, 5  ;;  %v6590_v62 = vld [vmem:[%s6807_s11 + $0x80] sm:$0x1] }
  0xc8   : > { %5952 = vmatprep.mubr.msk.bf16.mxu1 %vm701_vm4, %v5177_v15  ;;  %v3635_v15 = vrot.slane %v3633_v22, 5  ;;  %v7547_v55 = vsel %vm7054_vm8, %v5205_v25, %v1319_v63  ;;  %v7552_v22 = vsel %vm7054_vm8, %v1321_v38, %v1322_v29  ;;  %v5529_v59 = vld [vmem:[%s6807_s11 + $0x34] sm:$0xf]  ;;  %v5206_v25 = vrot.slane %v1219_v54, 9  ;;  %v6538_v54 = vld [vmem:[%s6807_s11 + $0x6c] sm:$0xff]  }
  0xc9   : > { %v7554_v48 = vrot.slane %v3639_v31, 5  ;;  %v7560_v5 = vrot.slane %v3663_v36, 5  ;;  %v3669_v38 = vrot.slane %v3667_v23, 4  ;;  %v3687_v31 = vshll.u32 %v5529_v59, 16  ;;  %v6589_v36 = vld [vmem:[%s6807_s11 + $0x7c] sm:$0xf] }
  0xca   : > { %v3636_v63 = vor.u32 %v3635_v15, %v3632_v1  ;;  %v3691_v50 = vshrl.u32 %v5529_v59, 16  ;;  %v1328_v27 = vrot.slane %v1326_v18, 4  ;;  %v3660_v1 = vor.u32 %v3659_v16, %v3656_v60  ;;  %v1220_v15 = vld [vmem:[%s6807_s11 + $0x78] sm:$0xe]  ;;  %v7593_v16 = vld [vmem:[%s6807_s11 + $0x40] sm:$0xf] }
  0xcb   : > { %v3646_v3 = vor.u32 %v3645_v43, %v7554_v48  ;;  %v1333_v23 = vrot.slane %v6589_v36, 5  ;;  %v6539_v59 = vld [vmem:[%s6807_s11 + $0x78] sm:$0xff]   ;;  %v7584_v43 = vsel %vm7054_vm8, %v5206_v25, %v1326_v18  ;;  %v7590_v29 = vrot.slane %v3687_v31, 5  ;;  %8708 = vst [vmem:[#allocation10_spill] sm:$0xff] %v7593_v16 }
  0xcc   : > { %v3637_v17 = vrot.slane %v3636_v63, 4  ;;  %v3693_v60 = vrot.slane %v3691_v50, 4  ;;  %v3675_v63 = vrot.slane %v3673_v34, 5  ;;  %v5207_v18 = vrot.slane %v1220_v15, 9 }
  0xcd   : > { %v3647_v36 = vrot.slane %v3646_v3, 4  ;;  %v3661_v25 = vrot.slane %v3660_v1, 4  ;;  %v1336_v19 = vrot.slane %v6590_v62, 5  ;;  %v3711_v3 = vshll.u32 %v7593_v16, 16 }
  0xce   : > { %6107 = vmatmul.mubr.msk.bf16.gmra.mrb[8].mxu0 %vm701_vm4, %v6534_v53  ;;  %v3694_v62 = vor.u32 %v3693_v60, %v7590_v29  ;;  %v3707_v15 = vrot.slane %v3705_v32, 5  ;;  %v6540_v60 = vld [vmem:[%s6807_s11 + $0x84] sm:$0xff]  }
  0xcf   : > { %5953 = vmatmul.mubr.msk.bf16.gmra.mrb[24].mxu1 %vm701_vm4, %v5178_v8  ;;  %6110 = vmatprep.mubr.msk.bf16.mxu0 %vm701_vm4, %v6536_v61  ;;  %v6588_v8 = vld [vmem:[%s6807_s11 + $0x74] sm:$0x1]  ;;  %v3683_v61 = vrot.slane %v3681_v2, 5  ;;  %v3702_v2 = vshrl.u32 %v5531_v40, 16  ;;  %v3715_v40 = vshrl.u32 %v7593_v16, 16  ;;  %v7641_v32 = vrot.slane %v3711_v3, 5 }
  0xd0   : > { %5956 = vmatprep.mubr.msk.bf16.mxu1 %vm701_vm4, %v5179_v56  ;;  %v1329_v53 = vrot.slane %v6588_v8, 5  ;;  %v3651_v56 = vrot.slane %v3649_v39, 5  ;;  %v3670_v8 = vor.u32 %v3669_v38, %v7560_v5  ;;  %v1335_v38 = vrot.slane %v1333_v23, 4 }
  0xd1   : > { %v3684_v31 = vor.u32 %v3683_v61, %v3680_v28  ;;  %v3704_v1 = vrot.slane %v3702_v2, 4  ;;  %v8710_v28 = vcombine.low %v7416_v21, %v7438_v4  ;;  %v3666_v21 = vsel %vm6833_vm5, %v3661_v25, %v7560_v5  ;;  %v6541_v5 = vld [vmem:[%s6807_s11 + $0x90] sm:$0xff]   ;;  %v6592_v25 = vld [vmem:[%s6807_s11 + $0x8c] sm:$0x1] }
  0xd2   : > { %v7597_v39 = vsel %vm7054_vm8, %v1328_v27, %v1329_v53  ;;  %v3671_v50 = vrot.slane %v3670_v8, 4  ;;  %v8709_v27 = vcombine.low %v7204_v57, %v7213_v30  ;;  %v6591_v53 = vld [vmem:[%s6807_s11 + $0x88] sm:$0xf]  ;;  %v3642_v57 = vsel %vm6833_vm5, %v3637_v17, %v7554_v48 }
  0xd3   : > { %v1340_v34 = vrot.slane %v6591_v53, 5  ;;  %v3652_v61 = vsel %vm6833_vm5, %v3647_v36, %v3651_v56  ;;  %v7632_v4 = vsel %vm7054_vm8, %v1335_v38, %v1336_v19  ;;  %v3685_v48 = vrot.slane %v3684_v31, 4  ;;  %v7635_v56 = vld [vmem:[%s6807_s11 + $0x44] sm:$0x1]  ;;  %v5534_v8 = vld [vmem:[%s6807_s11 + $0x48] sm:$0xf] }
  0xd4   : > { %v5208_v17 = vrot.slane %v1221_v10, 9  ;;  %8711 = vst [vmem:[#allocation11_spill] sm:$0xff] %v7635_v56  ;;  %v3699_v2 = vrot.slane %v3697_v14, 5  ;;  %v3717_v36 = vrot.slane %v3715_v40, 4  ;;  %v1343_v38 = vrot.slane %v6592_v25, 5 }
  0xd5   : > { %v1342_v19 = vrot.slane %v1340_v34, 4  ;;  %v3708_v10 = vor.u32 %v3707_v15, %v3704_v1  ;;  %v7646_v31 = vld [vmem:[%s6807_s11 + $0x4c] sm:$0xf]  ;;  %v3721_v53 = vshll.u32 %v7635_v56, 16  ;;  %v3726_v14 = vshrl.u32 %v5534_v8, 16 }
  0xd6   : > { %6111 = vmatmul.mubr.msk.bf16.gmra.mrb[12].mxu0 %vm701_vm4, %v6538_v54  ;;  %v7661_v1 = vsel %vm7054_vm8, %v5208_v17, %v1340_v34  ;;  %v5537_v15 = vld [vmem:[%s6807_s11 + $0x54] sm:$0xf] }
  0xd7   : > { %5957 = vmatmul.mubr.msk.bf16.gmra.mrb[28].mxu1 %vm701_vm4, %v8709_v27  ;;  %6114 = vmatprep.mubr.msk.bf16.mxu0 %vm701_vm4, %v6539_v59  ;;  %v7625_v59 = vsel %vm7054_vm8, %v5207_v18, %v1333_v23  ;;  %v3676_v23 = vsel %vm6833_vm5, %v3671_v50, %v3675_v63  ;;  %v3695_v18 = vrot.slane %v3694_v62, 4  ;;  %v7648_v27 = vcombine.low %v3642_v57, %v3652_v61  ;;  %v1222_v63 = vld [vmem:[%s6807_s11 + $0x90] sm:$0xe]  ;;  %v6593_v57 = vld [vmem:[%s6807_s11 + $0x94] sm:$0xf] }
  0xd8   : > { %5962 = vmatprep.mubr.msk.bf16.mxu1 %vm701_vm4, %v8710_v28  ;;  %v3729_v50 = vshll.u32 %v5534_v8, 16  ;;  %v7652_v3 = vcombine.low %v3666_v21, %v3676_v23  ;;  %v3690_v62 = vsel %vm6833_vm5, %v3685_v48, %v7590_v29  ;;  %v3718_v28 = vor.u32 %v3717_v36, %v7641_v32  ;;  %v7670_v23 = vld [vmem:[%s6807_s11 + $0x58] sm:$0xf] }
  0xd9   : > { %v1347_v61 = vrot.slane %v6593_v57, 5  ;;  %v3735_v21 = vshll.u32 %v7646_v31, 16  ;;  %v3739_v8 = vshrl.u32 %v7646_v31, 16  ;;  %v8712_v29 = vcombine.low %v7422_v0, %v7442_v13  ;;  %v6594_v36 = vld [vmem:[%s6807_s11 + $0x98] sm:$0x1] }
  0xda   : > { %v3700_v34 = vsel %vm6833_vm5, %v3695_v18, %v3699_v2  ;;  %v7681_v48 = vsel %vm7054_vm8, %v1342_v19, %v1343_v38  ;;  %v7683_v17 = vrot.slane %v3708_v10, 4  ;;  %v8713_v0 = vcombine.low %v7446_v35, %v7454_v11  ;;  %v5540_v10 = vld [vmem:[%s6807_s11 + $0x60] sm:$0xf] }
  0xdb   : > { %v7690_v13 = vrot.slane %v3721_v53, 5  ;;  %v1350_v2 = vrot.slane %v6594_v36, 5  ;;  %v3731_v18 = vrot.slane %v3729_v50, 5  ;;  %v3750_v19 = vshrl.u32 %v5537_v15, 16  ;;  %v6542_v35 = vld [vmem:[%s6807_s11 + $0x9c] sm:$0xff]   ;;  %v6543_v50 = vld [vmem:[%s6807_s11 + $0xa8] sm:$0xff]  }
  0xdc   : > { %v3753_v25 = vshll.u32 %v5537_v15, 16  ;;  %v3759_v38 = vshll.u32 %v7670_v23, 16  ;;  %v7698_v11 = vrot.slane %v3718_v28, 4  ;;  %v1349_v53 = vrot.slane %v1347_v61, 4  ;;  %v7716_v28 = vld [vmem:[%s6807_s11 + $0x50] sm:$0x1] }
  0xdd   : > { %v7703_v57 = vcombine.low %v3690_v62, %v3700_v34  ;;  %v6595_v36 = vld [vmem:[%s6807_s11 + $0xa0] sm:$0xf]  ;;  %v7721_v34 = vld [vmem:[%s6807_s11 + $0x64] sm:$0xf]  ;;  %v3774_v15 = vshrl.u32 %v5540_v10, 16  ;;  %v3777_v40 = vshll.u32 %v5540_v10, 16 }
  0xde   : > { %6115 = vmatmul.mubr.msk.bf16.gmra.mrb[16].mxu0 %vm701_vm4, %v6540_v60  ;;  %v5209_v60 = vrot.slane %v1222_v63, 9  ;;  %v7700_v63 = vrot.slane %v3735_v21, 5  ;;  %v1223_v21 = vld [vmem:[%s6807_s11 + $0x9c] sm:$0xe]  ;;  %v1354_v62 = vrot.slane %v6595_v36, 5  ;;  %8714 = vst [vmem:[#allocation12_spill] sm:$0xff] %v7721_v34 }
  0xdf   : > { %5963 = vmatmul.mubr.msk.bf16.vlgmr.msra.gmra.mrb[0].mxu1 %vm701_vm4, %v8712_v29  ;;  %6118 = vmatprep.mubr.msk.bf16.mxu0 %vm701_vm4, %v6541_v5  ;;  %v3728_v5 = vrot.slane %v3726_v14, 4  ;;  %v3741_v14 = vrot.slane %v3739_v8, 4  ;;  %v3752_v54 = vrot.slane %v3750_v19, 4  ;;  %v3755_v56 = vrot.slane %v3753_v25, 5  ;;  %v7737_v19 = vld [vmem:[%s6807_s11 + $0x5c] sm:$0x1] }
  0xe0   : > { %5995 = vmatpush3.bf16.msra.mxu1 %v7342_v33  ;;  %5966 = vmatprep.mubr.msk.bf16.mxu1 %vm701_vm4, %v8713_v0  ;;  %v3763_v33 = vshrl.u32 %v7670_v23, 16  ;;  %v7713_v0 = vsel %vm7054_vm8, %v5209_v60, %v1347_v61  ;;  %v7723_v16 = vrot.slane %v3759_v38, 5  ;;  %v3724_v61 = vsel %vm6833_vm5, %v7698_v11, %v7690_v13  ;;  %v1224_v13 = vld [vmem:[%s6807_s11 + $0xa8] sm:$0xe] }
  0xe1   : > { %6198 = vmatprep.subr.bf16.mxu1 %v6791_v7  ;;  %v3732_v8 = vor.u32 %v3731_v18, %v3728_v5  ;;  %v7732_v60 = vsel %vm7054_vm8, %v1349_v53, %v1350_v2  ;;  %v3742_v5 = vor.u32 %v3741_v14, %v7700_v63  ;;  %v3745_v18 = vshll.u32 %v7716_v28, 16  ;;  %v7760_v7 = vld [vmem:[%s6807_s11 + $0x68] sm:$0x1] }
  0xe2   : > { %v3765_v29 = vrot.slane %v3763_v33, 4  ;;  %v8715_v25 = vcombine.low %v7458_v52, %v7466_v44  ;;  %v5210_v38 = vrot.slane %v1223_v21, 9  ;;  %v1361_v2 = vrot.slane %v7189_v24, 5  ;;  %v6596_v44 = vld [vmem:[%s6807_s11 + $0xa4] sm:$0x1]  ;;  %8717 = vst [vmem:[#allocation13_spill] sm:$0xff] %v7760_v7 }
  0xe3   : > { %v3783_v33 = vshll.u32 %v7721_v34, 16  ;;  %v3787_v10 = vshrl.u32 %v7721_v34, 16  ;;  %v3733_v52 = vrot.slane %v3732_v8, 4  ;;  %v1357_v11 = vrot.slane %v6596_v44, 5 }
  0xe4   : > { %v3776_v53 = vrot.slane %v3774_v15, 4  ;;  %v3779_v14 = vrot.slane %v3777_v40, 5  ;;  %v1356_v21 = vrot.slane %v1354_v62, 4  ;;  %v3756_v24 = vor.u32 %v3755_v56, %v3752_v54  ;;  %v6597_v40 = vld [vmem:[%s6807_s11 + $0xb0] sm:$0x1] }
  0xe5   : > { %v3766_v36 = vor.u32 %v3765_v29, %v7723_v16  ;;  %v3747_v8 = vrot.slane %v3745_v18, 5  ;;  %v1363_v15 = vrot.slane %v1361_v2, 4  ;;  %v1364_v44 = vrot.slane %v6597_v40, 5  ;;  %v1225_v56 = vld [vmem:[%s6807_s11 + $0xb4] sm:$0xe] }
  0xe6   : > { %6119 = vmatmul.mubr.msk.bf16.gmra.mrb[20].mxu0 %vm701_vm4, %v6542_v35  ;;  %v8716_v35 = vcombine.low %v7462_v51, %v7473_v42  ;;  %v3743_v42 = vrot.slane %v3742_v5, 4  ;;  %v7763_v47 = vrot.slane %v3783_v33, 5  ;;  %v3789_v54 = vrot.slane %v3787_v10, 4 }
  0xe7   : > { %5967 = vmatmul.mubr.msk.bf16.gmra.mrb[4].mxu1 %vm701_vm4, %v8715_v25  ;;  %6122 = vmatprep.mubr.msk.bf16.mxu0 %vm701_vm4, %v6543_v50  ;;  %v6544_v50 = vld [vmem:[%s6807_s11 + $0xb4] sm:$0xff]   ;;  %v3769_v25 = vshll.u32 %v7737_v19, 16  ;;  %v3738_v29 = vsel %vm6833_vm5, %v3733_v52, %v7700_v63  ;;  %v7771_v34 = vsel %vm7054_vm8, %v5210_v38, %v1354_v62  ;;  %v3780_v5 = vor.u32 %v3779_v14, %v3776_v53 }
  0xe8   : > { %5970 = vmatprep.mubr.msk.bf16.mxu1 %vm701_vm4, %v8716_v35  ;;  %v5211_v35 = vrot.slane %v1224_v13, 9  ;;  %v1368_v18 = vrot.slane %v7213_v30, 5  ;;  %v5543_v13 = vld [vmem:[%s6807_s11 + $0x6c] sm:$0xf]  ;;  %v7777_v40 = vsel %vm7054_vm8, %v1356_v21, %v1357_v11  ;;  %v7779_v33 = vrot.slane %v3756_v24, 4 }
  0xe9   : > { %8718 = vst [vmem:[#allocation14_spill] sm:$0xff] %v7777_v40  ;;  %v7781_v10 = vrot.slane %v3766_v36, 4  ;;  %v7783_v51 = vrot.slane %v3769_v25, 5  ;;  %v3748_v63 = vsel %vm6833_vm5, %v3743_v42, %v3747_v8  ;;  %v3793_v62 = vshll.u32 %v7760_v7, 16  ;;  %v6546_v25 = vld [vmem:[%s6807_s11 + $0xcc] sm:$0xff]  }
  0xea   : > { %v7790_v30 = vsel %vm7054_vm8, %v5211_v35, %v1361_v2  ;;  %v5212_v38 = vrot.slane %v1225_v56, 9  ;;  %v8720_v52 = vcombine.low %v7500_v6, %v7510_v12  ;;  %v7800_v11 = vsel %vm7054_vm8, %v1363_v15, %v1364_v44  ;;  %v7804_v2 = vld [vmem:[%s6807_s11 + $0x70] sm:$0xf]  ;;  %v7847_v44 = vld [vmem:[%s6807_s11 + $0x7c] sm:$0xf] }
  0xeb   : > { %8719 = vst [vmem:[#allocation15_spill] sm:$0xff] %v7790_v30  ;;  %8721 = vst [vmem:[#allocation16_spill] sm:$0xff] %v7800_v11  ;;  %v3790_v53 = vor.u32 %v3789_v54, %v7763_v47  ;;  %v3798_v14 = vshrl.u32 %v5543_v13, 16  ;;  %v8723_v21 = vcombine.low %v7504_v41, %v7514_v26  ;;  %v8724_v6 = vsel %vm6833_vm5, %v7683_v17, %v7641_v32  ;;  %v7834_v17 = vld [vmem:[%s6807_s11 + $0x74] sm:$0x1] }
  0xec   : > { %8722 = vst [vmem:[#allocation17_spill] sm:$0xff] %v7804_v2  ;;  %v7815_v12 = vcombine.low %v8724_v6, %v3724_v61  ;;  %v1370_v24 = vrot.slane %v1368_v18, 4  ;;  %v1371_v36 = vrot.slane %v7219_v20, 5  ;;  %v7821_v42 = vcombine.low %v3738_v29, %v3748_v63  ;;  %8725 = vst [vmem:[#allocation18_spill] sm:$0xff] %v7834_v17  ;;  %v5546_v20 = vld [vmem:[%s6807_s11 + $0x78] sm:$0xf] }
  0xed   : > { %v7839_v8 = vrot.slane %v3793_v62, 5  ;;  %v7843_v35 = vsel %vm7054_vm8, %v5212_v38, %v1368_v18  ;;  %v3807_v15 = vshll.u32 %v7804_v2, 16  ;;  %8726 = vst [vmem:[#allocation19_spill] sm:$0xff] %v7847_v44  ;;  %v5549_v54 = vld [vmem:[%s6807_s11 + $0x84] sm:$0xf]  ;;  %v7850_v56 = vrot.slane %v3790_v53, 4 }
  0xee   : > { %6123 = vmatmul.mubr.msk.bf16.gmra.mrb[24].mxu0 %vm701_vm4, %v6544_v50  ;;  %v3801_v50 = vshll.u32 %v5543_v13, 16  ;;  %v7852_v29 = vrot.slane %v3798_v14, 4  ;;  %v3811_v13 = vshrl.u32 %v7804_v2, 16  ;;  %v7858_v63 = vld [vmem:[%s6807_s11 + $0x88] sm:$0xf]  ;;  %v7866_v62 = vsel %vm7054_vm8, %v1370_v24, %v1371_v36 }
  0xef   : > { %5971 = vmatmul.mubr.msk.bf16.gmra.mrb[8].mxu1 %vm701_vm4, %v8720_v52  ;;  %6126 = vmatprep.mubr.msk.bf16.mxu0 %vm701_vm4, %v6545_v9  ;;  %v7817_v9 = vrot.slane %v3780_v5, 4  ;;  %8727 = vst [vmem:[#allocation20_spill] sm:$0xff] %v7858_v63  ;;  %v3822_v38 = vshrl.u32 %v5546_v20, 16  ;;  %v3825_v52 = vshll.u32 %v5546_v20, 16  ;;  %v5552_v53 = vld [vmem:[%s6807_s11 + $0x90] sm:$0xf]  ;;  %v8729_v18 = vcombine.low %v7539_v46, %v7543_v58 }
  0xf0   : > { %5974 = vmatprep.mubr.msk.bf16.mxu1 %vm701_vm4, %v8723_v21  ;;  %v7854_v5 = vrot.slane %v3801_v50, 5  ;;  %v7870_v14 = vld [vmem:[%s6807_s11 + $0x94] sm:$0xf]  ;;  %v3831_v50 = vshll.u32 %v7847_v44, 16  ;;  %v3835_v21 = vshrl.u32 %v7847_v44, 16  ;;  %v3846_v6 = vshrl.u32 %v5549_v54, 16 }
  0xf1   : > { %8728 = vst [vmem:[#allocation21_spill] sm:$0xff] %v7870_v14  ;;  %v3849_v61 = vshll.u32 %v5549_v54, 16  ;;  %v7875_v41 = vrot.slane %v3807_v15, 5  ;;  %v3817_v24 = vshll.u32 %v7834_v17, 16  ;;  %v3855_v36 = vshll.u32 %v7858_v63, 16 }
  0xf2   : > { %v3859_v20 = vshrl.u32 %v7858_v63, 16  ;;  %v3870_v54 = vshrl.u32 %v5552_v53, 16  ;;  %v3879_v15 = vshll.u32 %v7870_v14, 16  ;;  %v3883_v26 = vshrl.u32 %v7870_v14, 16  ;;  %v5555_v32 = vld [vmem:[%s6807_s11 + $0x9c] sm:$0xf] }
  0xf3   : > { %v8730_v44 = vcombine.low %v7547_v55, %v7552_v22  ;;  %v3813_v46 = vrot.slane %v3811_v13, 4  ;;  %v7900_v63 = vrot.slane %v3831_v50, 5  ;;  %v3837_v14 = vrot.slane %v3835_v21, 4  ;;  %v7903_v55 = vld [vmem:[%s6807_s11 + $0x8c] sm:$0x1] }
  0xf4   : > { %v3848_v17 = vrot.slane %v3846_v6, 4  ;;  %v3851_v2 = vrot.slane %v3849_v61, 5  ;;  %v7905_v22 = vrot.slane %v3855_v36, 5  ;;  %v3894_v7 = vshrl.u32 %v5555_v32, 16  ;;  %v7908_v58 = vld [vmem:[%s6807_s11 + $0x98] sm:$0x1] }
  0xf5   : > { %v3897_v11 = vshll.u32 %v5555_v32, 16  ;;  %v3872_v13 = vrot.slane %v3870_v54, 4  ;;  %v3885_v50 = vrot.slane %v3883_v26, 4  ;;  %v3804_v21 = vor.u32 %v7854_v5, %v7852_v29 }
  0xf6   : > { %6127 = vmatmul.mubr.msk.bf16.gmra.mrb[28].mxu0 %vm701_vm4, %v6546_v25  ;;  %v3873_v25 = vshll.u32 %v5552_v53, 16  ;;  %v7898_v53 = vld [vmem:[%s6807_s11 + $0x80] sm:$0x1]  ;;  %v3814_v61 = vor.u32 %v3813_v46, %v7875_v41  ;;  %v7915_v6 = vrot.slane %v3817_v24, 5  ;;  %v3838_v32 = vor.u32 %v3837_v14, %v7900_v63 }
  0xf7   : > { %5975 = vmatmul.mubr.msk.bf16.gmra.mrb[12].mxu1 %vm701_vm4, %v8729_v18  ;;  %6132 = vmatprep.mubr.msk.bf16.mxu0 %vm701_vm4, %v7648_v27  ;;  %v3824_v27 = vrot.slane %v3822_v38, 4  ;;  %v3827_v18 = vrot.slane %v3825_v52, 5  ;;  %v7910_v52 = vrot.slane %v3879_v15, 5  ;;  %v3841_v36 = vshll.u32 %v7898_v53, 16 }
  0xf8   : > { %5978 = vmatprep.mubr.msk.bf16.mxu1 %vm701_vm4, %v8730_v44  ;;  %v3861_v44 = vrot.slane %v3859_v20, 4  ;;  %v3875_v38 = vrot.slane %v3873_v25, 5  ;;  %v7919_v20 = vld [vmem:[%s6807_s11 + $0xa0] sm:$0xf]  ;;  %v3852_v40 = vor.u32 %v3851_v2, %v3848_v17  ;;  %v3865_v54 = vshll.u32 %v7903_v55, 16 }
  0xf9   : > { %8731 = vst [vmem:[#allocation22_spill] sm:$0xff] %v7919_v20  ;;  %v3828_v30 = vor.u32 %v3827_v18, %v3824_v27  ;;  %v5558_v25 = vld [vmem:[%s6807_s11 + $0xa8] sm:$0xf]  ;;  %v3889_v29 = vshll.u32 %v7908_v58, 16  ;;  %v3896_v5 = vrot.slane %v3894_v7, 4  ;;  %v3899_v24 = vrot.slane %v3897_v11, 5 }
  0xfa   : > { %v3862_v26 = vor.u32 %v3861_v44, %v7905_v22  ;;  %v8732_v15 = vcombine.low %v7584_v43, %v7597_v39  ;;  %v3876_v2 = vor.u32 %v3875_v38, %v3872_v13  ;;  %v3886_v17 = vor.u32 %v3885_v50, %v7910_v52 }
  0xfb   : > { %v3903_v14 = vshll.u32 %v7919_v20, 16  ;;  %v8733_v46 = vcombine.low %v7625_v59, %v7632_v4  ;;  %v3805_v7 = vrot.slane %v3804_v21, 4  ;;  %v3815_v43 = vrot.slane %v3814_v61, 4  ;;  %v7948_v21 = vld [vmem:[%s6807_s11 + $0xac] sm:$0xf] }
  0xfc   : > { %v3921_v39 = vshll.u32 %v5558_v25, 16  ;;  %v3829_v11 = vrot.slane %v3828_v30, 4  ;;  %v3839_v27 = vrot.slane %v3838_v32, 4  ;;  %v3843_v18 = vrot.slane %v3841_v36, 5  ;;  %v7957_v61 = vld [vmem:[%s6807_s11 + $0xb0] sm:$0x1] }
  0xfd   : > { %v3853_v44 = vrot.slane %v3852_v40, 4  ;;  %v3863_v13 = vrot.slane %v3862_v26, 4  ;;  %v3867_v38 = vrot.slane %v3865_v54, 5  ;;  %v3891_v50 = vrot.slane %v3889_v29, 5 }
  0xfe   : > { %6133 = vmatmul.mubr.msk.bf16.vlgmr.msra.gmra.mrb[0].mxu0 %vm701_vm4, %v7652_v3  ;;  %v3907_v3 = vshrl.u32 %v7919_v20, 16  ;;  %v3900_v59 = vor.u32 %v3899_v24, %v3896_v5  ;;  %v3877_v4 = vrot.slane %v3876_v2, 4  ;;  %v7945_v20 = vrot.slane %v3903_v14, 5 }
  0xff   : > { %5979 = vmatmul.mubr.msk.bf16.gmra.mrb[16].mxu1 %vm701_vm4, %v8732_v15  ;;  %6165 = vmatpush3.bf16.msra.mxu0 %v7426_v49  ;;  %v3918_v49 = vshrl.u32 %v5558_v25, 16  ;;  %v7943_v15 = vld [vmem:[%s6807_s11 + $0xa4] sm:$0x1]  ;;  %v3810_v30 = vsel %vm6833_vm5, %v3805_v7, %v7875_v41  ;;  %v3820_v40 = vsel %vm6833_vm5, %v3815_v43, %v7915_v6  ;;  %v3923_v32 = vrot.slane %v3921_v39, 5 }
 0x100   : > { %5982 = vmatprep.mubr.msk.bf16.mxu1 %vm701_vm4, %v8733_v46  ;;  %6136 = vmatprep.mubr.msk.bf16.mxu0 %vm701_vm4, %v7703_v57  ;;  %v3887_v46 = vrot.slane %v3886_v17, 4  ;;  %v3909_v57 = vrot.slane %v3907_v3, 4  ;;  %v3834_v54 = vsel %vm6833_vm5, %v3829_v11, %v7900_v63  ;;  %v3844_v25 = vsel %vm6833_vm5, %v3839_v27, %v3843_v18  ;;  %v5561_v3 = vld [vmem:[%s6807_s11 + $0xb4] sm:$0xf] }
 0x101   : > { %v3920_v36 = vrot.slane %v3918_v49, 4  ;;  %v3858_v26 = vsel %vm6833_vm5, %v3853_v44, %v7905_v22  ;;  %v3913_v41 = vshll.u32 %v7943_v15, 16  ;;  %v3868_v6 = vsel %vm6833_vm5, %v3863_v13, %v3867_v38  ;;  %v5608_v11 = vld [vmem:[%s6807_s11 + $0x54] sm:$0xe]  ;;  %v5609_v38 = vld [vmem:[%s6807_s11 + $0x60] sm:$0xe] }
 0x102   : > { %v7972_v29 = vrot.slane %v3900_v59, 4  ;;  %v3927_v63 = vshll.u32 %v7948_v21, 16  ;;  %v3931_v5 = vshrl.u32 %v7948_v21, 16  ;;  %v8734_v24 = vcombine.low %v7661_v1, %v7681_v48 }
 0x103   : > { %v3892_v22 = vsel %vm6833_vm5, %v3887_v46, %v3891_v50  ;;  %v3910_v2 = vor.u32 %v3909_v57, %v7945_v20  ;;  %v3937_v17 = vshll.u32 %v7957_v61, 16  ;;  %v8735_v1 = vcombine.low %v7713_v0, %v7732_v60 }
 0x104   : > { %v8736_v48 = vsel %vm6833_vm5, %v7781_v10, %v7783_v51  ;;  %v8738_v14 = vsel %vm6833_vm5, %v7850_v56, %v7839_v8  ;;  %v8739_v0 = vsel %vm6833_vm5, %v7817_v9, %v7763_v47  ;;  %v5229_v51 = vcombine.low %v7843_v35, %v7866_v62  ;;  %v8026_v56 = vld [vmem:[%s6807_s11 + $0xb8] sm:$0xf] }
 0x105   : > { %v5577_v60 = vcombine.low %v8739_v0, %v8738_v14  ;;  %v3924_v10 = vor.u32 %v3923_v32, %v3920_v36  ;;  %v8019_v7 = vcombine.low %v3834_v54, %v3844_v25  ;;  %v8021_v43 = vcombine.low %v3858_v26, %v3868_v6  ;;  %v5610_v32 = vld [vmem:[%s6807_s11 + $0x6c] sm:$0xe] }
 0x106   : > { %6137 = vmatmul.mubr.msk.bf16.gmra.mrb[4].mxu0 %vm701_vm4, %v7815_v12  ;;  %v3882_v12 = vsel %vm6833_vm5, %v3877_v4, %v7910_v52  ;;  %v8023_v8 = vrot.slane %v3913_v41, 5  ;;  %v3906_v47 = vsel %vm6833_vm5, %v7972_v29, %v7945_v20  ;;  %v8034_v9 = vrot.slane %v3927_v63, 5  ;;  %v8742_v63 = vld [vmem:[#allocation12_spill] sm:$0xff] }
 0x107   : > { %5983 = vmatmul.mubr.msk.bf16.gmra.mrb[20].mxu1 %vm701_vm4, %v8734_v24  ;;  %6140 = vmatprep.mubr.msk.bf16.mxu0 %vm701_vm4, %v7821_v42  ;;  %v8737_v42 = vsel %vm6833_vm5, %v7779_v33, %v7723_v16  ;;  %v5607_v16 = vld [vmem:[%s6807_s11 + $0x48] sm:$0xe]  ;;  %v8017_v33 = vcombine.low %v3810_v30, %v3820_v40  ;;  %v8028_v49 = vcombine.low %v3882_v12, %v3892_v22  ;;  %v3933_v39 = vrot.slane %v3931_v5, 4  ;;  %v8743_v24 = vld [vmem:[#allocation15_spill] sm:$0xff]  ;;  %v5567_v29 = vld [vmem:[%s6807_s11 + $0xcc] sm:$0xf] }
 0x108   : > { %5986 = vmatprep.mubr.msk.bf16.mxu1 %vm701_vm4, %v8735_v1  ;;  %v5576_v52 = vcombine.low %v8737_v42, %v8736_v48  ;;  %v8037_v27 = vrot.slane %v3910_v2, 4  ;;  %v8039_v18 = vrot.slane %v3937_v17, 5  ;;  %v3942_v44 = vshrl.u32 %v5561_v3, 16  ;;  %v8744_v12 = vld [vmem:[#allocation16_spill] sm:$0xff]  ;;  %v8746_v2 = vld [vmem:[#allocation13_spill] sm:$0xff] }
 0x109   : > { %v5623_v13 = vrot.slane %v5607_v16, 9  ;;  %v8042_v50 = vrot.slane %v3924_v10, 4  ;;  %v3945_v59 = vshll.u32 %v5561_v3, 16  ;;  %v3951_v4 = vshll.u32 %v8026_v56, 16  ;;  %v8747_v48 = vld [vmem:[#allocation17_spill] sm:$0xff] }
 0x10a   : > { %v4401_v46 = vrot.slane %v7646_v31, 5  ;;  %v4404_v57 = vrot.slane %v7716_v28, 5  ;;  %v5624_v30 = vrot.slane %v5608_v11, 9  ;;  %v4408_v40 = vrot.slane %v7670_v23, 5  ;;  %v8740_v31 = vld [vmem:[#allocation14_spill] sm:$0xff] }
 0x10b   : > { %v4411_v36 = vrot.slane %v7737_v19, 5  ;;  %v3934_v54 = vor.u32 %v3933_v39, %v8034_v9  ;;  %v5625_v41 = vrot.slane %v5609_v38, 9  ;;  %v8741_v28 = vcombine.low %v7771_v34, %v8740_v31  ;;  %v8089_v3 = vld [vmem:[%s6807_s11 + $0xbc] sm:$0x1] }
 0x10c   : > { %v8054_v25 = vsel %vm7054_vm8, %v5623_v13, %v4401_v46  ;;  %v4403_v26 = vrot.slane %v4401_v46, 4  ;;  %v3955_v23 = vshrl.u32 %v8026_v56, 16  ;;  %v8064_v19 = vsel %vm7054_vm8, %v5624_v30, %v4408_v40  ;;  %v8748_v13 = vld [vmem:[#allocation18_spill] sm:$0xff] }
 0x10d   : > { %v4410_v6 = vrot.slane %v4408_v40, 4  ;;  %v4415_v5 = vrot.slane %v8742_v63, 5  ;;  %v8745_v22 = vcombine.low %v8743_v24, %v8744_v12  ;;  %v4418_v17 = vrot.slane %v8746_v2, 5  ;;  %v8107_v40 = vld [vmem:[%s6807_s11 + $0xc4] sm:$0xf] }
 0x10e   : > { %6141 = vmatmul.mubr.msk.bf16.gmra.mrb[8].mxu0 %vm701_vm4, %v5576_v52  ;;  %v8073_v34 = vsel %vm7054_vm8, %v4403_v26, %v4404_v57  ;;  %v5626_v1 = vrot.slane %v5610_v32, 9  ;;  %v4422_v42 = vrot.slane %v8747_v48, 5  ;;  %v5564_v52 = vld [vmem:[%s6807_s11 + $0xc0] sm:$0xf]  ;;  %v4425_v38 = vrot.slane %v8748_v13, 5  ;;  %v6547_v26 = vld [vmem:[%s6807_s11 + $0xc] sm:$0xff]  }
 0x10f   : > { %5987 = vmatmul.mubr.msk.bf16.gmra.mrb[24].mxu1 %vm701_vm4, %v8741_v28  ;;  %6144 = vmatprep.mubr.msk.bf16.mxu0 %vm701_vm4, %v5577_v60  ;;  %v5640_v14 = vcombine.low %v8054_v25, %v8073_v34  ;;  %v8082_v0 = vsel %vm7054_vm8, %v4410_v6, %v4411_v36  ;;  %v8086_v60 = vsel %vm7054_vm8, %v5625_v41, %v4415_v5  ;;  %v4417_v10 = vrot.slane %v4415_v5, 4  ;;  %v5611_v32 = vld [vmem:[%s6807_s11 + $0x78] sm:$0xe]  ;;  %v8749_v12 = vld [vmem:[#allocation19_spill] sm:$0xff]  ;;  %v8751_v48 = vld [vmem:[#allocation8_spill] sm:$0xff] }
 0x110   : > { %5990 = vmatprep.mubr.msk.bf16.mxu1 %vm701_vm4, %v8745_v22  ;;  %v5641_v16 = vcombine.low %v8064_v19, %v8082_v0  ;;  %v8095_v39 = vsel %vm7054_vm8, %v5626_v1, %v4422_v42  ;;  %v4424_v11 = vrot.slane %v4422_v42, 4  ;;  %v3916_v46 = vsel %vm6833_vm5, %v8037_v27, %v8023_v8  ;;  %v5338_v27 = vld [vmem:[%s6807_s11 + $0x78] sm:$0xf]  ;;  %v5612_v2 = vld [vmem:[%s6807_s11 + $0x84] sm:$0xe] }
 0x111   : > { %v8102_v57 = vrot.slane %v3942_v44, 4  ;;  %v8104_v30 = vrot.slane %v3945_v59, 5  ;;  %v8111_v36 = vsel %vm7054_vm8, %v4417_v10, %v4418_v17  ;;  %v8115_v41 = vrot.slane %v3951_v4, 5  ;;  %v6608_v0 = vld [vmem:[%s6807_s11 + $0xa0] sm:$0xf] }
 0x112   : > { %v3966_v31 = vshrl.u32 %v5564_v52, 16  ;;  %v5642_v28 = vcombine.low %v8086_v60, %v8111_v36  ;;  %v8121_v8 = vsel %vm7054_vm8, %v4424_v11, %v4425_v38  ;;  %v8124_v44 = vrot.slane %v3934_v54, 4  ;;  %v8752_v38 = vld [vmem:[#allocation20_spill] sm:$0xff] }
 0x113   : > { %v3961_v59 = vshll.u32 %v8089_v3, 16  ;;  %v3969_v6 = vshll.u32 %v5564_v52, 16  ;;  %v5643_v63 = vcombine.low %v8095_v39, %v8121_v8  ;;  %v8131_v4 = vrot.slane %v3955_v23, 4  ;;  %v6611_v8 = vld [vmem:[%s6807_s11 + $0xac] sm:$0xf] }
 0x114   : > { %v3975_v5 = vshll.u32 %v8107_v40, 16  ;;  %v5627_v24 = vrot.slane %v5611_v32, 9  ;;  %v4429_v22 = vrot.slane %v8749_v12, 5  ;;  %v3979_v54 = vshrl.u32 %v8107_v40, 16 }
 0x115   : > { %v2291_v23 = vshrl.u32 %v5338_v27, 16  ;;  %v2294_v17 = vshll.u32 %v5338_v27, 16  ;;  %v3968_v1 = vrot.slane %v3966_v31, 4  ;;  %v5628_v10 = vrot.slane %v5612_v2, 9  ;;  %v6548_v31 = vld [vmem:[%s6807_s11 + $0x18] sm:$0xff]  }
 0x116   : > { %6145 = vmatmul.mubr.msk.bf16.gmra.mrb[12].mxu0 %vm701_vm4, %v8017_v33  ;;  %v4432_v33 = vrot.slane %v7898_v53, 5  ;;  %v8147_v35 = vsel %vm7054_vm8, %v5627_v24, %v4429_v22  ;;  %v4431_v62 = vrot.slane %v4429_v22, 4  ;;  %v3971_v53 = vrot.slane %v3969_v6, 5  ;;  %v6549_v24 = vld [vmem:[%s6807_s11 + $0x24] sm:$0xff]  }
 0x117   : > { %5991 = vmatmul.mubr.msk.bf16.gmra.mrb[28].mxu1 %vm701_vm4, %v5229_v51  ;;  %6148 = vmatprep.mubr.msk.bf16.mxu0 %vm701_vm4, %v8019_v7  ;;  %v8750_v51 = vld [vmem:[#allocation7_spill] sm:$0xff]  ;;  %v2293_v42 = vrot.slane %v2291_v23, 4  ;;  %v2296_v52 = vrot.slane %v2294_v17, 5  ;;  %v5582_v11 = vcombine.low %v3906_v47, %v3916_v46  ;;  %v4436_v32 = vrot.slane %v8752_v38, 5  ;;  %v8173_v47 = vld [vmem:[%s6807_s11 + $0xd0] sm:$0xf] }
 0x118   : > { %5996 = vmatprep.mubr.msk.bf16.mxu1 %vm701_vm4, %v6547_v26  ;;  %v2313_v7 = vsel %vm6833_vm5, %v8751_v48, %v8750_v51  ;;  %v8160_v13 = vsel %vm7054_vm8, %v4431_v62, %v4432_v33  ;;  %v4439_v26 = vrot.slane %v7903_v55, 5  ;;  %v3930_v27 = vsel %vm6833_vm5, %v8042_v50, %v8034_v9  ;;  %v5613_v9 = vld [vmem:[%s6807_s11 + $0x90] sm:$0xe] }
 0x119   : > { %v3948_v20 = vor.u32 %v8104_v30, %v8102_v57  ;;  %v5644_v46 = vcombine.low %v8147_v35, %v8160_v13  ;;  %v2297_v6 = vor.u32 %v2296_v52, %v2293_v42  ;;  %v8178_v12 = vrot.slane %v3975_v5, 5  ;;  %v8192_v30 = vld [vmem:[%s6807_s11 + $0xc8] sm:$0x1]  ;;  %v8754_v51 = vld [vmem:[#allocation5_spill] sm:$0xff] }
 0x11a   : > { %v3981_v55 = vrot.slane %v3979_v54, 4  ;;  %v8182_v22 = vsel %vm7054_vm8, %v5628_v10, %v4436_v32  ;;  %v4438_v2 = vrot.slane %v4436_v32, 4  ;;  %v3940_v50 = vsel %vm6833_vm5, %v8124_v44, %v8039_v18  ;;  %v8753_v44 = vld [vmem:[#allocation6_spill] sm:$0xff]  ;;  %v8755_v38 = vld [vmem:[#allocation21_spill] sm:$0xff] }
 0x11b   : > { %v3958_v57 = vor.u32 %v8131_v4, %v8115_v41  ;;  %v3972_v33 = vor.u32 %v3971_v53, %v3968_v1  ;;  %v2298_v5 = vrot.slane %v2297_v6, 4  ;;  %v3990_v54 = vshrl.u32 %v5567_v29, 16 }
 0x11c   : > { %v3993_v23 = vshll.u32 %v5567_v29, 16  ;;  %v3999_v17 = vshll.u32 %v8173_v47, 16  ;;  %v8199_v62 = vsel %vm7054_vm8, %v4438_v2, %v4439_v26  ;;  %v4003_v18 = vshrl.u32 %v8173_v47, 16 }
 0x11d   : > { %v2303_v4 = vsel %vm6833_vm5, %v2298_v5, %v8753_v44  ;;  %v5629_v1 = vrot.slane %v5613_v9, 9  ;;  %v3963_v48 = vrot.slane %v3961_v59, 5  ;;  %v3985_v53 = vshll.u32 %v8192_v30, 16  ;;  %v5614_v9 = vld [vmem:[%s6807_s11 + $0x9c] sm:$0xe] }
 0x11e   : > { %6149 = vmatmul.mubr.msk.bf16.gmra.mrb[16].mxu0 %vm701_vm4, %v8021_v43  ;;  %v5645_v43 = vcombine.low %v8182_v22, %v8199_v62  ;;  %v8214_v42 = vcombine.low %v2303_v4, %v2313_v7  ;;  %v5583_v52 = vcombine.low %v3930_v27, %v3940_v50  ;;  %v3949_v10 = vrot.slane %v3948_v20, 4  ;;  %v8221_v59 = vld [vmem:[%s6807_s11 + $0xd4] sm:$0x1]  ;;  %v6551_v20 = vld [vmem:[%s6807_s11 + $0x3c] sm:$0xff]  }
 0x11f   : > { %5997 = vmatmul.mubr.msk.bf16.vlgmr.msra.gmra.mrb[0].mxu1 %vm701_vm4, %v6548_v31  ;;  %6152 = vmatprep.mubr.msk.bf16.mxu0 %vm701_vm4, %v8028_v49  ;;  %v3982_v49 = vor.u32 %v3981_v55, %v8178_v12  ;;  %v4443_v32 = vrot.slane %v8755_v38, 5  ;;  %v4446_v26 = vrot.slane %v7908_v58, 5  ;;  %v3959_v31 = vrot.slane %v3958_v57, 4  ;;  %v8756_v44 = vld [vmem:[#allocation22_spill] sm:$0xff]  ;;  %v5615_v38 = vld [vmem:[%s6807_s11 + $0xa8] sm:$0xe] }
 0x120   : > { %6199 = vmatpush3.bf16.msra.mxu1 %v8754_v51  ;;  %6000 = vmatprep.mubr.msk.bf16.mxu1 %vm701_vm4, %v6549_v24  ;;  %v3973_v29 = vrot.slane %v3972_v33, 4  ;;  %v3992_v6 = vrot.slane %v3990_v54, 4  ;;  %v3995_v2 = vrot.slane %v3993_v23, 5  ;;  %v6550_v24 = vld [vmem:[%s6807_s11 + $0x30] sm:$0xff]   ;;  %v8223_v55 = vrot.slane %v3999_v17, 5 }
 0x121   : > { %v4005_v5 = vrot.slane %v4003_v18, 4  ;;  %v8227_v7 = vsel %vm7054_vm8, %v5629_v1, %v4443_v32  ;;  %v4445_v27 = vrot.slane %v4443_v32, 4  ;;  %v3983_v50 = vrot.slane %v3982_v49, 4  ;;  %v5603_v51 = vld [vmem:[%s6807_s11 + $0x18] sm:$0xe] }
 0x122   : > { %v3987_v58 = vrot.slane %v3985_v53, 5  ;;  %v3954_v57 = vsel %vm6833_vm5, %v3949_v10, %v8115_v41  ;;  %v5630_v54 = vrot.slane %v5614_v9, 9  ;;  %v3964_v23 = vsel %vm6833_vm5, %v3959_v31, %v3963_v48  ;;  %v6598_v53 = vld [vmem:[%s6807_s11 + $0x1c] sm:$0xf] }
 0x123   : > { %v8235_v33 = vsel %vm7054_vm8, %v4445_v27, %v4446_v26  ;;  %v4009_v17 = vshll.u32 %v8221_v59, 16  ;;  %v4450_v4 = vrot.slane %v8756_v44, 5  ;;  %v3978_v41 = vsel %vm6833_vm5, %v3973_v29, %v8178_v12  ;;  %v6552_v29 = vld [vmem:[%s6807_s11 + $0x48] sm:$0xff]  }
 0x124   : > { %v5646_v18 = vcombine.low %v8227_v7, %v8235_v33  ;;  %v4006_v1 = vor.u32 %v4005_v5, %v8223_v55  ;;  %v4453_v48 = vrot.slane %v7943_v15, 5  ;;  %v3988_v49 = vsel %vm6833_vm5, %v3983_v50, %v3987_v58  ;;  %v6553_v5 = vld [vmem:[%s6807_s11 + $0x54] sm:$0xff]  }
 0x125   : > { %v8258_v10 = vsel %vm7054_vm8, %v5630_v54, %v4450_v4  ;;  %v4452_v12 = vrot.slane %v4450_v4, 4  ;;  %v5584_v32 = vcombine.low %v3954_v57, %v3964_v23  ;;  %v4011_v26 = vrot.slane %v4009_v17, 5  ;;  %v5604_v23 = vld [vmem:[%s6807_s11 + $0x24] sm:$0xe]  ;;  %v6600_v4 = vld [vmem:[%s6807_s11 + $0x28] sm:$0xf] }
 0x126   : > { %6153 = vmatmul.mubr.msk.bf16.gmra.mrb[20].mxu0 %vm701_vm4, %v5582_v11  ;;  %v3996_v11 = vor.u32 %v3995_v2, %v3992_v6  ;;  %v5619_v31 = vrot.slane %v5603_v51, 9  ;;  %v5585_v6 = vcombine.low %v3978_v41, %v3988_v49  ;;  %v4007_v9 = vrot.slane %v4006_v1, 4  ;;  %v6601_v49 = vld [vmem:[%s6807_s11 + $0x34] sm:$0xf] }
 0x127   : > { %6001 = vmatmul.mubr.msk.bf16.gmra.mrb[4].mxu1 %vm701_vm4, %v6550_v24  ;;  %6156 = vmatprep.mubr.msk.bf16.mxu0 %vm701_vm4, %v5583_v52  ;;  %v4373_v52 = vrot.slane %v6598_v53, 5  ;;  %v8263_v15 = vsel %vm7054_vm8, %v4452_v12, %v4453_v48  ;;  %v5631_v58 = vrot.slane %v5615_v38, 9  ;;  %v4457_v57 = vrot.slane %v7948_v21, 5  ;;  %v5605_v48 = vld [vmem:[%s6807_s11 + $0x30] sm:$0xe] }
 0x128   : > { %6004 = vmatprep.mubr.msk.bf16.mxu1 %vm701_vm4, %v6551_v20  ;;  %v3997_v2 = vrot.slane %v3996_v11, 4  ;;  %v5647_v24 = vcombine.low %v8258_v10, %v8263_v15  ;;  %v6599_v20 = vld [vmem:[%s6807_s11 + $0x20] sm:$0x1]  ;;  %v4460_v54 = vrot.slane %v7957_v61, 5  ;;  %v4012_v61 = vsel %vm6833_vm5, %v4007_v9, %v4011_v26  ;;  %v5616_v11 = vld [vmem:[%s6807_s11 + $0xb4] sm:$0xe] }
 0x129   : > { %v4375_v27 = vrot.slane %v4373_v52, 4  ;;  %v4376_v50 = vrot.slane %v6599_v20, 5  ;;  %v8276_v17 = vsel %vm7054_vm8, %v5631_v58, %v4457_v57  ;;  %v4459_v44 = vrot.slane %v4457_v57, 4  ;;  %v6602_v26 = vld [vmem:[%s6807_s11 + $0x2c] sm:$0x1]  ;;  %v8757_v58 = vld [vmem:[#allocation9_spill] sm:$0xff] }
 0x12a   : > { %v4002_v21 = vsel %vm6833_vm5, %v3997_v2, %v8223_v55  ;;  %v4380_v41 = vrot.slane %v6600_v4, 5  ;;  %v4374_v1 = vsel %vm7054_vm8, %v5619_v31, %v4373_v52  ;;  %v4387_v53 = vrot.slane %v6601_v49, 5  ;;  %v6555_v20 = vld [vmem:[%s6807_s11 + $0x6c] sm:$0xff]   ;;  %v6616_v10 = vld [vmem:[%s6807_s11 + $0xc8] sm:$0x1] }
 0x12b   : > { %v4377_v51 = vsel %vm7054_vm8, %v4375_v27, %v4376_v50  ;;  %v8296_v55 = vsel %vm7054_vm8, %v4459_v44, %v4460_v54  ;;  %v5620_v12 = vrot.slane %v5604_v23, 9  ;;  %v5632_v52 = vrot.slane %v5616_v11, 9  ;;  %v5617_v44 = vld [vmem:[%s6807_s11 + $0xc0] sm:$0xe]  ;;  %v5606_v11 = vld [vmem:[%s6807_s11 + $0x3c] sm:$0xe] }
 0x12c   : > { %v5648_v38 = vcombine.low %v8276_v17, %v8296_v55  ;;  %v4464_v31 = vrot.slane %v8026_v56, 5  ;;  %v5636_v2 = vcombine.low %v4374_v1, %v4377_v51  ;;  %v4382_v9 = vrot.slane %v4380_v41, 4  ;;  %v8758_v56 = vld [vmem:[#allocation10_spill] sm:$0xff] }
 0x12d   : > { %v4467_v27 = vrot.slane %v8089_v3, 5  ;;  %v4389_v50 = vrot.slane %v4387_v53, 4  ;;  %v4390_v57 = vrot.slane %v8757_v58, 5  ;;  %v4381_v3 = vsel %vm7054_vm8, %v5620_v12, %v4380_v41 }
 0x12e   : > { %6157 = vmatmul.mubr.msk.bf16.gmra.mrb[24].mxu0 %vm701_vm4, %v5584_v32  ;;  %v5586_v32 = vcombine.low %v4002_v21, %v4012_v61  ;;  %v8308_v54 = vsel %vm7054_vm8, %v5632_v52, %v4464_v31  ;;  %v4466_v23 = vrot.slane %v4464_v31, 4  ;;  %v4394_v21 = vrot.slane %v8758_v56, 5  ;;  %v8759_v31 = vld [vmem:[#allocation11_spill] sm:$0xff]  ;;  %v6603_v56 = vld [vmem:[%s6807_s11 + $0x70] sm:$0xf] }
 0x12f   : > { %6005 = vmatmul.mubr.msk.bf16.gmra.mrb[8].mxu1 %vm701_vm4, %v6552_v29  ;;  %6160 = vmatprep.mubr.msk.bf16.mxu0 %vm701_vm4, %v5585_v6  ;;  %v4383_v29 = vrot.slane %v6602_v26, 5  ;;  %v6554_v6 = vld [vmem:[%s6807_s11 + $0x60] sm:$0xff]   ;;  %v5633_v49 = vrot.slane %v5617_v44, 9  ;;  %v4471_v41 = vrot.slane %v8107_v40, 5  ;;  %v4474_v12 = vrot.slane %v8192_v30, 5 }
 0x130   : > { %6008 = vmatprep.mubr.msk.bf16.mxu1 %vm701_vm4, %v6553_v5  ;;  %v5621_v5 = vrot.slane %v5605_v48, 9  ;;  %v8315_v61 = vsel %vm7054_vm8, %v4466_v23, %v4467_v27  ;;  %v4391_v48 = vsel %vm7054_vm8, %v4389_v50, %v4390_v57  ;;  %v4396_v52 = vrot.slane %v4394_v21, 4 }
 0x131   : > { %v4384_v4 = vsel %vm7054_vm8, %v4382_v9, %v4383_v29  ;;  %v5649_v1 = vcombine.low %v8308_v54, %v8315_v61  ;;  %v5622_v29 = vrot.slane %v5606_v11, 9  ;;  %v6556_v9 = vld [vmem:[%s6807_s11 + $0x78] sm:$0xff]   ;;  %v4478_v11 = vrot.slane %v8173_v47, 5 }
 0x132   : > { %v4388_v51 = vsel %vm7054_vm8, %v5621_v5, %v4387_v53  ;;  %v5637_v26 = vcombine.low %v4381_v3, %v4384_v4  ;;  %v8339_v53 = vsel %vm7054_vm8, %v5633_v49, %v4471_v41  ;;  %v4473_v5 = vrot.slane %v4471_v41, 4 }
 0x133   : > { %v5638_v27 = vcombine.low %v4388_v51, %v4391_v48  ;;  %v4395_v57 = vsel %vm7054_vm8, %v5622_v29, %v4394_v21  ;;  %v2276_v3 = vshll.u32 %v6603_v56, 16  ;;  %v2280_v4 = vshrl.u32 %v6603_v56, 16 }
 0x134   : > { %v8344_v40 = vsel %vm7054_vm8, %v4473_v5, %v4474_v12  ;;  %v4481_v21 = vrot.slane %v8221_v59, 5  ;;  %v6558_v12 = vld [vmem:[%s6807_s11 + $0x90] sm:$0xff]   ;;  %v6559_v59 = vld [vmem:[%s6807_s11 + $0x9c] sm:$0xff]   ;;  %v2454_v15 = vshll.u32 %v6616_v10, 16 }
 0x135   : > { %v5650_v44 = vcombine.low %v8339_v53, %v8344_v40  ;;  %v2282_v29 = vrot.slane %v2280_v4, 4  ;;  %v6561_v4 = vld [vmem:[%s6807_s11 + $0xb4] sm:$0xff]  }
 0x136   : > { %6161 = vmatmul.mubr.msk.bf16.gmra.mrb[28].mxu0 %vm701_vm4, %v5586_v32  ;;  %v5335_v32 = vld [vmem:[%s6807_s11 + $0x6c] sm:$0xf] }
 0x137   : > { %6009 = vmatmul.mubr.msk.bf16.gmra.mrb[12].mxu1 %vm701_vm4, %v6554_v6  ;;  %6166 = vmatprep.mubr.msk.bf16.mxu0 %vm701_vm4, %v5636_v2  ;;  %v4397_v6 = vrot.slane %v8759_v31, 5  ;;  %v5618_v2 = vld [vmem:[%s6807_s11 + $0xcc] sm:$0xe]  ;;  %v2267_v50 = vshrl.u32 %v5335_v32, 16  ;;  %v2270_v58 = vshll.u32 %v5335_v32, 16  ;;  %v4480_v32 = vrot.slane %v4478_v11, 4 }
 0x138   : > { %6012 = vmatprep.mubr.msk.bf16.mxu1 %vm701_vm4, %v6555_v20  ;;  %v6557_v20 = vld [vmem:[%s6807_s11 + $0x84] sm:$0xff]   ;;  %v5634_v30 = vrot.slane %v5618_v2, 9  ;;  %v6604_v2 = vld [vmem:[%s6807_s11 + $0x74] sm:$0x1] }
 0x139   : > { %v4398_v23 = vsel %vm7054_vm8, %v4396_v52, %v4397_v6  ;;  %v2269_v51 = vrot.slane %v2267_v50, 4  ;;  %v2272_v48 = vrot.slane %v2270_v58, 5  ;;  %v8366_v47 = vsel %vm7054_vm8, %v4480_v32, %v4481_v21  ;;  %v5341_v52 = vld [vmem:[%s6807_s11 + $0x84] sm:$0xf] }
 0x13a   : > { %v8361_v49 = vsel %vm7054_vm8, %v5634_v30, %v4478_v11  ;;  %v5639_v41 = vcombine.low %v4395_v57, %v4398_v23  ;;  %v2318_v5 = vshll.u32 %v5341_v52, 16  ;;  %v5344_v57 = vld [vmem:[%s6807_s11 + $0x90] sm:$0xf]  ;;  %v6560_v23 = vld [vmem:[%s6807_s11 + $0xa8] sm:$0xff]  }
 0x13b   : > { %v5651_v31 = vcombine.low %v8361_v49, %v8366_v47  ;;  %v2273_v6 = vor.u32 %v2272_v48, %v2269_v51  ;;  %v2339_v51 = vshrl.u32 %v5344_v57, 16  ;;  %v2342_v48 = vshll.u32 %v5344_v57, 16 }
 0x13d   : > { %v2274_v30 = vrot.slane %v2273_v6, 4  ;;  %v6607_v6 = vld [vmem:[%s6807_s11 + $0x8c] sm:$0x1]  ;;  %v2344_v60 = vrot.slane %v2342_v48, 5  ;;  %v6610_v48 = vld [vmem:[%s6807_s11 + $0xa4] sm:$0x1] }
 0x13e   : > { %6167 = vmatmul.mubr.msk.bf16.vlgmr.msra.gmra.mrb[0].mxu0 %vm701_vm4, %v5637_v26  ;;  %v2278_v26 = vrot.slane %v2276_v3, 5  ;;  %v5347_v3 = vld [vmem:[%s6807_s11 + $0x9c] sm:$0xf]  ;;  %v2334_v19 = vshll.u32 %v6607_v6, 16 }
 0x13f   : > { %6013 = vmatmul.mubr.msk.bf16.gmra.mrb[16].mxu1 %vm701_vm4, %v6556_v9  ;;  %6170 = vmatprep.mubr.msk.bf16.mxu0 %vm701_vm4, %v5638_v27  ;;  %v2286_v9 = vshll.u32 %v6604_v2, 16  ;;  %v2315_v27 = vshrl.u32 %v5341_v52, 16  ;;  %v2366_v52 = vshll.u32 %v5347_v3, 16 }
 0x140   : > { %6016 = vmatprep.mubr.msk.bf16.mxu1 %vm701_vm4, %v6557_v20  ;;  %v2283_v45 = vor.u32 %v2282_v29, %v2278_v26  ;;  %v6605_v20 = vld [vmem:[%s6807_s11 + $0x88] sm:$0xf]  ;;  %v2279_v32 = vsel %vm6833_vm5, %v2274_v30, %v2278_v26  ;;  %v2336_v30 = vrot.slane %v2334_v19, 5 }
 0x141   : > { %v2324_v50 = vshll.u32 %v6605_v20, 16  ;;  %v2328_v58 = vshrl.u32 %v6605_v20, 16  ;;  %v2288_v25 = vrot.slane %v2286_v9, 5  ;;  %v2317_v34 = vrot.slane %v2315_v27, 4 }
 0x142   : > { %v2284_v56 = vrot.slane %v2283_v45, 4  ;;  %v2376_v45 = vshrl.u32 %v6608_v0, 16  ;;  %v2341_v27 = vrot.slane %v2339_v51, 4  ;;  %v2368_v20 = vrot.slane %v2366_v52, 5 }
 0x143   : > { %v8385_v11 = vrot.slane %v2324_v50, 5  ;;  %v2330_v21 = vrot.slane %v2328_v58, 4  ;;  %v6562_v50 = vld [vmem:[%s6807_s11 + $0xc0] sm:$0xff]  }
 0x144   : > { %v2289_v26 = vsel %vm6833_vm5, %v2284_v56, %v2288_v25  ;;  %v5350_v56 = vld [vmem:[%s6807_s11 + $0xa8] sm:$0xf] }
 0x145   : > { %v2331_v9 = vor.u32 %v2330_v21, %v8385_v11  ;;  %v5368_v58 = vcombine.low %v2279_v32, %v2289_v26  ;;  %v2382_v32 = vshll.u32 %v6610_v48, 16  ;;  %v2390_v39 = vshll.u32 %v5350_v56, 16 }
 0x146   : > { %6171 = vmatmul.mubr.msk.bf16.gmra.mrb[4].mxu0 %vm701_vm4, %v5639_v41  ;;  %v6606_v41 = vld [vmem:[%s6807_s11 + $0x94] sm:$0xf] }
 0x147   : > { %6017 = vmatmul.mubr.msk.bf16.gmra.mrb[20].mxu1 %vm701_vm4, %v6558_v12  ;;  %6174 = vmatprep.mubr.msk.bf16.mxu0 %vm701_vm4, %v5640_v14  ;;  %v2320_v14 = vrot.slane %v2318_v5, 5  ;;  %v2348_v12 = vshll.u32 %v6606_v41, 16  ;;  %v2352_v29 = vshrl.u32 %v6606_v41, 16  ;;  %v2387_v41 = vshrl.u32 %v5350_v56, 16  ;;  %v5356_v56 = vld [vmem:[%s6807_s11 + $0xc0] sm:$0xf] }
 0x148   : > { %6020 = vmatprep.mubr.msk.bf16.mxu1 %vm701_vm4, %v6559_v59  ;;  %v2363_v59 = vshrl.u32 %v5347_v3, 16  ;;  %v6609_v3 = vld [vmem:[%s6807_s11 + $0x98] sm:$0x1] }
 0x149   : > { %v2321_v2 = vor.u32 %v2320_v14, %v2317_v34  ;;  %v8405_v36 = vrot.slane %v2348_v12, 5  ;;  %v2332_v34 = vrot.slane %v2331_v9, 4  ;;  %v2345_v14 = vor.u32 %v2344_v60, %v2341_v27  ;;  %v5353_v12 = vld [vmem:[%s6807_s11 + $0xb4] sm:$0xf] }
 0x14a   : > { %v2365_v5 = vrot.slane %v2363_v59, 4  ;;  %v2400_v59 = vshrl.u32 %v6611_v8, 16  ;;  %v2411_v35 = vshrl.u32 %v5353_v12, 16  ;;  %v2414_v13 = vshll.u32 %v5353_v12, 16 }
 0x14b   : > { %v2322_v25 = vrot.slane %v2321_v2, 4  ;;  %v2337_v26 = vsel %vm6833_vm5, %v2332_v34, %v2336_v30  ;;  %v2346_v6 = vrot.slane %v2345_v14, 4  ;;  %v2384_v9 = vrot.slane %v2382_v32, 5 }
 0x14c   : > { %v2369_v51 = vor.u32 %v2368_v20, %v2365_v5  ;;  %v2389_v27 = vrot.slane %v2387_v41, 4  ;;  %v2402_v20 = vrot.slane %v2400_v59, 4  ;;  %v6615_v41 = vld [vmem:[%s6807_s11 + $0xbc] sm:$0x1] }
 0x14d   : > { %v2327_v52 = vsel %vm6833_vm5, %v2322_v25, %v8385_v11  ;;  %v2351_v25 = vsel %vm6833_vm5, %v2346_v6, %v8405_v36  ;;  %v2430_v7 = vshll.u32 %v6615_v41, 16 }
 0x14e   : > { %6175 = vmatmul.mubr.msk.bf16.gmra.mrb[8].mxu0 %vm701_vm4, %v5641_v16  ;;  %v2372_v16 = vshll.u32 %v6608_v0, 16  ;;  %v2370_v2 = vrot.slane %v2369_v51, 4  ;;  %v5370_v11 = vcombine.low %v2327_v52, %v2337_v26 }
 0x14f   : > { %6021 = vmatmul.mubr.msk.bf16.gmra.mrb[24].mxu1 %vm701_vm4, %v6560_v23  ;;  %6178 = vmatprep.mubr.msk.bf16.mxu0 %vm701_vm4, %v5642_v28  ;;  %v2354_v28 = vrot.slane %v2352_v29, 4  ;;  %v2378_v23 = vrot.slane %v2376_v45, 4 }
 0x150   : > { %6024 = vmatprep.mubr.msk.bf16.mxu1 %vm701_vm4, %v6561_v4  ;;  %v8408_v57 = vrot.slane %v2372_v16, 5  ;;  %v2358_v4 = vshll.u32 %v6609_v3, 16 }
 0x151   : > { %v2355_v21 = vor.u32 %v2354_v28, %v8405_v36  ;;  %v2392_v28 = vrot.slane %v2390_v39, 5  ;;  %v6613_v36 = vld [vmem:[%s6807_s11 + $0xb0] sm:$0x1] }
 0x152   : > { %v2379_v29 = vor.u32 %v2378_v23, %v8408_v57  ;;  %v2360_v19 = vrot.slane %v2358_v4, 5  ;;  %v2375_v14 = vsel %vm6833_vm5, %v2370_v2, %v8408_v57  ;;  %v2406_v3 = vshll.u32 %v6613_v36, 16 }
 0x153   : > { %v2356_v45 = vrot.slane %v2355_v21, 4  ;;  %v2393_v62 = vor.u32 %v2392_v28, %v2389_v27  ;;  %v2435_v4 = vshrl.u32 %v5356_v56, 16  ;;  %v2438_v57 = vshll.u32 %v5356_v56, 16  ;;  %v6614_v21 = vld [vmem:[%s6807_s11 + $0xc4] sm:$0xf] }
 0x154   : > { %v2380_v60 = vrot.slane %v2379_v29, 4  ;;  %v2444_v51 = vshll.u32 %v6614_v21, 16  ;;  %v2448_v48 = vshrl.u32 %v6614_v21, 16  ;;  %v2408_v39 = vrot.slane %v2406_v3, 5 }
 0x155   : > { %v2361_v34 = vsel %vm6833_vm5, %v2356_v45, %v2360_v19  ;;  %v2394_v12 = vrot.slane %v2393_v62, 4  ;;  %v2432_v19 = vrot.slane %v2430_v7, 5  ;;  %v2456_v2 = vrot.slane %v2454_v15, 5 }
 0x156   : > { %6179 = vmatmul.mubr.msk.bf16.gmra.mrb[12].mxu0 %vm701_vm4, %v5643_v63  ;;  %v2396_v63 = vshll.u32 %v6611_v8, 16  ;;  %v2385_v22 = vsel %vm6833_vm5, %v2380_v60, %v2384_v9  ;;  %v5371_v33 = vcombine.low %v2351_v25, %v2361_v34  ;;  %v2437_v8 = vrot.slane %v2435_v4, 4 }
 0x157   : > { %6025 = vmatmul.mubr.msk.bf16.gmra.mrb[28].mxu1 %vm701_vm4, %v6562_v50  ;;  %6182 = vmatprep.mubr.msk.bf16.mxu0 %vm701_vm4, %v5644_v46  ;;  %v6612_v46 = vld [vmem:[%s6807_s11 + $0xb8] sm:$0xf]  ;;  %v2413_v50 = vrot.slane %v2411_v35, 4  ;;  %v2446_v59 = vrot.slane %v2444_v51, 5  ;;  %v2450_v52 = vrot.slane %v2448_v48, 4  ;;  %s5024_s11 = sshll.u32 %s8520_s9, 4  ;;  %s8621_s11 = int_to_ptr.vmem [resolvable:$true] %s5024_s11 }
 0x158   : > { %6046 = vmatprep.mubr.msk.bf16.mxu1 %vm701_vm4, %v5368_v58  ;;  %v2420_v0 = vshll.u32 %v6612_v46, 16  ;;  %v2424_v16 = vshrl.u32 %v6612_v46, 16  ;;  %v2398_v5 = vrot.slane %v2396_v63, 5  ;;  %v2416_v58 = vrot.slane %v2414_v13, 5  ;;  %s6617_s23 = scalar_lea.vmem %s8621_s11, 2048  ;;  %p6624_p1 = scmp.lt.s32.totalorder %s8621_s11, %s6622_s27 }
 0x159   : > { %v2440_v63 = vrot.slane %v2438_v57, 5  ;;  %p6618_p12 = scmp.ne.s32.totalorder %s8621_s11, %s6617_s23  ;;  %p6625_p2 = scmp.lt.s32.totalorder %s6623_s28, %s6617_s23 }
 0x15a   : > { %v2422_v30 = vrot.slane %v2420_v0, 5  ;;  %v2426_v23 = vrot.slane %v2424_v16, 4  ;;  %v2399_v35 = vsel %vm6833_vm5, %v2394_v12, %v2398_v5  ;;  %v2451_v0 = vor.u32 %v2450_v52, %v2446_v59 }
 0x15b   : > { %v2441_v46 = vor.u32 %v2440_v63, %v2437_v8  ;;  %p6619_p13 = pnand %p6618_p12, %p6761_p4  ;;  %p6626_p3 = por %p6625_p2, %p6624_p1 }
 0x15c   : > { %v2427_v32 = vor.u32 %v2426_v23, %v2422_v30  ;;  %v2452_v45 = vrot.slane %v2451_v0, 4  ;;  %v8512_v23 = vld [vmem:[%s8679_s2] ss:$0 sm:$0xff] }
 0x15d   : > { %v2442_v16 = vrot.slane %v2441_v46, 4  ;;  %p6620_p0 = pneg %p6619_p13 }
 0x15e   : > { %6183 = vmatmul.mubr.msk.bf16.gmra.mrb[16].mxu0 %vm701_vm4, %v5645_v43  ;;  %v2403_v43 = vor.u32 %v2402_v20, %v2398_v5  ;;  %v2428_v6 = vrot.slane %v2427_v32, 4  ;;  %v2457_v27 = vsel %vm6833_vm5, %v2452_v45, %v2456_v2 }
 0x15f   : > { %6047 = vmatmul.mubr.msk.bf16.vlgmr.msra.gmra.mrb[16].mxu1 %vm701_vm4, %v8214_v42  ;;  %6186 = vmatprep.mubr.msk.bf16.mxu0 %vm701_vm4, %v5646_v18  ;;  %v2417_v42 = vor.u32 %v2416_v58, %v2413_v50  ;;  %v5372_v18 = vcombine.low %v2375_v14, %v2385_v22  ;;  %v2447_v9 = vsel %vm6833_vm5, %v2442_v16, %v2446_v59  ;;  %p6627_p5 = pnand %p6626_p3, %p6620_p0 }
 0x160   : > { %6050 = vmatprep.mubr.msk.bf16.mxu1 %vm701_vm4, %v5370_v11  ;;  %v2404_v29 = vrot.slane %v2403_v43, 4  ;;  %v2433_v17 = vsel %vm6833_vm5, %v2428_v6, %v2432_v19  ;;  %v5375_v60 = vcombine.low %v2447_v9, %v2457_v27 }
 0x161   : > { %v2418_v26 = vrot.slane %v2417_v42, 4 }
 0x162   : > { %v2409_v13 = vsel %vm6833_vm5, %v2404_v29, %v2408_v39 }
 0x163   : > { %v5373_v55 = vcombine.low %v2399_v35, %v2409_v13 }
 0x166   : > { %6187 = vmatmul.mubr.msk.bf16.gmra.mrb[20].mxu0 %vm701_vm4, %v5647_v24  ;;  %v2423_v24 = vsel %vm6833_vm5, %v2418_v26, %v2422_v30 }
 0x167   : > { %6051 = vmatmul.mubr.msk.bf16.gmra.mrb[20].mxu1 %vm701_vm4, %v5371_v33  ;;  %6190 = vmatprep.mubr.msk.bf16.mxu0 %vm701_vm4, %v5648_v38  ;;  %v5374_v38 = vcombine.low %v2423_v24, %v2433_v17 }
 0x168   : > { %6054 = vmatprep.mubr.msk.bf16.mxu1 %vm701_vm4, %v5372_v18 }
 0x16e   : > { %6191 = vmatmul.mubr.msk.bf16.gmra.mrb[24].mxu0 %vm701_vm4, %v5649_v1 }
 0x16f   : > { %6055 = vmatmul.mubr.msk.bf16.gmra.mrb[24].mxu1 %vm701_vm4, %v5373_v55  ;;  %6194 = vmatprep.mubr.msk.bf16.mxu0 %vm701_vm4, %v5650_v44 }
 0x170   : > { %6058 = vmatprep.mubr.msk.bf16.mxu1 %vm701_vm4, %v5374_v38 }
 0x176   : > { %6195 = vmatmul.mubr.msk.bf16.gmra.mrb[28].mxu0 %vm701_vm4, %v5651_v31 }
 0x177   : > { %6059 = vmatmul.mubr.msk.bf16.gmra.mrb[28].mxu1 %vm701_vm4, %v5375_v60 }
 0x1f2   : > { %v5998_v54 = vpop.f32.mrb[0].mxu1 }
 0x1f3   : > { %v1867_v61 = vpop.f32.mrb[1].mxu1 }
 0x1f4   : > { %v5999_v1 = vpop.f32.mrb[2].mxu1 }
 0x1f5   : > { %v1870_v53 = vpop.f32.mrb[3].mxu1 }
 0x1fa   : > { %v6002_v40 = vpop.f32.mrb[4].mxu1 }
 0x1fb   : > { %v1883_v44 = vpop.f32.mrb[5].mxu1 }
 0x1fc   : > { %v6003_v28 = vpop.f32.mrb[6].mxu1 }
 0x1fd   : > { %v1886_v5 = vpop.f32.mrb[7].mxu1 }
 0x202   : > { %v6006_v37 = vpop.f32.mrb[8].mxu1 }
 0x203   : > { %v1899_v20 = vpop.f32.mrb[9].mxu1 }
 0x204   : > { %v8496_v11 = vpop.f32.mrb[10].mxu1 }
 0x205   : > { %v8498_v50 = vpop.f32.mrb[11].mxu1 }
 0x20a   : > { %v8500_v49 = vpop.f32.mrb[12].mxu1 }
 0x20b   : > { %v8502_v47 = vpop.f32.mrb[13].mxu1 }
 0x20c   : > { %v8504_v31 = vpop.f32.mrb[14].mxu1 }
 0x20d   : > { %v8506_v58 = vpop.f32.mrb[15].mxu1 }
 0x211   : > { %v6168_v30 = vpop.f32.mrb[0].mxu0 }
 0x212   : > { %v6200_v56 = vadd.f32 %v6168_v30, %v5998_v54  ;;  %v4618_v25 = vpop.f32.mrb[1].mxu0 }
 0x213   : > { %v6201_v34 = vadd.f32 %v4618_v25, %v1867_v61  ;;  %v6169_v14 = vpop.f32.mrb[2].mxu0 }
 0x214   : > { %v4786_v22 = vadd.f32 %v6200_v56, %v8512_v23  ;;  %v6202_v62 = vadd.f32 %v6169_v14, %v5999_v1  ;;  %v4621_v43 = vpop.f32.mrb[3].mxu0 }
 0x215   : > { %v4784_v36 = vadd.f32 %v6201_v34, %v8512_v23  ;;  %v6203_v3 = vadd.f32 %v4621_v43, %v1870_v53 }
 0x216   : > { %v4818_v4 = vmax.f32 %v4786_v22, 0.0  ;;  %v4787_v57 = vadd.f32 %v6202_v62, %v8512_v23 }
 0x217   : > { %v4816_v21 = vmax.f32 %v4784_v36, 0.0  ;;  %v4785_v51 = vadd.f32 %v6203_v3, %v8512_v23 }
 0x218   : > { %v5708_v48 = vpack.c.bf16 %v4818_v4, %v4818_v4  ;;  %v4819_v42 = vmax.f32 %v4787_v57, 0.0 }
 0x219   : > { %v5706_v32 = vpack.c.bf16 %v4816_v21, %v4816_v21  ;;  %v4817_v41 = vmax.f32 %v4785_v51, 0.0  ;;  %v6172_v7 = vpop.f32.mrb[4].mxu0 }
 0x21a   : > { %4979 = vst.msk [vmem:[%s8520_s9 + $0x8] sm:$0xf] %vm4976_vm9, %v5708_v48  ;;  %v5709_v33 = vpack.c.bf16 %v4819_v42, %v4819_v42  ;;  %v6204_v18 = vadd.f32 %v6172_v7, %v6002_v40  ;;  %v4634_v12 = vpop.f32.mrb[5].mxu0 }
 0x21b   : > { %4977 = vst.msk [vmem:[%s8520_s9] sm:$0xf] %vm4976_vm9, %v5706_v32  ;;  %v5707_v29 = vpack.c.bf16 %v4817_v41, %v4817_v41  ;;  %v6205_v39 = vadd.f32 %v4634_v12, %v1883_v44  ;;  %v6173_v8 = vpop.f32.mrb[6].mxu0 }
 0x21c   : > { %4980 = vst.msk [vmem:[%s8520_s9 + $0xc] sm:$0xf] %vm4976_vm9, %v5709_v33  ;;  %v4790_v63 = vadd.f32 %v6204_v18, %v8512_v23  ;;  %v6206_v59 = vadd.f32 %v6173_v8, %v6003_v28  ;;  %v4637_v52 = vpop.f32.mrb[7].mxu0 }
 0x21d   : > { %4978 = vst.msk [vmem:[%s8520_s9 + $0x4] sm:$0xf] %vm4976_vm9, %v5707_v29  ;;  %v4788_v26 = vadd.f32 %v6205_v39, %v8512_v23  ;;  %v6207_v6 = vadd.f32 %v4637_v52, %v1886_v5 }
 0x21e   : > { %v4822_v19 = vmax.f32 %v4790_v63, 0.0  ;;  %v4791_v35 = vadd.f32 %v6206_v59, %v8512_v23 }
 0x21f   : > { %v4820_v13 = vmax.f32 %v4788_v26, 0.0  ;;  %v4789_v46 = vadd.f32 %v6207_v6, %v8512_v23 }
 0x220   : > { %v5712_v0 = vpack.c.bf16 %v4822_v19, %v4822_v19  ;;  %v4823_v10 = vmax.f32 %v4791_v35, 0.0 }
 0x221   : > { %v5710_v15 = vpack.c.bf16 %v4820_v13, %v4820_v13  ;;  %v4821_v24 = vmax.f32 %v4789_v46, 0.0  ;;  %v6176_v17 = vpop.f32.mrb[8].mxu0 }
 0x222   : > { %4983 = vst.msk [vmem:[%s8520_s9 + $0x18] sm:$0xf] %vm4976_vm9, %v5712_v0  ;;  %v5713_v55 = vpack.c.bf16 %v4823_v10, %v4823_v10  ;;  %v6208_v38 = vadd.f32 %v6176_v17, %v6006_v37  ;;  %v4650_v16 = vpop.f32.mrb[9].mxu0 }
 0x223   : > { %4981 = vst.msk [vmem:[%s8520_s9 + $0x10] sm:$0xf] %vm4976_vm9, %v5710_v15  ;;  %v5711_v45 = vpack.c.bf16 %v4821_v24, %v4821_v24  ;;  %v6209_v2 = vadd.f32 %v4650_v16, %v1899_v20  ;;  %v6177_v9 = vpop.f32.mrb[10].mxu0 }
 0x224   : > { %4984 = vst.msk [vmem:[%s8520_s9 + $0x1c] sm:$0xf] %vm4976_vm9, %v5713_v55  ;;  %v4794_v27 = vadd.f32 %v6208_v38, %v8512_v23  ;;  %v6210_v60 = vadd.f32 %v6177_v9, %v8496_v11  ;;  %v4653_v54 = vpop.f32.mrb[11].mxu0 }
 0x225   : > { %4982 = vst.msk [vmem:[%s8520_s9 + $0x14] sm:$0xf] %vm4976_vm9, %v5711_v45  ;;  %v4792_v61 = vadd.f32 %v6209_v2, %v8512_v23  ;;  %v6211_v1 = vadd.f32 %v4653_v54, %v8498_v50 }
 0x226   : > { %v4826_v53 = vmax.f32 %v4794_v27, 0.0  ;;  %v4795_v40 = vadd.f32 %v6210_v60, %v8512_v23 }
 0x227   : > { %v4824_v44 = vmax.f32 %v4792_v61, 0.0  ;;  %v4793_v28 = vadd.f32 %v6211_v1, %v8512_v23 }
 0x228   : > { %v5716_v5 = vpack.c.bf16 %v4826_v53, %v4826_v53  ;;  %v4827_v37 = vmax.f32 %v4795_v40, 0.0 }
 0x229   : > { %v5714_v20 = vpack.c.bf16 %v4824_v44, %v4824_v44  ;;  %v4825_v11 = vmax.f32 %v4793_v28, 0.0  ;;  %v6180_v30 = vpop.f32.mrb[12].mxu0 }
 0x22a   : > { %4987 = vst.msk [vmem:[%s8520_s9 + $0x28] sm:$0xf] %vm4976_vm9, %v5716_v5  ;;  %v5717_v56 = vpack.c.bf16 %v4827_v37, %v4827_v37  ;;  %v6212_v25 = vadd.f32 %v6180_v30, %v8500_v49  ;;  %v4666_v34 = vpop.f32.mrb[13].mxu0 }
 0x22b   : > { %4985 = vst.msk [vmem:[%s8520_s9 + $0x20] sm:$0xf] %vm4976_vm9, %v5714_v20  ;;  %v5715_v50 = vpack.c.bf16 %v4825_v11, %v4825_v11  ;;  %v6213_v14 = vadd.f32 %v4666_v34, %v8502_v47  ;;  %v6181_v22 = vpop.f32.mrb[14].mxu0 }
 0x22c   : > { %4988 = vst.msk [vmem:[%s8520_s9 + $0x2c] sm:$0xf] %vm4976_vm9, %v5717_v56  ;;  %v4798_v62 = vadd.f32 %v6212_v25, %v8512_v23  ;;  %v6214_v43 = vadd.f32 %v6181_v22, %v8504_v31  ;;  %v4669_v36 = vpop.f32.mrb[15].mxu0 }
 0x22d   : > { %4986 = vst.msk [vmem:[%s8520_s9 + $0x24] sm:$0xf] %vm4976_vm9, %v5715_v50  ;;  %v4796_v49 = vadd.f32 %v6213_v14, %v8512_v23  ;;  %v6215_v3 = vadd.f32 %v4669_v36, %v8506_v58 }
 0x22e   : > { %v4830_v4 = vmax.f32 %v4798_v62, 0.0  ;;  %v4799_v57 = vadd.f32 %v6214_v43, %v8512_v23 }
 0x22f   : > { %v4828_v47 = vmax.f32 %v4796_v49, 0.0  ;;  %v4797_v21 = vadd.f32 %v6215_v3, %v8512_v23 }
 0x230   : > { %v5720_v51 = vpack.c.bf16 %v4830_v4, %v4830_v4  ;;  %v4831_v48 = vmax.f32 %v4799_v57, 0.0 }
 0x231   : > { %v5718_v42 = vpack.c.bf16 %v4828_v47, %v4828_v47  ;;  %v4829_v31 = vmax.f32 %v4797_v21, 0.0  ;;  %v6184_v32 = vpop.f32.mrb[16].mxu0 }
 0x232   : > { %4991 = vst.msk [vmem:[%s8520_s9 + $0x38] sm:$0xf] %vm4976_vm9, %v5720_v51  ;;  %v5721_v41 = vpack.c.bf16 %v4831_v48, %v4831_v48  ;;  %v6048_v7 = vpop.f32.mrb[16].mxu1  ;;  %v4682_v33 = vpop.f32.mrb[17].mxu0 }
 0x233   : > { %4989 = vst.msk [vmem:[%s8520_s9 + $0x30] sm:$0xf] %vm4976_vm9, %v5718_v42  ;;  %v5719_v58 = vpack.c.bf16 %v4829_v31, %v4829_v31  ;;  %v6216_v18 = vadd.f32 %v6184_v32, %v6048_v7  ;;  %v2657_v12 = vpop.f32.mrb[17].mxu1  ;;  %v6185_v29 = vpop.f32.mrb[18].mxu0 }
 0x234   : > { %4992 = vst.msk [vmem:[%s8520_s9 + $0x3c] sm:$0xf] %vm4976_vm9, %v5721_v41  ;;  %v6217_v39 = vadd.f32 %v4682_v33, %v2657_v12  ;;  %v6049_v8 = vpop.f32.mrb[18].mxu1  ;;  %v4685_v63 = vpop.f32.mrb[19].mxu0 }
 0x235   : > { %4990 = vst.msk [vmem:[%s8520_s9 + $0x34] sm:$0xf] %vm4976_vm9, %v5719_v58  ;;  %v4802_v59 = vadd.f32 %v6216_v18, %v8512_v23  ;;  %v6218_v52 = vadd.f32 %v6185_v29, %v6049_v8  ;;  %v2660_v26 = vpop.f32.mrb[19].mxu1 }
 0x236   : > { %v4800_v6 = vadd.f32 %v6217_v39, %v8512_v23  ;;  %v6219_v19 = vadd.f32 %v4685_v63, %v2660_v26 }
 0x237   : > { %v4834_v35 = vmax.f32 %v4802_v59, 0.0  ;;  %v4803_v13 = vadd.f32 %v6218_v52, %v8512_v23 }
 0x238   : > { %v4832_v46 = vmax.f32 %v4800_v6, 0.0  ;;  %v4801_v0 = vadd.f32 %v6219_v19, %v8512_v23 }
 0x239   : > { %v5724_v10 = vpack.c.bf16 %v4834_v35, %v4834_v35  ;;  %v4835_v15 = vmax.f32 %v4803_v13, 0.0  ;;  %v6188_v24 = vpop.f32.mrb[20].mxu0 }
 0x23a   : > { %v5722_v17 = vpack.c.bf16 %v4832_v46, %v4832_v46  ;;  %v4833_v55 = vmax.f32 %v4801_v0, 0.0  ;;  %v6052_v38 = vpop.f32.mrb[20].mxu1  ;;  %v4698_v16 = vpop.f32.mrb[21].mxu0 }
 0x23b   : > { %4995 = vst.msk [vmem:[%s8520_s9 + $0x48] sm:$0xf] %vm4976_vm9, %v5724_v10  ;;  %v5725_v45 = vpack.c.bf16 %v4835_v15, %v4835_v15  ;;  %v6220_v2 = vadd.f32 %v6188_v24, %v6052_v38  ;;  %v2673_v9 = vpop.f32.mrb[21].mxu1  ;;  %v6189_v27 = vpop.f32.mrb[22].mxu0 }
 0x23c   : > { %4993 = vst.msk [vmem:[%s8520_s9 + $0x40] sm:$0xf] %vm4976_vm9, %v5722_v17  ;;  %v5723_v60 = vpack.c.bf16 %v4833_v55, %v4833_v55  ;;  %v6221_v54 = vadd.f32 %v4698_v16, %v2673_v9  ;;  %v6053_v61 = vpop.f32.mrb[22].mxu1  ;;  %v4701_v1 = vpop.f32.mrb[23].mxu0 }
 0x23d   : > { %4996 = vst.msk [vmem:[%s8520_s9 + $0x4c] sm:$0xf] %vm4976_vm9, %v5725_v45  ;;  %v4806_v53 = vadd.f32 %v6220_v2, %v8512_v23  ;;  %v6222_v40 = vadd.f32 %v6189_v27, %v6053_v61  ;;  %v2676_v44 = vpop.f32.mrb[23].mxu1 }
 0x23e   : > { %4994 = vst.msk [vmem:[%s8520_s9 + $0x44] sm:$0xf] %vm4976_vm9, %v5723_v60  ;;  %v4804_v28 = vadd.f32 %v6221_v54, %v8512_v23  ;;  %v6223_v5 = vadd.f32 %v4701_v1, %v2676_v44 }
 0x23f   : > { %v4838_v37 = vmax.f32 %v4806_v53, 0.0  ;;  %v4807_v20 = vadd.f32 %v6222_v40, %v8512_v23 }
 0x240   : > { %v4836_v11 = vmax.f32 %v4804_v28, 0.0  ;;  %v4805_v30 = vadd.f32 %v6223_v5, %v8512_v23 }
 0x241   : > { %v5728_v56 = vpack.c.bf16 %v4838_v37, %v4838_v37  ;;  %v4839_v25 = vmax.f32 %v4807_v20, 0.0  ;;  %v6192_v34 = vpop.f32.mrb[24].mxu0 }
 0x242   : > { %v5726_v50 = vpack.c.bf16 %v4836_v11, %v4836_v11  ;;  %v4837_v14 = vmax.f32 %v4805_v30, 0.0  ;;  %v6056_v22 = vpop.f32.mrb[24].mxu1  ;;  %v4714_v62 = vpop.f32.mrb[25].mxu0 }
 0x243   : > { %4999 = vst.msk [vmem:[%s8520_s9 + $0x58] sm:$0xf] %vm4976_vm9, %v5728_v56  ;;  %v5729_v43 = vpack.c.bf16 %v4839_v25, %v4839_v25  ;;  %v6224_v36 = vadd.f32 %v6192_v34, %v6056_v22  ;;  %v2689_v49 = vpop.f32.mrb[25].mxu1  ;;  %v6193_v3 = vpop.f32.mrb[26].mxu0 }
 0x244   : > { %4997 = vst.msk [vmem:[%s8520_s9 + $0x50] sm:$0xf] %vm4976_vm9, %v5726_v50  ;;  %v5727_v4 = vpack.c.bf16 %v4837_v14, %v4837_v14  ;;  %v6225_v57 = vadd.f32 %v4714_v62, %v2689_v49  ;;  %v6057_v47 = vpop.f32.mrb[26].mxu1  ;;  %v4717_v21 = vpop.f32.mrb[27].mxu0 }
 0x245   : > { %5000 = vst.msk [vmem:[%s8520_s9 + $0x5c] sm:$0xf] %vm4976_vm9, %v5729_v43  ;;  %v4810_v51 = vadd.f32 %v6224_v36, %v8512_v23  ;;  %v6226_v48 = vadd.f32 %v6193_v3, %v6057_v47  ;;  %v2692_v42 = vpop.f32.mrb[27].mxu1 }
 0x246   : > { %4998 = vst.msk [vmem:[%s8520_s9 + $0x54] sm:$0xf] %vm4976_vm9, %v5727_v4  ;;  %v4808_v31 = vadd.f32 %v6225_v57, %v8512_v23  ;;  %v6227_v32 = vadd.f32 %v4717_v21, %v2692_v42 }
 0x247   : > { %v4842_v41 = vmax.f32 %v4810_v51, 0.0  ;;  %v4811_v7 = vadd.f32 %v6226_v48, %v8512_v23 }
 0x248   : > { %v4840_v33 = vmax.f32 %v4808_v31, 0.0  ;;  %v4809_v58 = vadd.f32 %v6227_v32, %v8512_v23 }
 0x249   : > { %v5732_v18 = vpack.c.bf16 %v4842_v41, %v4842_v41  ;;  %v4843_v12 = vmax.f32 %v4811_v7, 0.0  ;;  %v6196_v29 = vpop.f32.mrb[28].mxu0 }
 0x24a   : > { %v5730_v39 = vpack.c.bf16 %v4840_v33, %v4840_v33  ;;  %v4841_v8 = vmax.f32 %v4809_v58, 0.0  ;;  %v6060_v63 = vpop.f32.mrb[28].mxu1  ;;  %v4730_v59 = vpop.f32.mrb[29].mxu0 }
 0x24b   : > { %5003 = vst.msk [vmem:[%s8520_s9 + $0x68] sm:$0xf] %vm4976_vm9, %v5732_v18  ;;  %v5733_v52 = vpack.c.bf16 %v4843_v12, %v4843_v12  ;;  %v6228_v26 = vadd.f32 %v6196_v29, %v6060_v63  ;;  %v2705_v6 = vpop.f32.mrb[29].mxu1  ;;  %v6197_v19 = vpop.f32.mrb[30].mxu0 }
 0x24c   : > { %5001 = vst.msk [vmem:[%s8520_s9 + $0x60] sm:$0xf] %vm4976_vm9, %v5730_v39  ;;  %v5731_v35 = vpack.c.bf16 %v4841_v8, %v4841_v8  ;;  %v6229_v13 = vadd.f32 %v4730_v59, %v2705_v6  ;;  %v6061_v46 = vpop.f32.mrb[30].mxu1  ;;  %v4733_v0 = vpop.f32.mrb[31].mxu0 }
 0x24d   : > { %5004 = vst.msk [vmem:[%s8520_s9 + $0x6c] sm:$0xf] %vm4976_vm9, %v5733_v52  ;;  %v4814_v10 = vadd.f32 %v6228_v26, %v8512_v23  ;;  %v6230_v15 = vadd.f32 %v6197_v19, %v6061_v46  ;;  %v2708_v24 = vpop.f32.mrb[31].mxu1 }
 0x24e   : > { %5002 = vst.msk [vmem:[%s8520_s9 + $0x64] sm:$0xf] %vm4976_vm9, %v5731_v35  ;;  %v4812_v17 = vadd.f32 %v6229_v13, %v8512_v23  ;;  %v6231_v55 = vadd.f32 %v4733_v0, %v2708_v24 }
 0x24f   : > { %v4846_v38 = vmax.f32 %v4814_v10, 0.0  ;;  %v4815_v16 = vadd.f32 %v6230_v15, %v8512_v23 }
 0x250   : > { %v4844_v45 = vmax.f32 %v4812_v17, 0.0  ;;  %v4813_v2 = vadd.f32 %v6231_v55, %v8512_v23 }
 0x251   : > { %v5736_v9 = vpack.c.bf16 %v4846_v38, %v4846_v38  ;;  %v4847_v27 = vmax.f32 %v4815_v16, 0.0 }
 0x252   : > { %v5734_v60 = vpack.c.bf16 %v4844_v45, %v4844_v45  ;;  %v4845_v54 = vmax.f32 %v4813_v2, 0.0 }
 0x253   : > { %5007 = vst.msk [vmem:[%s8520_s9 + $0x78] sm:$0xf] %vm4976_vm9, %v5736_v9  ;;  %v5737_v61 = vpack.c.bf16 %v4847_v27, %v4847_v27 }
 0x254   : > { %5005 = vst.msk [vmem:[%s8520_s9 + $0x70] sm:$0xf] %vm4976_vm9, %v5734_v60  ;;  %v5735_v23 = vpack.c.bf16 %v4845_v54, %v4845_v54 }
 0x255   : > { %5008 = vst.msk [vmem:[%s8520_s9 + $0x7c] sm:$0xf] %vm4976_vm9, %v5737_v61 }
 0x256   : > { %5006 = vst.msk [vmem:[%s8520_s9 + $0x74] sm:$0xf] %vm4976_vm9, %v5735_v23 }
 0x257   : > { %6630 = shalt.err (!%p6627_p5)
}
 0x258   : > { %s6631_s29 = scalar_lea.hbm %s8619_s21, 2048  ;;  %s6635_s5 = scalar_lea.hbm %s8680_s3, 4096 }
 0x259   : > { %p6632_p6 = scmp.ne.s32.totalorder %s8619_s21, %s6631_s29  ;;  %p6636_p10 = scmp.lt.u32.totalorder %s8619_s21, %s8680_s3 }
 0x25a   : > { %p6637_p11 = scmp.lt.u32.totalorder %s6635_s5, %s6631_s29  ;;  %p6639_p13 = scmp.lt.u32.totalorder %s6631_s29, %s8619_s21 }
 0x25b   : > { %p6633_p7 = pnand %p6632_p6, %p6761_p4 }
 0x25c   : > { %p6638_p12 = por %p6637_p11, %p6636_p10 }
 0x25d   : > { %p6634_p9 = pneg %p6633_p7 }
 0x25e   : > { %p6640_p0 = por %p6639_p13, %p6638_p12 }
 0x260   : > { %p6641_p1 = pnand %p6640_p0, %p6634_p9 }
 0x262   : > { %6644 = shalt.err (!%p6641_p1)
}
 0x263   : > { %s6699_s8 = smov 64   ;;  %s6700_s9 = smov 4  }
 0x264   : > { %6457 = dma.vmem_to_hbm [thread:$0]  (%p6761_p4), %s8621_s11, 2048, %s8619_s21, %s8631_s15, %s6699_s8, %s6699_s8, %s6700_s9  }
 0x265 PF: > { %p6463_p2 = scmp.ge.s32.totalorder %s6695_s17, 2  ;;  %s5039_s10 = sand.u32 1, %s6675_s12  }
 0x266   : > { %s5040_s18 = scalar_lea.sflag [#allocation3], %s5039_s10 }
 0x267   : > { %p6460_p3 = pnand %p6463_p2, %p6768_p8 }
 0x269   : > { %6670 = dma.done.wait (!%p6460_p3), %s5040_s18, 2048  }
 0x26a   : > { %6672 = vsyncadd (!%p6460_p3), %s5040_s18, 4294965248  ;;  %s16_s17 = sadd.s32 1, %s6695_s17   ;;  %s8760_s12 = smov %s6679_s13 }
 0x26b   : > { %p13_p5 = scmp.ge.s32.totalorder %s16_s17, 4   ;;  %s8761_s13 = smov %s6683_s14 }
 0x26c   : > { %s8762_s14 = smov %s6774_s25  ;;  %s8763_s15 = smov %s6691_s16 }
 0x26d   : > { %s8764_s16 = smov %s8766_s20  ;;  %15 = sbr.rel (!%p13_p5) target bundleno = 4 (0x4), region = 83 }
 0x274   :  { %5045 = vsyncpa [#allocation3], 1 }
 0x275   :  { %5047 = vsyncpa [#allocation3 + $0x1], 1 }

</bundles_post_ra>
